<compile_context>
chip_gen: v7x
topology: tpu7x:2x2x1
jax: 0.10.0
libtpu: 0.0.40
codegen_flags: <defaults>
</compile_context>

<pallas_src>
import functools

import jax
import jax.numpy as jnp
import numpy as np
from jax.experimental import pallas as pl
from jax.experimental.pallas import tpu as pltpu


# ----------------------------------------------------------------------------
# Fused Pallas kernel: 3 stacked LSTM layers + final Linear, all in VMEM.
# ----------------------------------------------------------------------------
def _lstm_cell(xh, w_gates, c):
    """One LSTM cell update.

    xh      : (B, K) concatenated [x_t, h, 1]  (bias folded via ones column)
    w_gates : tuple of 4 (K, H) weights, PyTorch gate order (i, f, g, o)
    c       : (B, H) previous cell state
    returns (h_new, c_new)
    """
    i_g = jax.nn.sigmoid(jnp.dot(xh, w_gates[0], preferred_element_type=jnp.float32))
    f_g = jax.nn.sigmoid(jnp.dot(xh, w_gates[1], preferred_element_type=jnp.float32))
    g_g = jnp.tanh(jnp.dot(xh, w_gates[2], preferred_element_type=jnp.float32))
    o_g = jax.nn.sigmoid(jnp.dot(xh, w_gates[3], preferred_element_type=jnp.float32))
    c_new = f_g * c + i_g * g_g
    h_new = o_g * jnp.tanh(c_new)
    return h_new, c_new


def make_fused_lstm_kernel(num_layers):
    def kernel(*refs):
        x_ref = refs[0]                      # (B, T, D)  batch-first, full block
        w_refs = refs[1:1 + num_layers]      # each (4, Din_l + H_l + 1, H_l)
        fcw_ref = refs[1 + num_layers]       # (H_last, O)
        fcb_ref = refs[2 + num_layers]       # (1, O)
        out_ref = refs[3 + num_layers]       # (B, O)

        B, T, _ = x_ref.shape
        x = x_ref[...]                                   # one VMEM load of the sequence
        ones_col = jnp.ones((B, 1), jnp.float32)         # hoisted (bias fold column)

        # Load + split per-gate weights once (loop-invariant values).
        w_gates = []
        hs, cs = [], []
        for w_ref in w_refs:
            w_gates.append(tuple(w_ref[g] for g in range(4)))
            h_dim = w_ref.shape[-1]
            hs.append(jnp.zeros((B, h_dim), jnp.float32))
            cs.append(jnp.zeros((B, h_dim), jnp.float32))

        # Fully unrolled, static time loop (T is small); recurrence is sequential.
        for t in range(T):
            inp = x[:, t, :]                             # (B, D) static slice
            for layer in range(num_layers):
                xh = jnp.concatenate([inp, hs[layer], ones_col], axis=-1)
                hs[layer], cs[layer] = _lstm_cell(xh, w_gates[layer], cs[layer])
                inp = hs[layer]
            # nn.Dropout(p=0.1): identity in eval mode

        # Final Linear on out[:, -1, :] (last layer, last timestep) only.
        out_ref[...] = (
            jnp.dot(hs[-1], fcw_ref[...], preferred_element_type=jnp.float32)
            + fcb_ref[...]
        )

    return kernel


def lstm_rnn_forward(x_bf, packed):
    """Fused forward.  x_bf: (B, T, D) batch-first; packed: see pack_params()."""
    B, T, D = x_bf.shape
    w_list = packed["w_gates"]
    fc_w, fc_b = packed["fc_w"], packed["fc_b"]
    num_layers = len(w_list)
    O = fc_w.shape[1]

    in_specs = [pl.BlockSpec((B, T, D), lambda: (0, 0, 0))]
    for w in w_list:
        in_specs.append(pl.BlockSpec(w.shape, lambda: (0, 0, 0)))
    in_specs.append(pl.BlockSpec(fc_w.shape, lambda: (0, 0)))
    in_specs.append(pl.BlockSpec(fc_b.shape, lambda: (0, 0)))

    return pl.pallas_call(
        make_fused_lstm_kernel(num_layers),
        out_shape=jax.ShapeDtypeStruct((B, O), jnp.float32),
        in_specs=in_specs,
        out_specs=pl.BlockSpec((B, O), lambda: (0, 0)),
    )(x_bf, *w_list, fc_w, fc_b)


# ----------------------------------------------------------------------------
# Parameter init (mirrors nn.LSTM / nn.Linear U(-k, k), k=1/sqrt(H)) + packing
# ----------------------------------------------------------------------------
def init_params(key, input_dim, hidden_dim, output_dim):
    params = {"lstm": []}
    dims = [input_dim] + list(hidden_dim)
    for li in range(len(hidden_dim)):
        d_in, h = dims[li], dims[li + 1]
        k = 1.0 / np.sqrt(h)
        key, k1, k2, k3, k4 = jax.random.split(key, 5)
        wih = jax.random.uniform(k1, (d_in, 4 * h), jnp.float32, -k, k)
        whh = jax.random.uniform(k2, (h, 4 * h), jnp.float32, -k, k)
        b_ih = jax.random.uniform(k3, (4 * h,), jnp.float32, -k, k)
        b_hh = jax.random.uniform(k4, (4 * h,), jnp.float32, -k, k)
        params["lstm"].append((wih, whh, b_ih + b_hh))        # combined bias (4H,)
    h_last = hidden_dim[-1]
    k = 1.0 / np.sqrt(h_last)
    key, k1, k2 = jax.random.split(key, 3)
    params["fc_w"] = jax.random.uniform(k1, (h_last, output_dim), jnp.float32, -k, k)
    params["fc_b"] = jax.random.uniform(k2, (1, output_dim), jnp.float32, -k, k)
    return params


def pack_params(params):
    """Build fused per-gate weights (4, Din+H+1, H): [Wih; Whh; bias-row] per gate."""
    w_gates = []
    for wih, whh, b in params["lstm"]:
        h = whh.shape[0]
        w_full = jnp.concatenate([wih, whh, b[None, :]], axis=0)   # (Din+H+1, 4H)
        w_gates.append(
            jnp.stack([w_full[:, g * h:(g + 1) * h] for g in range(4)], axis=0)
        )                                                          # (4, Din+H+1, H)
    return {"w_gates": w_gates, "fc_w": params["fc_w"], "fc_b": params["fc_b"]}


# ----------------------------------------------------------------------------
# Pure-JAX reference (lax.scan) for correctness check
# ----------------------------------------------------------------------------
def _lstm_layer_ref(x_tm, wih, whh, b):
    T, B, _ = x_tm.shape
    H = whh.shape[0]
    prec = jax.lax.Precision.HIGHEST

    def step(carry, x_t):
        h, c = carry
        gates = (jnp.dot(x_t, wih, precision=prec)
                 + jnp.dot(h, whh, precision=prec) + b)
        i_g = jax.nn.sigmoid(gates[:, :H])
        f_g = jax.nn.sigmoid(gates[:, H:2 * H])
        g_g = jnp.tanh(gates[:, 2 * H:3 * H])
        o_g = jax.nn.sigmoid(gates[:, 3 * H:])
        c = f_g * c + i_g * g_g
        h = o_g * jnp.tanh(c)
        return (h, c), h

    init = (jnp.zeros((B, H), jnp.float32), jnp.zeros((B, H), jnp.float32))
    _, hs = jax.lax.scan(step, init, x_tm)
    return hs


def lstm_rnn_forward_ref(x_bf, params):
    out = jnp.transpose(x_bf, (1, 0, 2))
    for (wih, whh, b) in params["lstm"]:
        out = _lstm_layer_ref(out, wih, whh, b)
    return (jnp.dot(out[-1], params["fc_w"], precision=jax.lax.Precision.HIGHEST)
            + params["fc_b"])


# ----------------------------------------------------------------------------
if __name__ == "__main__":
    # Small shapes consistent with the module's forward:
    #   x: (batch, seq, input_dim), hidden_dim list of 3, output_dim
    B, T, D = 8, 8, 16
    hidden_dim = [32, 16, 8]
    output_dim = 4

    key = jax.random.PRNGKey(0)
    key, kx = jax.random.split(key)
    x = jax.random.normal(kx, (B, T, D), dtype=jnp.float32)

    params = init_params(key, D, hidden_dim, output_dim)
    packed = jax.tree_util.tree_map(jnp.asarray, pack_params(params))

    fwd = jax.jit(functools.partial(lstm_rnn_forward, packed=packed))
    out = jax.block_until_ready(fwd(x))
    assert out.shape == (B, output_dim), out.shape

    ref = jax.block_until_ready(lstm_rnn_forward_ref(x, params))
    np.testing.assert_allclose(np.asarray(out), np.asarray(ref),
                               rtol=1e-4, atol=1e-4)

    print("KERNEL_OK")
</pallas_src>

<mosaic_0001>
module attributes {stable_mosaic.version = 11 : i64} {
  func.func @kernel(%arg0: memref<8x8x16xf32, #tpu.memory_space<vmem>>, %arg1: memref<4x49x32xf32, #tpu.memory_space<vmem>>, %arg2: memref<4x49x16xf32, #tpu.memory_space<vmem>>, %arg3: memref<4x25x8xf32, #tpu.memory_space<vmem>>, %arg4: memref<8x4xf32, #tpu.memory_space<vmem>>, %arg5: memref<1x4xf32, #tpu.memory_space<vmem>>, %arg6: memref<8x4xf32, #tpu.memory_space<vmem>>) attributes {dimension_semantics = [], scalar_prefetch = 0 : i64, scratch_operands = 0 : i64, tpu.core_type = #tpu.core_type<tc>} {
    %c0 = arith.constant 0 : index
    %c0_0 = arith.constant 0 : index
    %c0_1 = arith.constant 0 : index
    %0 = vector.load %arg0[%c0, %c0_0, %c0_1] : memref<8x8x16xf32, #tpu.memory_space<vmem>>, vector<8x8x16xf32>
    %cst = arith.constant 1.000000e+00 : f32
    %1 = vector.broadcast %cst : f32 to vector<8x1xf32>
    %c0_2 = arith.constant 0 : index
    %c0_3 = arith.constant 0 : index
    %c0_4 = arith.constant 0 : index
    %2 = vector.load %arg1[%c0_2, %c0_3, %c0_4] : memref<4x49x32xf32, #tpu.memory_space<vmem>>, vector<1x49x32xf32>
    %3 = vector.shape_cast %2 : vector<1x49x32xf32> to vector<49x32xf32>
    %c1 = arith.constant 1 : index
    %c0_5 = arith.constant 0 : index
    %c0_6 = arith.constant 0 : index
    %4 = vector.load %arg1[%c1, %c0_5, %c0_6] : memref<4x49x32xf32, #tpu.memory_space<vmem>>, vector<1x49x32xf32>
    %5 = vector.shape_cast %4 : vector<1x49x32xf32> to vector<49x32xf32>
    %c2 = arith.constant 2 : index
    %c0_7 = arith.constant 0 : index
    %c0_8 = arith.constant 0 : index
    %6 = vector.load %arg1[%c2, %c0_7, %c0_8] : memref<4x49x32xf32, #tpu.memory_space<vmem>>, vector<1x49x32xf32>
    %7 = vector.shape_cast %6 : vector<1x49x32xf32> to vector<49x32xf32>
    %c3 = arith.constant 3 : index
    %c0_9 = arith.constant 0 : index
    %c0_10 = arith.constant 0 : index
    %8 = vector.load %arg1[%c3, %c0_9, %c0_10] : memref<4x49x32xf32, #tpu.memory_space<vmem>>, vector<1x49x32xf32>
    %9 = vector.shape_cast %8 : vector<1x49x32xf32> to vector<49x32xf32>
    %cst_11 = arith.constant 0.000000e+00 : f32
    %10 = vector.broadcast %cst_11 : f32 to vector<8x32xf32>
    %cst_12 = arith.constant 0.000000e+00 : f32
    %11 = vector.broadcast %cst_12 : f32 to vector<8x32xf32>
    %c0_13 = arith.constant 0 : index
    %c0_14 = arith.constant 0 : index
    %c0_15 = arith.constant 0 : index
    %12 = vector.load %arg2[%c0_13, %c0_14, %c0_15] : memref<4x49x16xf32, #tpu.memory_space<vmem>>, vector<1x49x16xf32>
    %13 = vector.shape_cast %12 : vector<1x49x16xf32> to vector<49x16xf32>
    %c1_16 = arith.constant 1 : index
    %c0_17 = arith.constant 0 : index
    %c0_18 = arith.constant 0 : index
    %14 = vector.load %arg2[%c1_16, %c0_17, %c0_18] : memref<4x49x16xf32, #tpu.memory_space<vmem>>, vector<1x49x16xf32>
    %15 = vector.shape_cast %14 : vector<1x49x16xf32> to vector<49x16xf32>
    %c2_19 = arith.constant 2 : index
    %c0_20 = arith.constant 0 : index
    %c0_21 = arith.constant 0 : index
    %16 = vector.load %arg2[%c2_19, %c0_20, %c0_21] : memref<4x49x16xf32, #tpu.memory_space<vmem>>, vector<1x49x16xf32>
    %17 = vector.shape_cast %16 : vector<1x49x16xf32> to vector<49x16xf32>
    %c3_22 = arith.constant 3 : index
    %c0_23 = arith.constant 0 : index
    %c0_24 = arith.constant 0 : index
    %18 = vector.load %arg2[%c3_22, %c0_23, %c0_24] : memref<4x49x16xf32, #tpu.memory_space<vmem>>, vector<1x49x16xf32>
    %19 = vector.shape_cast %18 : vector<1x49x16xf32> to vector<49x16xf32>
    %cst_25 = arith.constant 0.000000e+00 : f32
    %20 = vector.broadcast %cst_25 : f32 to vector<8x16xf32>
    %cst_26 = arith.constant 0.000000e+00 : f32
    %21 = vector.broadcast %cst_26 : f32 to vector<8x16xf32>
    %c0_27 = arith.constant 0 : index
    %c0_28 = arith.constant 0 : index
    %c0_29 = arith.constant 0 : index
    %22 = vector.load %arg3[%c0_27, %c0_28, %c0_29] : memref<4x25x8xf32, #tpu.memory_space<vmem>>, vector<1x25x8xf32>
    %23 = vector.shape_cast %22 : vector<1x25x8xf32> to vector<25x8xf32>
    %c1_30 = arith.constant 1 : index
    %c0_31 = arith.constant 0 : index
    %c0_32 = arith.constant 0 : index
    %24 = vector.load %arg3[%c1_30, %c0_31, %c0_32] : memref<4x25x8xf32, #tpu.memory_space<vmem>>, vector<1x25x8xf32>
    %25 = vector.shape_cast %24 : vector<1x25x8xf32> to vector<25x8xf32>
    %c2_33 = arith.constant 2 : index
    %c0_34 = arith.constant 0 : index
    %c0_35 = arith.constant 0 : index
    %26 = vector.load %arg3[%c2_33, %c0_34, %c0_35] : memref<4x25x8xf32, #tpu.memory_space<vmem>>, vector<1x25x8xf32>
    %27 = vector.shape_cast %26 : vector<1x25x8xf32> to vector<25x8xf32>
    %c3_36 = arith.constant 3 : index
    %c0_37 = arith.constant 0 : index
    %c0_38 = arith.constant 0 : index
    %28 = vector.load %arg3[%c3_36, %c0_37, %c0_38] : memref<4x25x8xf32, #tpu.memory_space<vmem>>, vector<1x25x8xf32>
    %29 = vector.shape_cast %28 : vector<1x25x8xf32> to vector<25x8xf32>
    %cst_39 = arith.constant 0.000000e+00 : f32
    %30 = vector.broadcast %cst_39 : f32 to vector<8x8xf32>
    %cst_40 = arith.constant 0.000000e+00 : f32
    %31 = vector.broadcast %cst_40 : f32 to vector<8x8xf32>
    %32 = vector.extract_strided_slice %0 {offsets = [0, 0, 0], sizes = [8, 1, 16], strides = [1, 1, 1]} : vector<8x8x16xf32> to vector<8x1x16xf32>
    %33 = vector.shape_cast %32 : vector<8x1x16xf32> to vector<8x16xf32>
    %34 = tpu.concatenate %33, %10, %1 in 1 : vector<8x16xf32>, vector<8x32xf32>, vector<8x1xf32> -> vector<8x49xf32>
    %cst_41 = arith.constant dense<0.000000e+00> : vector<8x32xf32>
    %35 = tpu.matmul %34, %3, %cst_41 {dimension_numbers = #tpu.dot_dimension_numbers<[1], [0], [0], [1], [0, 0, 1, 1], [], []>} : vector<8x49xf32>, vector<49x32xf32>, vector<8x32xf32> -> vector<8x32xf32>
    %36 = arith.negf %35 : vector<8x32xf32>
    %37 = math.exp %36 : vector<8x32xf32>
    %cst_42 = arith.constant 1.000000e+00 : f32
    %38 = vector.broadcast %cst_42 : f32 to vector<8x32xf32>
    %39 = arith.addf %38, %37 : vector<8x32xf32>
    %40 = arith.divf %38, %39 : vector<8x32xf32>
    %cst_43 = arith.constant dense<0.000000e+00> : vector<8x32xf32>
    %41 = tpu.matmul %34, %5, %cst_43 {dimension_numbers = #tpu.dot_dimension_numbers<[1], [0], [0], [1], [0, 0, 1, 1], [], []>} : vector<8x49xf32>, vector<49x32xf32>, vector<8x32xf32> -> vector<8x32xf32>
    %42 = arith.negf %41 : vector<8x32xf32>
    %43 = math.exp %42 : vector<8x32xf32>
    %cst_44 = arith.constant 1.000000e+00 : f32
    %44 = vector.broadcast %cst_44 : f32 to vector<8x32xf32>
    %45 = arith.addf %44, %43 : vector<8x32xf32>
    %46 = arith.divf %44, %45 : vector<8x32xf32>
    %cst_45 = arith.constant dense<0.000000e+00> : vector<8x32xf32>
    %47 = tpu.matmul %34, %7, %cst_45 {dimension_numbers = #tpu.dot_dimension_numbers<[1], [0], [0], [1], [0, 0, 1, 1], [], []>} : vector<8x49xf32>, vector<49x32xf32>, vector<8x32xf32> -> vector<8x32xf32>
    %48 = math.tanh %47 : vector<8x32xf32>
    %cst_46 = arith.constant dense<0.000000e+00> : vector<8x32xf32>
    %49 = tpu.matmul %34, %9, %cst_46 {dimension_numbers = #tpu.dot_dimension_numbers<[1], [0], [0], [1], [0, 0, 1, 1], [], []>} : vector<8x49xf32>, vector<49x32xf32>, vector<8x32xf32> -> vector<8x32xf32>
    %50 = arith.negf %49 : vector<8x32xf32>
    %51 = math.exp %50 : vector<8x32xf32>
    %cst_47 = arith.constant 1.000000e+00 : f32
    %52 = vector.broadcast %cst_47 : f32 to vector<8x32xf32>
    %53 = arith.addf %52, %51 : vector<8x32xf32>
    %54 = arith.divf %52, %53 : vector<8x32xf32>
    %55 = arith.mulf %46, %11 : vector<8x32xf32>
    %56 = arith.mulf %40, %48 : vector<8x32xf32>
    %57 = arith.addf %55, %56 : vector<8x32xf32>
    %58 = math.tanh %57 : vector<8x32xf32>
    %59 = arith.mulf %54, %58 : vector<8x32xf32>
    %60 = tpu.concatenate %59, %20, %1 in 1 : vector<8x32xf32>, vector<8x16xf32>, vector<8x1xf32> -> vector<8x49xf32>
    %cst_48 = arith.constant dense<0.000000e+00> : vector<8x16xf32>
    %61 = tpu.matmul %60, %13, %cst_48 {dimension_numbers = #tpu.dot_dimension_numbers<[1], [0], [0], [1], [0, 0, 1, 1], [], []>} : vector<8x49xf32>, vector<49x16xf32>, vector<8x16xf32> -> vector<8x16xf32>
    %62 = arith.negf %61 : vector<8x16xf32>
    %63 = math.exp %62 : vector<8x16xf32>
    %cst_49 = arith.constant 1.000000e+00 : f32
    %64 = vector.broadcast %cst_49 : f32 to vector<8x16xf32>
    %65 = arith.addf %64, %63 : vector<8x16xf32>
    %66 = arith.divf %64, %65 : vector<8x16xf32>
    %cst_50 = arith.constant dense<0.000000e+00> : vector<8x16xf32>
    %67 = tpu.matmul %60, %15, %cst_50 {dimension_numbers = #tpu.dot_dimension_numbers<[1], [0], [0], [1], [0, 0, 1, 1], [], []>} : vector<8x49xf32>, vector<49x16xf32>, vector<8x16xf32> -> vector<8x16xf32>
    %68 = arith.negf %67 : vector<8x16xf32>
    %69 = math.exp %68 : vector<8x16xf32>
    %cst_51 = arith.constant 1.000000e+00 : f32
    %70 = vector.broadcast %cst_51 : f32 to vector<8x16xf32>
    %71 = arith.addf %70, %69 : vector<8x16xf32>
    %72 = arith.divf %70, %71 : vector<8x16xf32>
    %cst_52 = arith.constant dense<0.000000e+00> : vector<8x16xf32>
    %73 = tpu.matmul %60, %17, %cst_52 {dimension_numbers = #tpu.dot_dimension_numbers<[1], [0], [0], [1], [0, 0, 1, 1], [], []>} : vector<8x49xf32>, vector<49x16xf32>, vector<8x16xf32> -> vector<8x16xf32>
    %74 = math.tanh %73 : vector<8x16xf32>
    %cst_53 = arith.constant dense<0.000000e+00> : vector<8x16xf32>
    %75 = tpu.matmul %60, %19, %cst_53 {dimension_numbers = #tpu.dot_dimension_numbers<[1], [0], [0], [1], [0, 0, 1, 1], [], []>} : vector<8x49xf32>, vector<49x16xf32>, vector<8x16xf32> -> vector<8x16xf32>
    %76 = arith.negf %75 : vector<8x16xf32>
    %77 = math.exp %76 : vector<8x16xf32>
    %cst_54 = arith.constant 1.000000e+00 : f32
    %78 = vector.broadcast %cst_54 : f32 to vector<8x16xf32>
    %79 = arith.addf %78, %77 : vector<8x16xf32>
    %80 = arith.divf %78, %79 : vector<8x16xf32>
    %81 = arith.mulf %72, %21 : vector<8x16xf32>
    %82 = arith.mulf %66, %74 : vector<8x16xf32>
    %83 = arith.addf %81, %82 : vector<8x16xf32>
    %84 = math.tanh %83 : vector<8x16xf32>
    %85 = arith.mulf %80, %84 : vector<8x16xf32>
    %86 = tpu.concatenate %85, %30, %1 in 1 : vector<8x16xf32>, vector<8x8xf32>, vector<8x1xf32> -> vector<8x25xf32>
    %cst_55 = arith.constant dense<0.000000e+00> : vector<8x8xf32>
    %87 = tpu.matmul %86, %23, %cst_55 {dimension_numbers = #tpu.dot_dimension_numbers<[1], [0], [0], [1], [0, 0, 1, 1], [], []>} : vector<8x25xf32>, vector<25x8xf32>, vector<8x8xf32> -> vector<8x8xf32>
    %88 = arith.negf %87 : vector<8x8xf32>
    %89 = math.exp %88 : vector<8x8xf32>
    %cst_56 = arith.constant 1.000000e+00 : f32
    %90 = vector.broadcast %cst_56 : f32 to vector<8x8xf32>
    %91 = arith.addf %90, %89 : vector<8x8xf32>
    %92 = arith.divf %90, %91 : vector<8x8xf32>
    %cst_57 = arith.constant dense<0.000000e+00> : vector<8x8xf32>
    %93 = tpu.matmul %86, %25, %cst_57 {dimension_numbers = #tpu.dot_dimension_numbers<[1], [0], [0], [1], [0, 0, 1, 1], [], []>} : vector<8x25xf32>, vector<25x8xf32>, vector<8x8xf32> -> vector<8x8xf32>
    %94 = arith.negf %93 : vector<8x8xf32>
    %95 = math.exp %94 : vector<8x8xf32>
    %cst_58 = arith.constant 1.000000e+00 : f32
    %96 = vector.broadcast %cst_58 : f32 to vector<8x8xf32>
    %97 = arith.addf %96, %95 : vector<8x8xf32>
    %98 = arith.divf %96, %97 : vector<8x8xf32>
    %cst_59 = arith.constant dense<0.000000e+00> : vector<8x8xf32>
    %99 = tpu.matmul %86, %27, %cst_59 {dimension_numbers = #tpu.dot_dimension_numbers<[1], [0], [0], [1], [0, 0, 1, 1], [], []>} : vector<8x25xf32>, vector<25x8xf32>, vector<8x8xf32> -> vector<8x8xf32>
    %100 = math.tanh %99 : vector<8x8xf32>
    %cst_60 = arith.constant dense<0.000000e+00> : vector<8x8xf32>
    %101 = tpu.matmul %86, %29, %cst_60 {dimension_numbers = #tpu.dot_dimension_numbers<[1], [0], [0], [1], [0, 0, 1, 1], [], []>} : vector<8x25xf32>, vector<25x8xf32>, vector<8x8xf32> -> vector<8x8xf32>
    %102 = arith.negf %101 : vector<8x8xf32>
    %103 = math.exp %102 : vector<8x8xf32>
    %cst_61 = arith.constant 1.000000e+00 : f32
    %104 = vector.broadcast %cst_61 : f32 to vector<8x8xf32>
    %105 = arith.addf %104, %103 : vector<8x8xf32>
    %106 = arith.divf %104, %105 : vector<8x8xf32>
    %107 = arith.mulf %98, %31 : vector<8x8xf32>
    %108 = arith.mulf %92, %100 : vector<8x8xf32>
    %109 = arith.addf %107, %108 : vector<8x8xf32>
    %110 = math.tanh %109 : vector<8x8xf32>
    %111 = arith.mulf %106, %110 : vector<8x8xf32>
    %112 = vector.extract_strided_slice %0 {offsets = [0, 1, 0], sizes = [8, 1, 16], strides = [1, 1, 1]} : vector<8x8x16xf32> to vector<8x1x16xf32>
    %113 = vector.shape_cast %112 : vector<8x1x16xf32> to vector<8x16xf32>
    %114 = tpu.concatenate %113, %59, %1 in 1 : vector<8x16xf32>, vector<8x32xf32>, vector<8x1xf32> -> vector<8x49xf32>
    %cst_62 = arith.constant dense<0.000000e+00> : vector<8x32xf32>
    %115 = tpu.matmul %114, %3, %cst_62 {dimension_numbers = #tpu.dot_dimension_numbers<[1], [0], [0], [1], [0, 0, 1, 1], [], []>} : vector<8x49xf32>, vector<49x32xf32>, vector<8x32xf32> -> vector<8x32xf32>
    %116 = arith.negf %115 : vector<8x32xf32>
    %117 = math.exp %116 : vector<8x32xf32>
    %cst_63 = arith.constant 1.000000e+00 : f32
    %118 = vector.broadcast %cst_63 : f32 to vector<8x32xf32>
    %119 = arith.addf %118, %117 : vector<8x32xf32>
    %120 = arith.divf %118, %119 : vector<8x32xf32>
    %cst_64 = arith.constant dense<0.000000e+00> : vector<8x32xf32>
    %121 = tpu.matmul %114, %5, %cst_64 {dimension_numbers = #tpu.dot_dimension_numbers<[1], [0], [0], [1], [0, 0, 1, 1], [], []>} : vector<8x49xf32>, vector<49x32xf32>, vector<8x32xf32> -> vector<8x32xf32>
    %122 = arith.negf %121 : vector<8x32xf32>
    %123 = math.exp %122 : vector<8x32xf32>
    %cst_65 = arith.constant 1.000000e+00 : f32
    %124 = vector.broadcast %cst_65 : f32 to vector<8x32xf32>
    %125 = arith.addf %124, %123 : vector<8x32xf32>
    %126 = arith.divf %124, %125 : vector<8x32xf32>
    %cst_66 = arith.constant dense<0.000000e+00> : vector<8x32xf32>
    %127 = tpu.matmul %114, %7, %cst_66 {dimension_numbers = #tpu.dot_dimension_numbers<[1], [0], [0], [1], [0, 0, 1, 1], [], []>} : vector<8x49xf32>, vector<49x32xf32>, vector<8x32xf32> -> vector<8x32xf32>
    %128 = math.tanh %127 : vector<8x32xf32>
    %cst_67 = arith.constant dense<0.000000e+00> : vector<8x32xf32>
    %129 = tpu.matmul %114, %9, %cst_67 {dimension_numbers = #tpu.dot_dimension_numbers<[1], [0], [0], [1], [0, 0, 1, 1], [], []>} : vector<8x49xf32>, vector<49x32xf32>, vector<8x32xf32> -> vector<8x32xf32>
    %130 = arith.negf %129 : vector<8x32xf32>
    %131 = math.exp %130 : vector<8x32xf32>
    %cst_68 = arith.constant 1.000000e+00 : f32
    %132 = vector.broadcast %cst_68 : f32 to vector<8x32xf32>
    %133 = arith.addf %132, %131 : vector<8x32xf32>
    %134 = arith.divf %132, %133 : vector<8x32xf32>
    %135 = arith.mulf %126, %57 : vector<8x32xf32>
    %136 = arith.mulf %120, %128 : vector<8x32xf32>
    %137 = arith.addf %135, %136 : vector<8x32xf32>
    %138 = math.tanh %137 : vector<8x32xf32>
    %139 = arith.mulf %134, %138 : vector<8x32xf32>
    %140 = tpu.concatenate %139, %85, %1 in 1 : vector<8x32xf32>, vector<8x16xf32>, vector<8x1xf32> -> vector<8x49xf32>
    %cst_69 = arith.constant dense<0.000000e+00> : vector<8x16xf32>
    %141 = tpu.matmul %140, %13, %cst_69 {dimension_numbers = #tpu.dot_dimension_numbers<[1], [0], [0], [1], [0, 0, 1, 1], [], []>} : vector<8x49xf32>, vector<49x16xf32>, vector<8x16xf32> -> vector<8x16xf32>
    %142 = arith.negf %141 : vector<8x16xf32>
    %143 = math.exp %142 : vector<8x16xf32>
    %cst_70 = arith.constant 1.000000e+00 : f32
    %144 = vector.broadcast %cst_70 : f32 to vector<8x16xf32>
    %145 = arith.addf %144, %143 : vector<8x16xf32>
    %146 = arith.divf %144, %145 : vector<8x16xf32>
    %cst_71 = arith.constant dense<0.000000e+00> : vector<8x16xf32>
    %147 = tpu.matmul %140, %15, %cst_71 {dimension_numbers = #tpu.dot_dimension_numbers<[1], [0], [0], [1], [0, 0, 1, 1], [], []>} : vector<8x49xf32>, vector<49x16xf32>, vector<8x16xf32> -> vector<8x16xf32>
    %148 = arith.negf %147 : vector<8x16xf32>
    %149 = math.exp %148 : vector<8x16xf32>
    %cst_72 = arith.constant 1.000000e+00 : f32
    %150 = vector.broadcast %cst_72 : f32 to vector<8x16xf32>
    %151 = arith.addf %150, %149 : vector<8x16xf32>
    %152 = arith.divf %150, %151 : vector<8x16xf32>
    %cst_73 = arith.constant dense<0.000000e+00> : vector<8x16xf32>
    %153 = tpu.matmul %140, %17, %cst_73 {dimension_numbers = #tpu.dot_dimension_numbers<[1], [0], [0], [1], [0, 0, 1, 1], [], []>} : vector<8x49xf32>, vector<49x16xf32>, vector<8x16xf32> -> vector<8x16xf32>
    %154 = math.tanh %153 : vector<8x16xf32>
    %cst_74 = arith.constant dense<0.000000e+00> : vector<8x16xf32>
    %155 = tpu.matmul %140, %19, %cst_74 {dimension_numbers = #tpu.dot_dimension_numbers<[1], [0], [0], [1], [0, 0, 1, 1], [], []>} : vector<8x49xf32>, vector<49x16xf32>, vector<8x16xf32> -> vector<8x16xf32>
    %156 = arith.negf %155 : vector<8x16xf32>
    %157 = math.exp %156 : vector<8x16xf32>
    %cst_75 = arith.constant 1.000000e+00 : f32
    %158 = vector.broadcast %cst_75 : f32 to vector<8x16xf32>
    %159 = arith.addf %158, %157 : vector<8x16xf32>
    %160 = arith.divf %158, %159 : vector<8x16xf32>
    %161 = arith.mulf %152, %83 : vector<8x16xf32>
    %162 = arith.mulf %146, %154 : vector<8x16xf32>
    %163 = arith.addf %161, %162 : vector<8x16xf32>
    %164 = math.tanh %163 : vector<8x16xf32>
    %165 = arith.mulf %160, %164 : vector<8x16xf32>
    %166 = tpu.concatenate %165, %111, %1 in 1 : vector<8x16xf32>, vector<8x8xf32>, vector<8x1xf32> -> vector<8x25xf32>
    %cst_76 = arith.constant dense<0.000000e+00> : vector<8x8xf32>
    %167 = tpu.matmul %166, %23, %cst_76 {dimension_numbers = #tpu.dot_dimension_numbers<[1], [0], [0], [1], [0, 0, 1, 1], [], []>} : vector<8x25xf32>, vector<25x8xf32>, vector<8x8xf32> -> vector<8x8xf32>
    %168 = arith.negf %167 : vector<8x8xf32>
    %169 = math.exp %168 : vector<8x8xf32>
    %cst_77 = arith.constant 1.000000e+00 : f32
    %170 = vector.broadcast %cst_77 : f32 to vector<8x8xf32>
    %171 = arith.addf %170, %169 : vector<8x8xf32>
    %172 = arith.divf %170, %171 : vector<8x8xf32>
    %cst_78 = arith.constant dense<0.000000e+00> : vector<8x8xf32>
    %173 = tpu.matmul %166, %25, %cst_78 {dimension_numbers = #tpu.dot_dimension_numbers<[1], [0], [0], [1], [0, 0, 1, 1], [], []>} : vector<8x25xf32>, vector<25x8xf32>, vector<8x8xf32> -> vector<8x8xf32>
    %174 = arith.negf %173 : vector<8x8xf32>
    %175 = math.exp %174 : vector<8x8xf32>
    %cst_79 = arith.constant 1.000000e+00 : f32
    %176 = vector.broadcast %cst_79 : f32 to vector<8x8xf32>
    %177 = arith.addf %176, %175 : vector<8x8xf32>
    %178 = arith.divf %176, %177 : vector<8x8xf32>
    %cst_80 = arith.constant dense<0.000000e+00> : vector<8x8xf32>
    %179 = tpu.matmul %166, %27, %cst_80 {dimension_numbers = #tpu.dot_dimension_numbers<[1], [0], [0], [1], [0, 0, 1, 1], [], []>} : vector<8x25xf32>, vector<25x8xf32>, vector<8x8xf32> -> vector<8x8xf32>
    %180 = math.tanh %179 : vector<8x8xf32>
    %cst_81 = arith.constant dense<0.000000e+00> : vector<8x8xf32>
    %181 = tpu.matmul %166, %29, %cst_81 {dimension_numbers = #tpu.dot_dimension_numbers<[1], [0], [0], [1], [0, 0, 1, 1], [], []>} : vector<8x25xf32>, vector<25x8xf32>, vector<8x8xf32> -> vector<8x8xf32>
    %182 = arith.negf %181 : vector<8x8xf32>
    %183 = math.exp %182 : vector<8x8xf32>
    %cst_82 = arith.constant 1.000000e+00 : f32
    %184 = vector.broadcast %cst_82 : f32 to vector<8x8xf32>
    %185 = arith.addf %184, %183 : vector<8x8xf32>
    %186 = arith.divf %184, %185 : vector<8x8xf32>
    %187 = arith.mulf %178, %109 : vector<8x8xf32>
    %188 = arith.mulf %172, %180 : vector<8x8xf32>
    %189 = arith.addf %187, %188 : vector<8x8xf32>
    %190 = math.tanh %189 : vector<8x8xf32>
    %191 = arith.mulf %186, %190 : vector<8x8xf32>
    %192 = vector.extract_strided_slice %0 {offsets = [0, 2, 0], sizes = [8, 1, 16], strides = [1, 1, 1]} : vector<8x8x16xf32> to vector<8x1x16xf32>
    %193 = vector.shape_cast %192 : vector<8x1x16xf32> to vector<8x16xf32>
    %194 = tpu.concatenate %193, %139, %1 in 1 : vector<8x16xf32>, vector<8x32xf32>, vector<8x1xf32> -> vector<8x49xf32>
    %cst_83 = arith.constant dense<0.000000e+00> : vector<8x32xf32>
    %195 = tpu.matmul %194, %3, %cst_83 {dimension_numbers = #tpu.dot_dimension_numbers<[1], [0], [0], [1], [0, 0, 1, 1], [], []>} : vector<8x49xf32>, vector<49x32xf32>, vector<8x32xf32> -> vector<8x32xf32>
    %196 = arith.negf %195 : vector<8x32xf32>
    %197 = math.exp %196 : vector<8x32xf32>
    %cst_84 = arith.constant 1.000000e+00 : f32
    %198 = vector.broadcast %cst_84 : f32 to vector<8x32xf32>
    %199 = arith.addf %198, %197 : vector<8x32xf32>
    %200 = arith.divf %198, %199 : vector<8x32xf32>
    %cst_85 = arith.constant dense<0.000000e+00> : vector<8x32xf32>
    %201 = tpu.matmul %194, %5, %cst_85 {dimension_numbers = #tpu.dot_dimension_numbers<[1], [0], [0], [1], [0, 0, 1, 1], [], []>} : vector<8x49xf32>, vector<49x32xf32>, vector<8x32xf32> -> vector<8x32xf32>
    %202 = arith.negf %201 : vector<8x32xf32>
    %203 = math.exp %202 : vector<8x32xf32>
    %cst_86 = arith.constant 1.000000e+00 : f32
    %204 = vector.broadcast %cst_86 : f32 to vector<8x32xf32>
    %205 = arith.addf %204, %203 : vector<8x32xf32>
    %206 = arith.divf %204, %205 : vector<8x32xf32>
    %cst_87 = arith.constant dense<0.000000e+00> : vector<8x32xf32>
    %207 = tpu.matmul %194, %7, %cst_87 {dimension_numbers = #tpu.dot_dimension_numbers<[1], [0], [0], [1], [0, 0, 1, 1], [], []>} : vector<8x49xf32>, vector<49x32xf32>, vector<8x32xf32> -> vector<8x32xf32>
    %208 = math.tanh %207 : vector<8x32xf32>
    %cst_88 = arith.constant dense<0.000000e+00> : vector<8x32xf32>
    %209 = tpu.matmul %194, %9, %cst_88 {dimension_numbers = #tpu.dot_dimension_numbers<[1], [0], [0], [1], [0, 0, 1, 1], [], []>} : vector<8x49xf32>, vector<49x32xf32>, vector<8x32xf32> -> vector<8x32xf32>
    %210 = arith.negf %209 : vector<8x32xf32>
    %211 = math.exp %210 : vector<8x32xf32>
    %cst_89 = arith.constant 1.000000e+00 : f32
    %212 = vector.broadcast %cst_89 : f32 to vector<8x32xf32>
    %213 = arith.addf %212, %211 : vector<8x32xf32>
    %214 = arith.divf %212, %213 : vector<8x32xf32>
    %215 = arith.mulf %206, %137 : vector<8x32xf32>
    %216 = arith.mulf %200, %208 : vector<8x32xf32>
    %217 = arith.addf %215, %216 : vector<8x32xf32>
    %218 = math.tanh %217 : vector<8x32xf32>
    %219 = arith.mulf %214, %218 : vector<8x32xf32>
    %220 = tpu.concatenate %219, %165, %1 in 1 : vector<8x32xf32>, vector<8x16xf32>, vector<8x1xf32> -> vector<8x49xf32>
    %cst_90 = arith.constant dense<0.000000e+00> : vector<8x16xf32>
    %221 = tpu.matmul %220, %13, %cst_90 {dimension_numbers = #tpu.dot_dimension_numbers<[1], [0], [0], [1], [0, 0, 1, 1], [], []>} : vector<8x49xf32>, vector<49x16xf32>, vector<8x16xf32> -> vector<8x16xf32>
    %222 = arith.negf %221 : vector<8x16xf32>
    %223 = math.exp %222 : vector<8x16xf32>
    %cst_91 = arith.constant 1.000000e+00 : f32
    %224 = vector.broadcast %cst_91 : f32 to vector<8x16xf32>
    %225 = arith.addf %224, %223 : vector<8x16xf32>
    %226 = arith.divf %224, %225 : vector<8x16xf32>
    %cst_92 = arith.constant dense<0.000000e+00> : vector<8x16xf32>
    %227 = tpu.matmul %220, %15, %cst_92 {dimension_numbers = #tpu.dot_dimension_numbers<[1], [0], [0], [1], [0, 0, 1, 1], [], []>} : vector<8x49xf32>, vector<49x16xf32>, vector<8x16xf32> -> vector<8x16xf32>
    %228 = arith.negf %227 : vector<8x16xf32>
    %229 = math.exp %228 : vector<8x16xf32>
    %cst_93 = arith.constant 1.000000e+00 : f32
    %230 = vector.broadcast %cst_93 : f32 to vector<8x16xf32>
    %231 = arith.addf %230, %229 : vector<8x16xf32>
    %232 = arith.divf %230, %231 : vector<8x16xf32>
    %cst_94 = arith.constant dense<0.000000e+00> : vector<8x16xf32>
    %233 = tpu.matmul %220, %17, %cst_94 {dimension_numbers = #tpu.dot_dimension_numbers<[1], [0], [0], [1], [0, 0, 1, 1], [], []>} : vector<8x49xf32>, vector<49x16xf32>, vector<8x16xf32> -> vector<8x16xf32>
    %234 = math.tanh %233 : vector<8x16xf32>
    %cst_95 = arith.constant dense<0.000000e+00> : vector<8x16xf32>
    %235 = tpu.matmul %220, %19, %cst_95 {dimension_numbers = #tpu.dot_dimension_numbers<[1], [0], [0], [1], [0, 0, 1, 1], [], []>} : vector<8x49xf32>, vector<49x16xf32>, vector<8x16xf32> -> vector<8x16xf32>
    %236 = arith.negf %235 : vector<8x16xf32>
    %237 = math.exp %236 : vector<8x16xf32>
    %cst_96 = arith.constant 1.000000e+00 : f32
    %238 = vector.broadcast %cst_96 : f32 to vector<8x16xf32>
    %239 = arith.addf %238, %237 : vector<8x16xf32>
    %240 = arith.divf %238, %239 : vector<8x16xf32>
    %241 = arith.mulf %232, %163 : vector<8x16xf32>
    %242 = arith.mulf %226, %234 : vector<8x16xf32>
    %243 = arith.addf %241, %242 : vector<8x16xf32>
    %244 = math.tanh %243 : vector<8x16xf32>
    %245 = arith.mulf %240, %244 : vector<8x16xf32>
    %246 = tpu.concatenate %245, %191, %1 in 1 : vector<8x16xf32>, vector<8x8xf32>, vector<8x1xf32> -> vector<8x25xf32>
    %cst_97 = arith.constant dense<0.000000e+00> : vector<8x8xf32>
    %247 = tpu.matmul %246, %23, %cst_97 {dimension_numbers = #tpu.dot_dimension_numbers<[1], [0], [0], [1], [0, 0, 1, 1], [], []>} : vector<8x25xf32>, vector<25x8xf32>, vector<8x8xf32> -> vector<8x8xf32>
    %248 = arith.negf %247 : vector<8x8xf32>
    %249 = math.exp %248 : vector<8x8xf32>
    %cst_98 = arith.constant 1.000000e+00 : f32
    %250 = vector.broadcast %cst_98 : f32 to vector<8x8xf32>
    %251 = arith.addf %250, %249 : vector<8x8xf32>
    %252 = arith.divf %250, %251 : vector<8x8xf32>
    %cst_99 = arith.constant dense<0.000000e+00> : vector<8x8xf32>
    %253 = tpu.matmul %246, %25, %cst_99 {dimension_numbers = #tpu.dot_dimension_numbers<[1], [0], [0], [1], [0, 0, 1, 1], [], []>} : vector<8x25xf32>, vector<25x8xf32>, vector<8x8xf32> -> vector<8x8xf32>
    %254 = arith.negf %253 : vector<8x8xf32>
    %255 = math.exp %254 : vector<8x8xf32>
    %cst_100 = arith.constant 1.000000e+00 : f32
    %256 = vector.broadcast %cst_100 : f32 to vector<8x8xf32>
    %257 = arith.addf %256, %255 : vector<8x8xf32>
    %258 = arith.divf %256, %257 : vector<8x8xf32>
    %cst_101 = arith.constant dense<0.000000e+00> : vector<8x8xf32>
    %259 = tpu.matmul %246, %27, %cst_101 {dimension_numbers = #tpu.dot_dimension_numbers<[1], [0], [0], [1], [0, 0, 1, 1], [], []>} : vector<8x25xf32>, vector<25x8xf32>, vector<8x8xf32> -> vector<8x8xf32>
    %260 = math.tanh %259 : vector<8x8xf32>
    %cst_102 = arith.constant dense<0.000000e+00> : vector<8x8xf32>
    %261 = tpu.matmul %246, %29, %cst_102 {dimension_numbers = #tpu.dot_dimension_numbers<[1], [0], [0], [1], [0, 0, 1, 1], [], []>} : vector<8x25xf32>, vector<25x8xf32>, vector<8x8xf32> -> vector<8x8xf32>
    %262 = arith.negf %261 : vector<8x8xf32>
    %263 = math.exp %262 : vector<8x8xf32>
    %cst_103 = arith.constant 1.000000e+00 : f32
    %264 = vector.broadcast %cst_103 : f32 to vector<8x8xf32>
    %265 = arith.addf %264, %263 : vector<8x8xf32>
    %266 = arith.divf %264, %265 : vector<8x8xf32>
    %267 = arith.mulf %258, %189 : vector<8x8xf32>
    %268 = arith.mulf %252, %260 : vector<8x8xf32>
    %269 = arith.addf %267, %268 : vector<8x8xf32>
    %270 = math.tanh %269 : vector<8x8xf32>
    %271 = arith.mulf %266, %270 : vector<8x8xf32>
    %272 = vector.extract_strided_slice %0 {offsets = [0, 3, 0], sizes = [8, 1, 16], strides = [1, 1, 1]} : vector<8x8x16xf32> to vector<8x1x16xf32>
    %273 = vector.shape_cast %272 : vector<8x1x16xf32> to vector<8x16xf32>
    %274 = tpu.concatenate %273, %219, %1 in 1 : vector<8x16xf32>, vector<8x32xf32>, vector<8x1xf32> -> vector<8x49xf32>
    %cst_104 = arith.constant dense<0.000000e+00> : vector<8x32xf32>
    %275 = tpu.matmul %274, %3, %cst_104 {dimension_numbers = #tpu.dot_dimension_numbers<[1], [0], [0], [1], [0, 0, 1, 1], [], []>} : vector<8x49xf32>, vector<49x32xf32>, vector<8x32xf32> -> vector<8x32xf32>
    %276 = arith.negf %275 : vector<8x32xf32>
    %277 = math.exp %276 : vector<8x32xf32>
    %cst_105 = arith.constant 1.000000e+00 : f32
    %278 = vector.broadcast %cst_105 : f32 to vector<8x32xf32>
    %279 = arith.addf %278, %277 : vector<8x32xf32>
    %280 = arith.divf %278, %279 : vector<8x32xf32>
    %cst_106 = arith.constant dense<0.000000e+00> : vector<8x32xf32>
    %281 = tpu.matmul %274, %5, %cst_106 {dimension_numbers = #tpu.dot_dimension_numbers<[1], [0], [0], [1], [0, 0, 1, 1], [], []>} : vector<8x49xf32>, vector<49x32xf32>, vector<8x32xf32> -> vector<8x32xf32>
    %282 = arith.negf %281 : vector<8x32xf32>
    %283 = math.exp %282 : vector<8x32xf32>
    %cst_107 = arith.constant 1.000000e+00 : f32
    %284 = vector.broadcast %cst_107 : f32 to vector<8x32xf32>
    %285 = arith.addf %284, %283 : vector<8x32xf32>
    %286 = arith.divf %284, %285 : vector<8x32xf32>
    %cst_108 = arith.constant dense<0.000000e+00> : vector<8x32xf32>
    %287 = tpu.matmul %274, %7, %cst_108 {dimension_numbers = #tpu.dot_dimension_numbers<[1], [0], [0], [1], [0, 0, 1, 1], [], []>} : vector<8x49xf32>, vector<49x32xf32>, vector<8x32xf32> -> vector<8x32xf32>
    %288 = math.tanh %287 : vector<8x32xf32>
    %cst_109 = arith.constant dense<0.000000e+00> : vector<8x32xf32>
    %289 = tpu.matmul %274, %9, %cst_109 {dimension_numbers = #tpu.dot_dimension_numbers<[1], [0], [0], [1], [0, 0, 1, 1], [], []>} : vector<8x49xf32>, vector<49x32xf32>, vector<8x32xf32> -> vector<8x32xf32>
    %290 = arith.negf %289 : vector<8x32xf32>
    %291 = math.exp %290 : vector<8x32xf32>
    %cst_110 = arith.constant 1.000000e+00 : f32
    %292 = vector.broadcast %cst_110 : f32 to vector<8x32xf32>
    %293 = arith.addf %292, %291 : vector<8x32xf32>
    %294 = arith.divf %292, %293 : vector<8x32xf32>
    %295 = arith.mulf %286, %217 : vector<8x32xf32>
    %296 = arith.mulf %280, %288 : vector<8x32xf32>
    %297 = arith.addf %295, %296 : vector<8x32xf32>
    %298 = math.tanh %297 : vector<8x32xf32>
    %299 = arith.mulf %294, %298 : vector<8x32xf32>
    %300 = tpu.concatenate %299, %245, %1 in 1 : vector<8x32xf32>, vector<8x16xf32>, vector<8x1xf32> -> vector<8x49xf32>
    %cst_111 = arith.constant dense<0.000000e+00> : vector<8x16xf32>
    %301 = tpu.matmul %300, %13, %cst_111 {dimension_numbers = #tpu.dot_dimension_numbers<[1], [0], [0], [1], [0, 0, 1, 1], [], []>} : vector<8x49xf32>, vector<49x16xf32>, vector<8x16xf32> -> vector<8x16xf32>
    %302 = arith.negf %301 : vector<8x16xf32>
    %303 = math.exp %302 : vector<8x16xf32>
    %cst_112 = arith.constant 1.000000e+00 : f32
    %304 = vector.broadcast %cst_112 : f32 to vector<8x16xf32>
    %305 = arith.addf %304, %303 : vector<8x16xf32>
    %306 = arith.divf %304, %305 : vector<8x16xf32>
    %cst_113 = arith.constant dense<0.000000e+00> : vector<8x16xf32>
    %307 = tpu.matmul %300, %15, %cst_113 {dimension_numbers = #tpu.dot_dimension_numbers<[1], [0], [0], [1], [0, 0, 1, 1], [], []>} : vector<8x49xf32>, vector<49x16xf32>, vector<8x16xf32> -> vector<8x16xf32>
    %308 = arith.negf %307 : vector<8x16xf32>
    %309 = math.exp %308 : vector<8x16xf32>
    %cst_114 = arith.constant 1.000000e+00 : f32
    %310 = vector.broadcast %cst_114 : f32 to vector<8x16xf32>
    %311 = arith.addf %310, %309 : vector<8x16xf32>
    %312 = arith.divf %310, %311 : vector<8x16xf32>
    %cst_115 = arith.constant dense<0.000000e+00> : vector<8x16xf32>
    %313 = tpu.matmul %300, %17, %cst_115 {dimension_numbers = #tpu.dot_dimension_numbers<[1], [0], [0], [1], [0, 0, 1, 1], [], []>} : vector<8x49xf32>, vector<49x16xf32>, vector<8x16xf32> -> vector<8x16xf32>
    %314 = math.tanh %313 : vector<8x16xf32>
    %cst_116 = arith.constant dense<0.000000e+00> : vector<8x16xf32>
    %315 = tpu.matmul %300, %19, %cst_116 {dimension_numbers = #tpu.dot_dimension_numbers<[1], [0], [0], [1], [0, 0, 1, 1], [], []>} : vector<8x49xf32>, vector<49x16xf32>, vector<8x16xf32> -> vector<8x16xf32>
    %316 = arith.negf %315 : vector<8x16xf32>
    %317 = math.exp %316 : vector<8x16xf32>
    %cst_117 = arith.constant 1.000000e+00 : f32
    %318 = vector.broadcast %cst_117 : f32 to vector<8x16xf32>
    %319 = arith.addf %318, %317 : vector<8x16xf32>
    %320 = arith.divf %318, %319 : vector<8x16xf32>
    %321 = arith.mulf %312, %243 : vector<8x16xf32>
    %322 = arith.mulf %306, %314 : vector<8x16xf32>
    %323 = arith.addf %321, %322 : vector<8x16xf32>
    %324 = math.tanh %323 : vector<8x16xf32>
    %325 = arith.mulf %320, %324 : vector<8x16xf32>
    %326 = tpu.concatenate %325, %271, %1 in 1 : vector<8x16xf32>, vector<8x8xf32>, vector<8x1xf32> -> vector<8x25xf32>
    %cst_118 = arith.constant dense<0.000000e+00> : vector<8x8xf32>
    %327 = tpu.matmul %326, %23, %cst_118 {dimension_numbers = #tpu.dot_dimension_numbers<[1], [0], [0], [1], [0, 0, 1, 1], [], []>} : vector<8x25xf32>, vector<25x8xf32>, vector<8x8xf32> -> vector<8x8xf32>
    %328 = arith.negf %327 : vector<8x8xf32>
    %329 = math.exp %328 : vector<8x8xf32>
    %cst_119 = arith.constant 1.000000e+00 : f32
    %330 = vector.broadcast %cst_119 : f32 to vector<8x8xf32>
    %331 = arith.addf %330, %329 : vector<8x8xf32>
    %332 = arith.divf %330, %331 : vector<8x8xf32>
    %cst_120 = arith.constant dense<0.000000e+00> : vector<8x8xf32>
    %333 = tpu.matmul %326, %25, %cst_120 {dimension_numbers = #tpu.dot_dimension_numbers<[1], [0], [0], [1], [0, 0, 1, 1], [], []>} : vector<8x25xf32>, vector<25x8xf32>, vector<8x8xf32> -> vector<8x8xf32>
    %334 = arith.negf %333 : vector<8x8xf32>
    %335 = math.exp %334 : vector<8x8xf32>
    %cst_121 = arith.constant 1.000000e+00 : f32
    %336 = vector.broadcast %cst_121 : f32 to vector<8x8xf32>
    %337 = arith.addf %336, %335 : vector<8x8xf32>
    %338 = arith.divf %336, %337 : vector<8x8xf32>
    %cst_122 = arith.constant dense<0.000000e+00> : vector<8x8xf32>
    %339 = tpu.matmul %326, %27, %cst_122 {dimension_numbers = #tpu.dot_dimension_numbers<[1], [0], [0], [1], [0, 0, 1, 1], [], []>} : vector<8x25xf32>, vector<25x8xf32>, vector<8x8xf32> -> vector<8x8xf32>
    %340 = math.tanh %339 : vector<8x8xf32>
    %cst_123 = arith.constant dense<0.000000e+00> : vector<8x8xf32>
    %341 = tpu.matmul %326, %29, %cst_123 {dimension_numbers = #tpu.dot_dimension_numbers<[1], [0], [0], [1], [0, 0, 1, 1], [], []>} : vector<8x25xf32>, vector<25x8xf32>, vector<8x8xf32> -> vector<8x8xf32>
    %342 = arith.negf %341 : vector<8x8xf32>
    %343 = math.exp %342 : vector<8x8xf32>
    %cst_124 = arith.constant 1.000000e+00 : f32
    %344 = vector.broadcast %cst_124 : f32 to vector<8x8xf32>
    %345 = arith.addf %344, %343 : vector<8x8xf32>
    %346 = arith.divf %344, %345 : vector<8x8xf32>
    %347 = arith.mulf %338, %269 : vector<8x8xf32>
    %348 = arith.mulf %332, %340 : vector<8x8xf32>
    %349 = arith.addf %347, %348 : vector<8x8xf32>
    %350 = math.tanh %349 : vector<8x8xf32>
    %351 = arith.mulf %346, %350 : vector<8x8xf32>
    %352 = vector.extract_strided_slice %0 {offsets = [0, 4, 0], sizes = [8, 1, 16], strides = [1, 1, 1]} : vector<8x8x16xf32> to vector<8x1x16xf32>
    %353 = vector.shape_cast %352 : vector<8x1x16xf32> to vector<8x16xf32>
    %354 = tpu.concatenate %353, %299, %1 in 1 : vector<8x16xf32>, vector<8x32xf32>, vector<8x1xf32> -> vector<8x49xf32>
    %cst_125 = arith.constant dense<0.000000e+00> : vector<8x32xf32>
    %355 = tpu.matmul %354, %3, %cst_125 {dimension_numbers = #tpu.dot_dimension_numbers<[1], [0], [0], [1], [0, 0, 1, 1], [], []>} : vector<8x49xf32>, vector<49x32xf32>, vector<8x32xf32> -> vector<8x32xf32>
    %356 = arith.negf %355 : vector<8x32xf32>
    %357 = math.exp %356 : vector<8x32xf32>
    %cst_126 = arith.constant 1.000000e+00 : f32
    %358 = vector.broadcast %cst_126 : f32 to vector<8x32xf32>
    %359 = arith.addf %358, %357 : vector<8x32xf32>
    %360 = arith.divf %358, %359 : vector<8x32xf32>
    %cst_127 = arith.constant dense<0.000000e+00> : vector<8x32xf32>
    %361 = tpu.matmul %354, %5, %cst_127 {dimension_numbers = #tpu.dot_dimension_numbers<[1], [0], [0], [1], [0, 0, 1, 1], [], []>} : vector<8x49xf32>, vector<49x32xf32>, vector<8x32xf32> -> vector<8x32xf32>
    %362 = arith.negf %361 : vector<8x32xf32>
    %363 = math.exp %362 : vector<8x32xf32>
    %cst_128 = arith.constant 1.000000e+00 : f32
    %364 = vector.broadcast %cst_128 : f32 to vector<8x32xf32>
    %365 = arith.addf %364, %363 : vector<8x32xf32>
    %366 = arith.divf %364, %365 : vector<8x32xf32>
    %cst_129 = arith.constant dense<0.000000e+00> : vector<8x32xf32>
    %367 = tpu.matmul %354, %7, %cst_129 {dimension_numbers = #tpu.dot_dimension_numbers<[1], [0], [0], [1], [0, 0, 1, 1], [], []>} : vector<8x49xf32>, vector<49x32xf32>, vector<8x32xf32> -> vector<8x32xf32>
    %368 = math.tanh %367 : vector<8x32xf32>
    %cst_130 = arith.constant dense<0.000000e+00> : vector<8x32xf32>
    %369 = tpu.matmul %354, %9, %cst_130 {dimension_numbers = #tpu.dot_dimension_numbers<[1], [0], [0], [1], [0, 0, 1, 1], [], []>} : vector<8x49xf32>, vector<49x32xf32>, vector<8x32xf32> -> vector<8x32xf32>
    %370 = arith.negf %369 : vector<8x32xf32>
    %371 = math.exp %370 : vector<8x32xf32>
    %cst_131 = arith.constant 1.000000e+00 : f32
    %372 = vector.broadcast %cst_131 : f32 to vector<8x32xf32>
    %373 = arith.addf %372, %371 : vector<8x32xf32>
    %374 = arith.divf %372, %373 : vector<8x32xf32>
    %375 = arith.mulf %366, %297 : vector<8x32xf32>
    %376 = arith.mulf %360, %368 : vector<8x32xf32>
    %377 = arith.addf %375, %376 : vector<8x32xf32>
    %378 = math.tanh %377 : vector<8x32xf32>
    %379 = arith.mulf %374, %378 : vector<8x32xf32>
    %380 = tpu.concatenate %379, %325, %1 in 1 : vector<8x32xf32>, vector<8x16xf32>, vector<8x1xf32> -> vector<8x49xf32>
    %cst_132 = arith.constant dense<0.000000e+00> : vector<8x16xf32>
    %381 = tpu.matmul %380, %13, %cst_132 {dimension_numbers = #tpu.dot_dimension_numbers<[1], [0], [0], [1], [0, 0, 1, 1], [], []>} : vector<8x49xf32>, vector<49x16xf32>, vector<8x16xf32> -> vector<8x16xf32>
    %382 = arith.negf %381 : vector<8x16xf32>
    %383 = math.exp %382 : vector<8x16xf32>
    %cst_133 = arith.constant 1.000000e+00 : f32
    %384 = vector.broadcast %cst_133 : f32 to vector<8x16xf32>
    %385 = arith.addf %384, %383 : vector<8x16xf32>
    %386 = arith.divf %384, %385 : vector<8x16xf32>
    %cst_134 = arith.constant dense<0.000000e+00> : vector<8x16xf32>
    %387 = tpu.matmul %380, %15, %cst_134 {dimension_numbers = #tpu.dot_dimension_numbers<[1], [0], [0], [1], [0, 0, 1, 1], [], []>} : vector<8x49xf32>, vector<49x16xf32>, vector<8x16xf32> -> vector<8x16xf32>
    %388 = arith.negf %387 : vector<8x16xf32>
    %389 = math.exp %388 : vector<8x16xf32>
    %cst_135 = arith.constant 1.000000e+00 : f32
    %390 = vector.broadcast %cst_135 : f32 to vector<8x16xf32>
    %391 = arith.addf %390, %389 : vector<8x16xf32>
    %392 = arith.divf %390, %391 : vector<8x16xf32>
    %cst_136 = arith.constant dense<0.000000e+00> : vector<8x16xf32>
    %393 = tpu.matmul %380, %17, %cst_136 {dimension_numbers = #tpu.dot_dimension_numbers<[1], [0], [0], [1], [0, 0, 1, 1], [], []>} : vector<8x49xf32>, vector<49x16xf32>, vector<8x16xf32> -> vector<8x16xf32>
    %394 = math.tanh %393 : vector<8x16xf32>
    %cst_137 = arith.constant dense<0.000000e+00> : vector<8x16xf32>
    %395 = tpu.matmul %380, %19, %cst_137 {dimension_numbers = #tpu.dot_dimension_numbers<[1], [0], [0], [1], [0, 0, 1, 1], [], []>} : vector<8x49xf32>, vector<49x16xf32>, vector<8x16xf32> -> vector<8x16xf32>
    %396 = arith.negf %395 : vector<8x16xf32>
    %397 = math.exp %396 : vector<8x16xf32>
    %cst_138 = arith.constant 1.000000e+00 : f32
    %398 = vector.broadcast %cst_138 : f32 to vector<8x16xf32>
    %399 = arith.addf %398, %397 : vector<8x16xf32>
    %400 = arith.divf %398, %399 : vector<8x16xf32>
    %401 = arith.mulf %392, %323 : vector<8x16xf32>
    %402 = arith.mulf %386, %394 : vector<8x16xf32>
    %403 = arith.addf %401, %402 : vector<8x16xf32>
    %404 = math.tanh %403 : vector<8x16xf32>
    %405 = arith.mulf %400, %404 : vector<8x16xf32>
    %406 = tpu.concatenate %405, %351, %1 in 1 : vector<8x16xf32>, vector<8x8xf32>, vector<8x1xf32> -> vector<8x25xf32>
    %cst_139 = arith.constant dense<0.000000e+00> : vector<8x8xf32>
    %407 = tpu.matmul %406, %23, %cst_139 {dimension_numbers = #tpu.dot_dimension_numbers<[1], [0], [0], [1], [0, 0, 1, 1], [], []>} : vector<8x25xf32>, vector<25x8xf32>, vector<8x8xf32> -> vector<8x8xf32>
    %408 = arith.negf %407 : vector<8x8xf32>
    %409 = math.exp %408 : vector<8x8xf32>
    %cst_140 = arith.constant 1.000000e+00 : f32
    %410 = vector.broadcast %cst_140 : f32 to vector<8x8xf32>
    %411 = arith.addf %410, %409 : vector<8x8xf32>
    %412 = arith.divf %410, %411 : vector<8x8xf32>
    %cst_141 = arith.constant dense<0.000000e+00> : vector<8x8xf32>
    %413 = tpu.matmul %406, %25, %cst_141 {dimension_numbers = #tpu.dot_dimension_numbers<[1], [0], [0], [1], [0, 0, 1, 1], [], []>} : vector<8x25xf32>, vector<25x8xf32>, vector<8x8xf32> -> vector<8x8xf32>
    %414 = arith.negf %413 : vector<8x8xf32>
    %415 = math.exp %414 : vector<8x8xf32>
    %cst_142 = arith.constant 1.000000e+00 : f32
    %416 = vector.broadcast %cst_142 : f32 to vector<8x8xf32>
    %417 = arith.addf %416, %415 : vector<8x8xf32>
    %418 = arith.divf %416, %417 : vector<8x8xf32>
    %cst_143 = arith.constant dense<0.000000e+00> : vector<8x8xf32>
    %419 = tpu.matmul %406, %27, %cst_143 {dimension_numbers = #tpu.dot_dimension_numbers<[1], [0], [0], [1], [0, 0, 1, 1], [], []>} : vector<8x25xf32>, vector<25x8xf32>, vector<8x8xf32> -> vector<8x8xf32>
    %420 = math.tanh %419 : vector<8x8xf32>
    %cst_144 = arith.constant dense<0.000000e+00> : vector<8x8xf32>
    %421 = tpu.matmul %406, %29, %cst_144 {dimension_numbers = #tpu.dot_dimension_numbers<[1], [0], [0], [1], [0, 0, 1, 1], [], []>} : vector<8x25xf32>, vector<25x8xf32>, vector<8x8xf32> -> vector<8x8xf32>
    %422 = arith.negf %421 : vector<8x8xf32>
    %423 = math.exp %422 : vector<8x8xf32>
    %cst_145 = arith.constant 1.000000e+00 : f32
    %424 = vector.broadcast %cst_145 : f32 to vector<8x8xf32>
    %425 = arith.addf %424, %423 : vector<8x8xf32>
    %426 = arith.divf %424, %425 : vector<8x8xf32>
    %427 = arith.mulf %418, %349 : vector<8x8xf32>
    %428 = arith.mulf %412, %420 : vector<8x8xf32>
    %429 = arith.addf %427, %428 : vector<8x8xf32>
    %430 = math.tanh %429 : vector<8x8xf32>
    %431 = arith.mulf %426, %430 : vector<8x8xf32>
    %432 = vector.extract_strided_slice %0 {offsets = [0, 5, 0], sizes = [8, 1, 16], strides = [1, 1, 1]} : vector<8x8x16xf32> to vector<8x1x16xf32>
    %433 = vector.shape_cast %432 : vector<8x1x16xf32> to vector<8x16xf32>
    %434 = tpu.concatenate %433, %379, %1 in 1 : vector<8x16xf32>, vector<8x32xf32>, vector<8x1xf32> -> vector<8x49xf32>
    %cst_146 = arith.constant dense<0.000000e+00> : vector<8x32xf32>
    %435 = tpu.matmul %434, %3, %cst_146 {dimension_numbers = #tpu.dot_dimension_numbers<[1], [0], [0], [1], [0, 0, 1, 1], [], []>} : vector<8x49xf32>, vector<49x32xf32>, vector<8x32xf32> -> vector<8x32xf32>
    %436 = arith.negf %435 : vector<8x32xf32>
    %437 = math.exp %436 : vector<8x32xf32>
    %cst_147 = arith.constant 1.000000e+00 : f32
    %438 = vector.broadcast %cst_147 : f32 to vector<8x32xf32>
    %439 = arith.addf %438, %437 : vector<8x32xf32>
    %440 = arith.divf %438, %439 : vector<8x32xf32>
    %cst_148 = arith.constant dense<0.000000e+00> : vector<8x32xf32>
    %441 = tpu.matmul %434, %5, %cst_148 {dimension_numbers = #tpu.dot_dimension_numbers<[1], [0], [0], [1], [0, 0, 1, 1], [], []>} : vector<8x49xf32>, vector<49x32xf32>, vector<8x32xf32> -> vector<8x32xf32>
    %442 = arith.negf %441 : vector<8x32xf32>
    %443 = math.exp %442 : vector<8x32xf32>
    %cst_149 = arith.constant 1.000000e+00 : f32
    %444 = vector.broadcast %cst_149 : f32 to vector<8x32xf32>
    %445 = arith.addf %444, %443 : vector<8x32xf32>
    %446 = arith.divf %444, %445 : vector<8x32xf32>
    %cst_150 = arith.constant dense<0.000000e+00> : vector<8x32xf32>
    %447 = tpu.matmul %434, %7, %cst_150 {dimension_numbers = #tpu.dot_dimension_numbers<[1], [0], [0], [1], [0, 0, 1, 1], [], []>} : vector<8x49xf32>, vector<49x32xf32>, vector<8x32xf32> -> vector<8x32xf32>
    %448 = math.tanh %447 : vector<8x32xf32>
    %cst_151 = arith.constant dense<0.000000e+00> : vector<8x32xf32>
    %449 = tpu.matmul %434, %9, %cst_151 {dimension_numbers = #tpu.dot_dimension_numbers<[1], [0], [0], [1], [0, 0, 1, 1], [], []>} : vector<8x49xf32>, vector<49x32xf32>, vector<8x32xf32> -> vector<8x32xf32>
    %450 = arith.negf %449 : vector<8x32xf32>
    %451 = math.exp %450 : vector<8x32xf32>
    %cst_152 = arith.constant 1.000000e+00 : f32
    %452 = vector.broadcast %cst_152 : f32 to vector<8x32xf32>
    %453 = arith.addf %452, %451 : vector<8x32xf32>
    %454 = arith.divf %452, %453 : vector<8x32xf32>
    %455 = arith.mulf %446, %377 : vector<8x32xf32>
    %456 = arith.mulf %440, %448 : vector<8x32xf32>
    %457 = arith.addf %455, %456 : vector<8x32xf32>
    %458 = math.tanh %457 : vector<8x32xf32>
    %459 = arith.mulf %454, %458 : vector<8x32xf32>
    %460 = tpu.concatenate %459, %405, %1 in 1 : vector<8x32xf32>, vector<8x16xf32>, vector<8x1xf32> -> vector<8x49xf32>
    %cst_153 = arith.constant dense<0.000000e+00> : vector<8x16xf32>
    %461 = tpu.matmul %460, %13, %cst_153 {dimension_numbers = #tpu.dot_dimension_numbers<[1], [0], [0], [1], [0, 0, 1, 1], [], []>} : vector<8x49xf32>, vector<49x16xf32>, vector<8x16xf32> -> vector<8x16xf32>
    %462 = arith.negf %461 : vector<8x16xf32>
    %463 = math.exp %462 : vector<8x16xf32>
    %cst_154 = arith.constant 1.000000e+00 : f32
    %464 = vector.broadcast %cst_154 : f32 to vector<8x16xf32>
    %465 = arith.addf %464, %463 : vector<8x16xf32>
    %466 = arith.divf %464, %465 : vector<8x16xf32>
    %cst_155 = arith.constant dense<0.000000e+00> : vector<8x16xf32>
    %467 = tpu.matmul %460, %15, %cst_155 {dimension_numbers = #tpu.dot_dimension_numbers<[1], [0], [0], [1], [0, 0, 1, 1], [], []>} : vector<8x49xf32>, vector<49x16xf32>, vector<8x16xf32> -> vector<8x16xf32>
    %468 = arith.negf %467 : vector<8x16xf32>
    %469 = math.exp %468 : vector<8x16xf32>
    %cst_156 = arith.constant 1.000000e+00 : f32
    %470 = vector.broadcast %cst_156 : f32 to vector<8x16xf32>
    %471 = arith.addf %470, %469 : vector<8x16xf32>
    %472 = arith.divf %470, %471 : vector<8x16xf32>
    %cst_157 = arith.constant dense<0.000000e+00> : vector<8x16xf32>
    %473 = tpu.matmul %460, %17, %cst_157 {dimension_numbers = #tpu.dot_dimension_numbers<[1], [0], [0], [1], [0, 0, 1, 1], [], []>} : vector<8x49xf32>, vector<49x16xf32>, vector<8x16xf32> -> vector<8x16xf32>
    %474 = math.tanh %473 : vector<8x16xf32>
    %cst_158 = arith.constant dense<0.000000e+00> : vector<8x16xf32>
    %475 = tpu.matmul %460, %19, %cst_158 {dimension_numbers = #tpu.dot_dimension_numbers<[1], [0], [0], [1], [0, 0, 1, 1], [], []>} : vector<8x49xf32>, vector<49x16xf32>, vector<8x16xf32> -> vector<8x16xf32>
    %476 = arith.negf %475 : vector<8x16xf32>
    %477 = math.exp %476 : vector<8x16xf32>
    %cst_159 = arith.constant 1.000000e+00 : f32
    %478 = vector.broadcast %cst_159 : f32 to vector<8x16xf32>
    %479 = arith.addf %478, %477 : vector<8x16xf32>
    %480 = arith.divf %478, %479 : vector<8x16xf32>
    %481 = arith.mulf %472, %403 : vector<8x16xf32>
    %482 = arith.mulf %466, %474 : vector<8x16xf32>
    %483 = arith.addf %481, %482 : vector<8x16xf32>
    %484 = math.tanh %483 : vector<8x16xf32>
    %485 = arith.mulf %480, %484 : vector<8x16xf32>
    %486 = tpu.concatenate %485, %431, %1 in 1 : vector<8x16xf32>, vector<8x8xf32>, vector<8x1xf32> -> vector<8x25xf32>
    %cst_160 = arith.constant dense<0.000000e+00> : vector<8x8xf32>
    %487 = tpu.matmul %486, %23, %cst_160 {dimension_numbers = #tpu.dot_dimension_numbers<[1], [0], [0], [1], [0, 0, 1, 1], [], []>} : vector<8x25xf32>, vector<25x8xf32>, vector<8x8xf32> -> vector<8x8xf32>
    %488 = arith.negf %487 : vector<8x8xf32>
    %489 = math.exp %488 : vector<8x8xf32>
    %cst_161 = arith.constant 1.000000e+00 : f32
    %490 = vector.broadcast %cst_161 : f32 to vector<8x8xf32>
    %491 = arith.addf %490, %489 : vector<8x8xf32>
    %492 = arith.divf %490, %491 : vector<8x8xf32>
    %cst_162 = arith.constant dense<0.000000e+00> : vector<8x8xf32>
    %493 = tpu.matmul %486, %25, %cst_162 {dimension_numbers = #tpu.dot_dimension_numbers<[1], [0], [0], [1], [0, 0, 1, 1], [], []>} : vector<8x25xf32>, vector<25x8xf32>, vector<8x8xf32> -> vector<8x8xf32>
    %494 = arith.negf %493 : vector<8x8xf32>
    %495 = math.exp %494 : vector<8x8xf32>
    %cst_163 = arith.constant 1.000000e+00 : f32
    %496 = vector.broadcast %cst_163 : f32 to vector<8x8xf32>
    %497 = arith.addf %496, %495 : vector<8x8xf32>
    %498 = arith.divf %496, %497 : vector<8x8xf32>
    %cst_164 = arith.constant dense<0.000000e+00> : vector<8x8xf32>
    %499 = tpu.matmul %486, %27, %cst_164 {dimension_numbers = #tpu.dot_dimension_numbers<[1], [0], [0], [1], [0, 0, 1, 1], [], []>} : vector<8x25xf32>, vector<25x8xf32>, vector<8x8xf32> -> vector<8x8xf32>
    %500 = math.tanh %499 : vector<8x8xf32>
    %cst_165 = arith.constant dense<0.000000e+00> : vector<8x8xf32>
    %501 = tpu.matmul %486, %29, %cst_165 {dimension_numbers = #tpu.dot_dimension_numbers<[1], [0], [0], [1], [0, 0, 1, 1], [], []>} : vector<8x25xf32>, vector<25x8xf32>, vector<8x8xf32> -> vector<8x8xf32>
    %502 = arith.negf %501 : vector<8x8xf32>
    %503 = math.exp %502 : vector<8x8xf32>
    %cst_166 = arith.constant 1.000000e+00 : f32
    %504 = vector.broadcast %cst_166 : f32 to vector<8x8xf32>
    %505 = arith.addf %504, %503 : vector<8x8xf32>
    %506 = arith.divf %504, %505 : vector<8x8xf32>
    %507 = arith.mulf %498, %429 : vector<8x8xf32>
    %508 = arith.mulf %492, %500 : vector<8x8xf32>
    %509 = arith.addf %507, %508 : vector<8x8xf32>
    %510 = math.tanh %509 : vector<8x8xf32>
    %511 = arith.mulf %506, %510 : vector<8x8xf32>
    %512 = vector.extract_strided_slice %0 {offsets = [0, 6, 0], sizes = [8, 1, 16], strides = [1, 1, 1]} : vector<8x8x16xf32> to vector<8x1x16xf32>
    %513 = vector.shape_cast %512 : vector<8x1x16xf32> to vector<8x16xf32>
    %514 = tpu.concatenate %513, %459, %1 in 1 : vector<8x16xf32>, vector<8x32xf32>, vector<8x1xf32> -> vector<8x49xf32>
    %cst_167 = arith.constant dense<0.000000e+00> : vector<8x32xf32>
    %515 = tpu.matmul %514, %3, %cst_167 {dimension_numbers = #tpu.dot_dimension_numbers<[1], [0], [0], [1], [0, 0, 1, 1], [], []>} : vector<8x49xf32>, vector<49x32xf32>, vector<8x32xf32> -> vector<8x32xf32>
    %516 = arith.negf %515 : vector<8x32xf32>
    %517 = math.exp %516 : vector<8x32xf32>
    %cst_168 = arith.constant 1.000000e+00 : f32
    %518 = vector.broadcast %cst_168 : f32 to vector<8x32xf32>
    %519 = arith.addf %518, %517 : vector<8x32xf32>
    %520 = arith.divf %518, %519 : vector<8x32xf32>
    %cst_169 = arith.constant dense<0.000000e+00> : vector<8x32xf32>
    %521 = tpu.matmul %514, %5, %cst_169 {dimension_numbers = #tpu.dot_dimension_numbers<[1], [0], [0], [1], [0, 0, 1, 1], [], []>} : vector<8x49xf32>, vector<49x32xf32>, vector<8x32xf32> -> vector<8x32xf32>
    %522 = arith.negf %521 : vector<8x32xf32>
    %523 = math.exp %522 : vector<8x32xf32>
    %cst_170 = arith.constant 1.000000e+00 : f32
    %524 = vector.broadcast %cst_170 : f32 to vector<8x32xf32>
    %525 = arith.addf %524, %523 : vector<8x32xf32>
    %526 = arith.divf %524, %525 : vector<8x32xf32>
    %cst_171 = arith.constant dense<0.000000e+00> : vector<8x32xf32>
    %527 = tpu.matmul %514, %7, %cst_171 {dimension_numbers = #tpu.dot_dimension_numbers<[1], [0], [0], [1], [0, 0, 1, 1], [], []>} : vector<8x49xf32>, vector<49x32xf32>, vector<8x32xf32> -> vector<8x32xf32>
    %528 = math.tanh %527 : vector<8x32xf32>
    %cst_172 = arith.constant dense<0.000000e+00> : vector<8x32xf32>
    %529 = tpu.matmul %514, %9, %cst_172 {dimension_numbers = #tpu.dot_dimension_numbers<[1], [0], [0], [1], [0, 0, 1, 1], [], []>} : vector<8x49xf32>, vector<49x32xf32>, vector<8x32xf32> -> vector<8x32xf32>
    %530 = arith.negf %529 : vector<8x32xf32>
    %531 = math.exp %530 : vector<8x32xf32>
    %cst_173 = arith.constant 1.000000e+00 : f32
    %532 = vector.broadcast %cst_173 : f32 to vector<8x32xf32>
    %533 = arith.addf %532, %531 : vector<8x32xf32>
    %534 = arith.divf %532, %533 : vector<8x32xf32>
    %535 = arith.mulf %526, %457 : vector<8x32xf32>
    %536 = arith.mulf %520, %528 : vector<8x32xf32>
    %537 = arith.addf %535, %536 : vector<8x32xf32>
    %538 = math.tanh %537 : vector<8x32xf32>
    %539 = arith.mulf %534, %538 : vector<8x32xf32>
    %540 = tpu.concatenate %539, %485, %1 in 1 : vector<8x32xf32>, vector<8x16xf32>, vector<8x1xf32> -> vector<8x49xf32>
    %cst_174 = arith.constant dense<0.000000e+00> : vector<8x16xf32>
    %541 = tpu.matmul %540, %13, %cst_174 {dimension_numbers = #tpu.dot_dimension_numbers<[1], [0], [0], [1], [0, 0, 1, 1], [], []>} : vector<8x49xf32>, vector<49x16xf32>, vector<8x16xf32> -> vector<8x16xf32>
    %542 = arith.negf %541 : vector<8x16xf32>
    %543 = math.exp %542 : vector<8x16xf32>
    %cst_175 = arith.constant 1.000000e+00 : f32
    %544 = vector.broadcast %cst_175 : f32 to vector<8x16xf32>
    %545 = arith.addf %544, %543 : vector<8x16xf32>
    %546 = arith.divf %544, %545 : vector<8x16xf32>
    %cst_176 = arith.constant dense<0.000000e+00> : vector<8x16xf32>
    %547 = tpu.matmul %540, %15, %cst_176 {dimension_numbers = #tpu.dot_dimension_numbers<[1], [0], [0], [1], [0, 0, 1, 1], [], []>} : vector<8x49xf32>, vector<49x16xf32>, vector<8x16xf32> -> vector<8x16xf32>
    %548 = arith.negf %547 : vector<8x16xf32>
    %549 = math.exp %548 : vector<8x16xf32>
    %cst_177 = arith.constant 1.000000e+00 : f32
    %550 = vector.broadcast %cst_177 : f32 to vector<8x16xf32>
    %551 = arith.addf %550, %549 : vector<8x16xf32>
    %552 = arith.divf %550, %551 : vector<8x16xf32>
    %cst_178 = arith.constant dense<0.000000e+00> : vector<8x16xf32>
    %553 = tpu.matmul %540, %17, %cst_178 {dimension_numbers = #tpu.dot_dimension_numbers<[1], [0], [0], [1], [0, 0, 1, 1], [], []>} : vector<8x49xf32>, vector<49x16xf32>, vector<8x16xf32> -> vector<8x16xf32>
    %554 = math.tanh %553 : vector<8x16xf32>
    %cst_179 = arith.constant dense<0.000000e+00> : vector<8x16xf32>
    %555 = tpu.matmul %540, %19, %cst_179 {dimension_numbers = #tpu.dot_dimension_numbers<[1], [0], [0], [1], [0, 0, 1, 1], [], []>} : vector<8x49xf32>, vector<49x16xf32>, vector<8x16xf32> -> vector<8x16xf32>
    %556 = arith.negf %555 : vector<8x16xf32>
    %557 = math.exp %556 : vector<8x16xf32>
    %cst_180 = arith.constant 1.000000e+00 : f32
    %558 = vector.broadcast %cst_180 : f32 to vector<8x16xf32>
    %559 = arith.addf %558, %557 : vector<8x16xf32>
    %560 = arith.divf %558, %559 : vector<8x16xf32>
    %561 = arith.mulf %552, %483 : vector<8x16xf32>
    %562 = arith.mulf %546, %554 : vector<8x16xf32>
    %563 = arith.addf %561, %562 : vector<8x16xf32>
    %564 = math.tanh %563 : vector<8x16xf32>
    %565 = arith.mulf %560, %564 : vector<8x16xf32>
    %566 = tpu.concatenate %565, %511, %1 in 1 : vector<8x16xf32>, vector<8x8xf32>, vector<8x1xf32> -> vector<8x25xf32>
    %cst_181 = arith.constant dense<0.000000e+00> : vector<8x8xf32>
    %567 = tpu.matmul %566, %23, %cst_181 {dimension_numbers = #tpu.dot_dimension_numbers<[1], [0], [0], [1], [0, 0, 1, 1], [], []>} : vector<8x25xf32>, vector<25x8xf32>, vector<8x8xf32> -> vector<8x8xf32>
    %568 = arith.negf %567 : vector<8x8xf32>
    %569 = math.exp %568 : vector<8x8xf32>
    %cst_182 = arith.constant 1.000000e+00 : f32
    %570 = vector.broadcast %cst_182 : f32 to vector<8x8xf32>
    %571 = arith.addf %570, %569 : vector<8x8xf32>
    %572 = arith.divf %570, %571 : vector<8x8xf32>
    %cst_183 = arith.constant dense<0.000000e+00> : vector<8x8xf32>
    %573 = tpu.matmul %566, %25, %cst_183 {dimension_numbers = #tpu.dot_dimension_numbers<[1], [0], [0], [1], [0, 0, 1, 1], [], []>} : vector<8x25xf32>, vector<25x8xf32>, vector<8x8xf32> -> vector<8x8xf32>
    %574 = arith.negf %573 : vector<8x8xf32>
    %575 = math.exp %574 : vector<8x8xf32>
    %cst_184 = arith.constant 1.000000e+00 : f32
    %576 = vector.broadcast %cst_184 : f32 to vector<8x8xf32>
    %577 = arith.addf %576, %575 : vector<8x8xf32>
    %578 = arith.divf %576, %577 : vector<8x8xf32>
    %cst_185 = arith.constant dense<0.000000e+00> : vector<8x8xf32>
    %579 = tpu.matmul %566, %27, %cst_185 {dimension_numbers = #tpu.dot_dimension_numbers<[1], [0], [0], [1], [0, 0, 1, 1], [], []>} : vector<8x25xf32>, vector<25x8xf32>, vector<8x8xf32> -> vector<8x8xf32>
    %580 = math.tanh %579 : vector<8x8xf32>
    %cst_186 = arith.constant dense<0.000000e+00> : vector<8x8xf32>
    %581 = tpu.matmul %566, %29, %cst_186 {dimension_numbers = #tpu.dot_dimension_numbers<[1], [0], [0], [1], [0, 0, 1, 1], [], []>} : vector<8x25xf32>, vector<25x8xf32>, vector<8x8xf32> -> vector<8x8xf32>
    %582 = arith.negf %581 : vector<8x8xf32>
    %583 = math.exp %582 : vector<8x8xf32>
    %cst_187 = arith.constant 1.000000e+00 : f32
    %584 = vector.broadcast %cst_187 : f32 to vector<8x8xf32>
    %585 = arith.addf %584, %583 : vector<8x8xf32>
    %586 = arith.divf %584, %585 : vector<8x8xf32>
    %587 = arith.mulf %578, %509 : vector<8x8xf32>
    %588 = arith.mulf %572, %580 : vector<8x8xf32>
    %589 = arith.addf %587, %588 : vector<8x8xf32>
    %590 = math.tanh %589 : vector<8x8xf32>
    %591 = arith.mulf %586, %590 : vector<8x8xf32>
    %592 = vector.extract_strided_slice %0 {offsets = [0, 7, 0], sizes = [8, 1, 16], strides = [1, 1, 1]} : vector<8x8x16xf32> to vector<8x1x16xf32>
    %593 = vector.shape_cast %592 : vector<8x1x16xf32> to vector<8x16xf32>
    %594 = tpu.concatenate %593, %539, %1 in 1 : vector<8x16xf32>, vector<8x32xf32>, vector<8x1xf32> -> vector<8x49xf32>
    %cst_188 = arith.constant dense<0.000000e+00> : vector<8x32xf32>
    %595 = tpu.matmul %594, %3, %cst_188 {dimension_numbers = #tpu.dot_dimension_numbers<[1], [0], [0], [1], [0, 0, 1, 1], [], []>} : vector<8x49xf32>, vector<49x32xf32>, vector<8x32xf32> -> vector<8x32xf32>
    %596 = arith.negf %595 : vector<8x32xf32>
    %597 = math.exp %596 : vector<8x32xf32>
    %cst_189 = arith.constant 1.000000e+00 : f32
    %598 = vector.broadcast %cst_189 : f32 to vector<8x32xf32>
    %599 = arith.addf %598, %597 : vector<8x32xf32>
    %600 = arith.divf %598, %599 : vector<8x32xf32>
    %cst_190 = arith.constant dense<0.000000e+00> : vector<8x32xf32>
    %601 = tpu.matmul %594, %5, %cst_190 {dimension_numbers = #tpu.dot_dimension_numbers<[1], [0], [0], [1], [0, 0, 1, 1], [], []>} : vector<8x49xf32>, vector<49x32xf32>, vector<8x32xf32> -> vector<8x32xf32>
    %602 = arith.negf %601 : vector<8x32xf32>
    %603 = math.exp %602 : vector<8x32xf32>
    %cst_191 = arith.constant 1.000000e+00 : f32
    %604 = vector.broadcast %cst_191 : f32 to vector<8x32xf32>
    %605 = arith.addf %604, %603 : vector<8x32xf32>
    %606 = arith.divf %604, %605 : vector<8x32xf32>
    %cst_192 = arith.constant dense<0.000000e+00> : vector<8x32xf32>
    %607 = tpu.matmul %594, %7, %cst_192 {dimension_numbers = #tpu.dot_dimension_numbers<[1], [0], [0], [1], [0, 0, 1, 1], [], []>} : vector<8x49xf32>, vector<49x32xf32>, vector<8x32xf32> -> vector<8x32xf32>
    %608 = math.tanh %607 : vector<8x32xf32>
    %cst_193 = arith.constant dense<0.000000e+00> : vector<8x32xf32>
    %609 = tpu.matmul %594, %9, %cst_193 {dimension_numbers = #tpu.dot_dimension_numbers<[1], [0], [0], [1], [0, 0, 1, 1], [], []>} : vector<8x49xf32>, vector<49x32xf32>, vector<8x32xf32> -> vector<8x32xf32>
    %610 = arith.negf %609 : vector<8x32xf32>
    %611 = math.exp %610 : vector<8x32xf32>
    %cst_194 = arith.constant 1.000000e+00 : f32
    %612 = vector.broadcast %cst_194 : f32 to vector<8x32xf32>
    %613 = arith.addf %612, %611 : vector<8x32xf32>
    %614 = arith.divf %612, %613 : vector<8x32xf32>
    %615 = arith.mulf %606, %537 : vector<8x32xf32>
    %616 = arith.mulf %600, %608 : vector<8x32xf32>
    %617 = arith.addf %615, %616 : vector<8x32xf32>
    %618 = math.tanh %617 : vector<8x32xf32>
    %619 = arith.mulf %614, %618 : vector<8x32xf32>
    %620 = tpu.concatenate %619, %565, %1 in 1 : vector<8x32xf32>, vector<8x16xf32>, vector<8x1xf32> -> vector<8x49xf32>
    %cst_195 = arith.constant dense<0.000000e+00> : vector<8x16xf32>
    %621 = tpu.matmul %620, %13, %cst_195 {dimension_numbers = #tpu.dot_dimension_numbers<[1], [0], [0], [1], [0, 0, 1, 1], [], []>} : vector<8x49xf32>, vector<49x16xf32>, vector<8x16xf32> -> vector<8x16xf32>
    %622 = arith.negf %621 : vector<8x16xf32>
    %623 = math.exp %622 : vector<8x16xf32>
    %cst_196 = arith.constant 1.000000e+00 : f32
    %624 = vector.broadcast %cst_196 : f32 to vector<8x16xf32>
    %625 = arith.addf %624, %623 : vector<8x16xf32>
    %626 = arith.divf %624, %625 : vector<8x16xf32>
    %cst_197 = arith.constant dense<0.000000e+00> : vector<8x16xf32>
    %627 = tpu.matmul %620, %15, %cst_197 {dimension_numbers = #tpu.dot_dimension_numbers<[1], [0], [0], [1], [0, 0, 1, 1], [], []>} : vector<8x49xf32>, vector<49x16xf32>, vector<8x16xf32> -> vector<8x16xf32>
    %628 = arith.negf %627 : vector<8x16xf32>
    %629 = math.exp %628 : vector<8x16xf32>
    %cst_198 = arith.constant 1.000000e+00 : f32
    %630 = vector.broadcast %cst_198 : f32 to vector<8x16xf32>
    %631 = arith.addf %630, %629 : vector<8x16xf32>
    %632 = arith.divf %630, %631 : vector<8x16xf32>
    %cst_199 = arith.constant dense<0.000000e+00> : vector<8x16xf32>
    %633 = tpu.matmul %620, %17, %cst_199 {dimension_numbers = #tpu.dot_dimension_numbers<[1], [0], [0], [1], [0, 0, 1, 1], [], []>} : vector<8x49xf32>, vector<49x16xf32>, vector<8x16xf32> -> vector<8x16xf32>
    %634 = math.tanh %633 : vector<8x16xf32>
    %cst_200 = arith.constant dense<0.000000e+00> : vector<8x16xf32>
    %635 = tpu.matmul %620, %19, %cst_200 {dimension_numbers = #tpu.dot_dimension_numbers<[1], [0], [0], [1], [0, 0, 1, 1], [], []>} : vector<8x49xf32>, vector<49x16xf32>, vector<8x16xf32> -> vector<8x16xf32>
    %636 = arith.negf %635 : vector<8x16xf32>
    %637 = math.exp %636 : vector<8x16xf32>
    %cst_201 = arith.constant 1.000000e+00 : f32
    %638 = vector.broadcast %cst_201 : f32 to vector<8x16xf32>
    %639 = arith.addf %638, %637 : vector<8x16xf32>
    %640 = arith.divf %638, %639 : vector<8x16xf32>
    %641 = arith.mulf %632, %563 : vector<8x16xf32>
    %642 = arith.mulf %626, %634 : vector<8x16xf32>
    %643 = arith.addf %641, %642 : vector<8x16xf32>
    %644 = math.tanh %643 : vector<8x16xf32>
    %645 = arith.mulf %640, %644 : vector<8x16xf32>
    %646 = tpu.concatenate %645, %591, %1 in 1 : vector<8x16xf32>, vector<8x8xf32>, vector<8x1xf32> -> vector<8x25xf32>
    %cst_202 = arith.constant dense<0.000000e+00> : vector<8x8xf32>
    %647 = tpu.matmul %646, %23, %cst_202 {dimension_numbers = #tpu.dot_dimension_numbers<[1], [0], [0], [1], [0, 0, 1, 1], [], []>} : vector<8x25xf32>, vector<25x8xf32>, vector<8x8xf32> -> vector<8x8xf32>
    %648 = arith.negf %647 : vector<8x8xf32>
    %649 = math.exp %648 : vector<8x8xf32>
    %cst_203 = arith.constant 1.000000e+00 : f32
    %650 = vector.broadcast %cst_203 : f32 to vector<8x8xf32>
    %651 = arith.addf %650, %649 : vector<8x8xf32>
    %652 = arith.divf %650, %651 : vector<8x8xf32>
    %cst_204 = arith.constant dense<0.000000e+00> : vector<8x8xf32>
    %653 = tpu.matmul %646, %25, %cst_204 {dimension_numbers = #tpu.dot_dimension_numbers<[1], [0], [0], [1], [0, 0, 1, 1], [], []>} : vector<8x25xf32>, vector<25x8xf32>, vector<8x8xf32> -> vector<8x8xf32>
    %654 = arith.negf %653 : vector<8x8xf32>
    %655 = math.exp %654 : vector<8x8xf32>
    %cst_205 = arith.constant 1.000000e+00 : f32
    %656 = vector.broadcast %cst_205 : f32 to vector<8x8xf32>
    %657 = arith.addf %656, %655 : vector<8x8xf32>
    %658 = arith.divf %656, %657 : vector<8x8xf32>
    %cst_206 = arith.constant dense<0.000000e+00> : vector<8x8xf32>
    %659 = tpu.matmul %646, %27, %cst_206 {dimension_numbers = #tpu.dot_dimension_numbers<[1], [0], [0], [1], [0, 0, 1, 1], [], []>} : vector<8x25xf32>, vector<25x8xf32>, vector<8x8xf32> -> vector<8x8xf32>
    %660 = math.tanh %659 : vector<8x8xf32>
    %cst_207 = arith.constant dense<0.000000e+00> : vector<8x8xf32>
    %661 = tpu.matmul %646, %29, %cst_207 {dimension_numbers = #tpu.dot_dimension_numbers<[1], [0], [0], [1], [0, 0, 1, 1], [], []>} : vector<8x25xf32>, vector<25x8xf32>, vector<8x8xf32> -> vector<8x8xf32>
    %662 = arith.negf %661 : vector<8x8xf32>
    %663 = math.exp %662 : vector<8x8xf32>
    %cst_208 = arith.constant 1.000000e+00 : f32
    %664 = vector.broadcast %cst_208 : f32 to vector<8x8xf32>
    %665 = arith.addf %664, %663 : vector<8x8xf32>
    %666 = arith.divf %664, %665 : vector<8x8xf32>
    %667 = arith.mulf %658, %589 : vector<8x8xf32>
    %668 = arith.mulf %652, %660 : vector<8x8xf32>
    %669 = arith.addf %667, %668 : vector<8x8xf32>
    %670 = math.tanh %669 : vector<8x8xf32>
    %671 = arith.mulf %666, %670 : vector<8x8xf32>
    %c0_209 = arith.constant 0 : index
    %c0_210 = arith.constant 0 : index
    %672 = vector.load %arg4[%c0_209, %c0_210] : memref<8x4xf32, #tpu.memory_space<vmem>>, vector<8x4xf32>
    %cst_211 = arith.constant dense<0.000000e+00> : vector<8x4xf32>
    %673 = tpu.matmul %671, %672, %cst_211 {dimension_numbers = #tpu.dot_dimension_numbers<[1], [0], [0], [1], [0, 0, 1, 1], [], []>} : vector<8x8xf32>, vector<8x4xf32>, vector<8x4xf32> -> vector<8x4xf32>
    %c0_212 = arith.constant 0 : index
    %c0_213 = arith.constant 0 : index
    %674 = vector.load %arg5[%c0_212, %c0_213] : memref<1x4xf32, #tpu.memory_space<vmem>>, vector<1x4xf32>
    %675 = vector.broadcast %674 : vector<1x4xf32> to vector<8x4xf32>
    %676 = arith.addf %673, %675 : vector<8x4xf32>
    %c0_214 = arith.constant 0 : index
    %c0_215 = arith.constant 0 : index
    %677 = vector.load %arg6[%c0_214, %c0_215] : memref<8x4xf32, #tpu.memory_space<vmem>>, vector<8x4xf32>
    tpu.vector_store %arg6[%c0_214, %c0_215], %676 {strides = array<i32>} : memref<8x4xf32, #tpu.memory_space<vmem>>, vector<8x4xf32>,
    return
  }
}

</mosaic_0001>

<bundles_post_ra>
// kernel: lstm_rnn_forward.1
= control target key start
LH: loop header
LB: loop body
LE: loop exit
PB: predicated region body
PF: predicated region fallthrough
CT: control target
= control target key end

     0   :  { %11 = vsyncpa [#allocation3], 0  ;;  %s13242_s0 = inlined_call_operand.hbm [shape: f32[8,8,16], index: 0, kind: input, shape index: {}]   ;;  %s13243_s1 = inlined_call_operand.hbm [shape: f32[4,49,32], index: 1, kind: input, shape index: {}]   ;;  %s13244_s2 = inlined_call_operand.hbm [shape: f32[4,49,16], index: 2, kind: input, shape index: {}]   ;;  %s13245_s3 = inlined_call_operand.hbm [shape: f32[4,25,8], index: 3, kind: input, shape index: {}]   ;;  %s13246_s4 = inlined_call_operand.vmem [shape: f32[8,4], index: 4, kind: input, shape index: {}]   ;;  %s13247_s5 = inlined_call_operand.vmem [shape: f32[1,4], index: 5, kind: input, shape index: {}]   ;;  %s13248_s6 = inlined_call_operand.vmem [shape: f32[8,4], index: 6, kind: output, shape index: {}]  }
   0x1   :  { %12 = vsyncpa [#allocation5], 0 }
   0x2   :  { %13 = vsyncpa [#allocation8], 0  ;;  %s11635_s21 = smov [#allocation4]   ;;  %s11636_s23 = smov [#allocation2]  }
   0x3   :  { %s31_s22 = sshll.u32 %s11635_s21, 4  ;;  %s19_s24 = sshll.u32 %s11636_s23, 4  ;;  %s32_s22 = int_to_ptr.vmem [resolvable:$true] %s31_s22  ;;  %s11682_s24 = int_to_ptr.vmem [resolvable:$true] %s19_s24 }
   0x4   :  { %s11541_s27 = scalar_lea.hbm %s13243_s1, 3584 }
   0x5   :  { %p11542_p0 = scmp.ne.s32.totalorder %s13243_s1, %s11541_s27  ;;  %p11545_p1 = scmp.lt.u32.totalorder %s11541_s27, %s13243_s1 }
   0x7   :  { %p11547_p2 = pnand %p11545_p1, %p11542_p0 }
   0x9   :  { %11550 = shalt.err (!%p11547_p2)
}
   0xa   :  { %s11551_s8 = scalar_lea.vmem %s32_s22, 3584  ;;  %p11556_p4 = scmp.lt.s32.totalorder %s32_s22, %s32_s22 }
   0xb   :  { %p11552_p3 = scmp.ne.s32.totalorder %s32_s22, %s11551_s8  ;;  %p11557_p5 = scmp.lt.s32.totalorder %s11551_s8, %s11551_s8 }
   0xd   :  { %p11558_p6 = por %p11557_p5, %p11556_p4 }
   0xf   :  { %p11559_p7 = pnand %p11558_p6, %p11552_p3 }
  0x11   :  { %11562 = shalt.err (!%p11559_p7)
}
  0x12   :  { %s11637_s9 = smov 128   ;;  %s11638_s10 = smov 8  }
  0x13   :  { %37 = dma.hbm_to_vmem [thread:$0]  %s13243_s1, 3584, %s32_s22, [#allocation5], %s11637_s9, %s11637_s9, %s11638_s10  }
  0x14   :  { %s11563_s15 = scalar_lea.hbm %s13242_s0, 1024 }
  0x15   :  { %p11564_p8 = scmp.ne.s32.totalorder %s13242_s0, %s11563_s15  ;;  %p11567_p9 = scmp.lt.u32.totalorder %s11563_s15, %s13242_s0 }
  0x17   :  { %p11569_p10 = pnand %p11567_p9, %p11564_p8 }
  0x19   :  { %11572 = shalt.err (!%p11569_p10)
}
  0x1a   :  { %s11573_s20 = scalar_lea.vmem %s11682_s24, 1024  ;;  %p11578_p12 = scmp.lt.s32.totalorder %s11682_s24, %s11682_s24 }
  0x1b   :  { %p11574_p11 = scmp.ne.s32.totalorder %s11682_s24, %s11573_s20  ;;  %p11579_p13 = scmp.lt.s32.totalorder %s11573_s20, %s11573_s20 }
  0x1d   :  { %p11580_p0 = por %p11579_p13, %p11578_p12 }
  0x1f   :  { %p11581_p1 = pnand %p11580_p0, %p11574_p11 }
  0x21   :  { %11584 = shalt.err (!%p11581_p1)
}
  0x22   :  { %25 = dma.hbm_to_vmem [thread:$0]  %s13242_s0, 1024, %s11682_s24, [#allocation3], %s11637_s9, %s11637_s9, %s11638_s10  }
  0x23   :  { %s11639_s22 = smov [#allocation6]   ;;  %s11640_s25 = smov [#allocation7]  }
  0x24   :  { %s43_s23 = sshll.u32 %s11639_s22, 4  ;;  %s55_s26 = sshll.u32 %s11640_s25, 4  ;;  %s44_s23 = int_to_ptr.vmem [resolvable:$true] %s43_s23  ;;  %s11719_s26 = int_to_ptr.vmem [resolvable:$true] %s55_s26 }
  0x25   :  { %s11585_s29 = scalar_lea.hbm %s13244_s2, 3584 }
  0x26   :  { %p11586_p2 = scmp.ne.s32.totalorder %s13244_s2, %s11585_s29  ;;  %p11589_p3 = scmp.lt.u32.totalorder %s11585_s29, %s13244_s2 }
  0x28   :  { %p11591_p4 = pnand %p11589_p3, %p11586_p2 }
  0x2a   :  { %11594 = shalt.err (!%p11591_p4)
}
  0x2b   :  { %s11595_s0 = scalar_lea.vmem %s44_s23, 3584  ;;  %p11600_p6 = scmp.lt.s32.totalorder %s44_s23, %s44_s23 }
  0x2c   :  { %p11596_p5 = scmp.ne.s32.totalorder %s44_s23, %s11595_s0  ;;  %p11601_p7 = scmp.lt.s32.totalorder %s11595_s0, %s11595_s0 }
  0x2e   :  { %p11602_p8 = por %p11601_p7, %p11600_p6 }
  0x30   :  { %p11603_p9 = pnand %p11602_p8, %p11596_p5 }
  0x32   :  { %11606 = shalt.err (!%p11603_p9)
}
  0x33   :  { %49 = dma.hbm_to_vmem [thread:$0]  %s13244_s2, 3584, %s44_s23, [#allocation5], %s11637_s9, %s11637_s9, %s11638_s10  }
  0x34   :  { %s11607_s15 = scalar_lea.hbm %s13245_s3, 2048 }
  0x35   :  { %p11608_p10 = scmp.ne.s32.totalorder %s13245_s3, %s11607_s15  ;;  %p11611_p11 = scmp.lt.u32.totalorder %s11607_s15, %s13245_s3 }
  0x37   :  { %p11613_p12 = pnand %p11611_p11, %p11608_p10 }
  0x39   :  { %11616 = shalt.err (!%p11613_p12)
}
  0x3a   :  { %s11617_s20 = scalar_lea.vmem %s11719_s26, 2048  ;;  %p11622_p0 = scmp.lt.s32.totalorder %s11719_s26, %s11719_s26 }
  0x3b   :  { %p11618_p13 = scmp.ne.s32.totalorder %s11719_s26, %s11617_s20  ;;  %p11623_p1 = scmp.lt.s32.totalorder %s11617_s20, %s11617_s20 }
  0x3d   :  { %p11624_p2 = por %p11623_p1, %p11622_p0 }
  0x3f   :  { %p11625_p3 = pnand %p11624_p2, %p11618_p13 }
  0x41   :  { %11628 = shalt.err (!%p11625_p3)
}
  0x42   :  { %61 = dma.hbm_to_vmem [thread:$0]  %s13245_s3, 2048, %s11719_s26, [#allocation8], %s11637_s9, %s11637_s9, %s11638_s10  }
  0x43   :  { %11629 = dma.done.wait [#allocation3], 1024  }
  0x44   :  { %11630 = vsyncadd [#allocation3], 4294966272 }
  0x45   :  { %11631 = dma.done.wait [#allocation5], 7168  }
  0x46   :  { %11632 = vsyncadd [#allocation5], 4294960128 }
  0x47   :  { %11633 = dma.done.wait [#allocation8], 2048  }
  0x48   :  { %11634 = vsyncadd [#allocation8], 4294965248  ;;  %v13253_v0 = vmov 0.0|0.0   ;;  %vm11642_vm0 = vmmov 0   ;;  %v13249_v1 = vmov 0.0   ;;  %v86_v2 = vld [vmem:[#allocation4] sm:$0xff] }
  0x49   :  { %10327 = vmatprep.subr.bf16.mxu0 %v13253_v0  ;;  %10336 = vmatprep.subr.bf16.mxu1 %v13253_v0  ;;  %v87_v3 = vld [vmem:[#allocation4 + $0x8] sm:$0xff]  ;;  %v94_v4 = vld [vmem:[#allocation4 + $0x38] sm:$0xff]  ;;  %v95_v6 = vld [vmem:[#allocation4 + $0x40] sm:$0xff]  ;;  %vm176_vm1 = vcmask 1041409   ;;  %vm13251_vm2 = vcmask 1042434   ;;  %vm182_vm3 = vcmask 1043459  }
  0x4a   :  { %8896 = vmatprep.mubr.msk.f32.mxu0 %vm11642_vm0, %v13249_v1  ;;  %8913 = vmatprep.mubr.msk.f32.mxu1 %vm11642_vm0, %v13249_v1  ;;  %v11762_v5 = vpack.c.bf16 %v87_v3, %v86_v2  ;;  %v88_v7 = vld [vmem:[#allocation4 + $0x10] sm:$0xff]  ;;  %v89_v8 = vld [vmem:[#allocation4 + $0x18] sm:$0xff]  ;;  %v11764_v9 = vpack.c.bf16 %v95_v6, %v94_v4  ;;  %v96_v10 = vld [vmem:[#allocation4 + $0x48] sm:$0xff]  ;;  %vm185_vm4 = vcmask 1044484   ;;  %vm188_vm5 = vcmask 1045509   ;;  %s11644_s3 = smov 16  }
  0x4b   :  { %v97_v11 = vld [vmem:[#allocation4 + $0x50] sm:$0xff]  ;;  %v11767_v12 = vpack.c.bf16 %v89_v8, %v88_v7  ;;  %v90_v13 = vld [vmem:[#allocation4 + $0x20] sm:$0xff]  ;;  %v91_v14 = vld [vmem:[#allocation4 + $0x28] sm:$0xff]  ;;  %vm191_vm6 = vcmask 1046534   ;;  %vm194_vm7 = vcmask 1047559   ;;  %vm205_vm8 = vcmask 1040384  }
  0x4c   :  { %10329 = vmatpush3.bf16.msra.mxu0 %v11762_v5  ;;  %10338 = vmatpush3.bf16.msra.mxu1 %v11764_v9  ;;  %v11771_v15 = vpack.c.bf16 %v97_v11, %v96_v10  ;;  %v98_v16 = vld [vmem:[#allocation4 + $0x58] sm:$0xff]  ;;  %v99_v17 = vld [vmem:[#allocation4 + $0x60] sm:$0xff]  ;;  %v79_v19 = vld [vmem:[#allocation2 + $0x8] sm:$0xff]  ;;  %v11783_v28 = vpack.c.bf16 %v91_v14, %v90_v13  ;;  %vm197_vm9 = vcmask 130048   ;;  %vm199_vm10 = vcmask 392192   ;;  %s11646_s9 = smov 32  }
  0x4d   :  { %10330 = vmatprep.subr.bf16.mxu0 %v13253_v0  ;;  %v11773_v18 = vld [vmem:[#allocation2] sm:$0xff]  ;;  %10339 = vmatprep.subr.bf16.mxu1 %v13253_v0  ;;  %v80_v20 = vld [vmem:[#allocation2 + $0x10] sm:$0xff]  ;;  %v81_v21 = vld [vmem:[#allocation2 + $0x18] sm:$0xff]  ;;  %v11776_v25 = vrot.slane %v79_v19, 7  ;;  %v11789_v31 = vpack.c.bf16 %v99_v17, %v98_v16  ;;  %vm201_vm11 = vcmask 400384   ;;  %vm522_vm12 = vcmask 261120  }
  0x4e   :  { %v82_v22 = vld [vmem:[#allocation2 + $0x20] sm:$0xff]  ;;  %v83_v23 = vld [vmem:[#allocation2 + $0x28] sm:$0xff]  ;;  %v84_v24 = vld [vmem:[#allocation2 + $0x30] sm:$0xff]  ;;  %v11778_v26 = vrot.slane %v80_v20, 6  ;;  %v11780_v27 = vrot.slane %v81_v21, 5  ;;  %vm11645_vm13 = vmmov 1  }
  0x4f   :  { %v85_v29 = vld [vmem:[#allocation2 + $0x38] sm:$0xff]  ;;  %v11785_v30 = vrot.slane %v82_v22, 4  ;;  %v177_v32 = vsel %vm176_vm1, %v11776_v25, %v11773_v18  ;;  %v11794_v33 = vrot.slane %v83_v23, 3  ;;  %v11799_v35 = vrot.slane %v84_v24, 2  ;;  %v102_v39 = vld [vmem:[#allocation4 + $0x70] sm:$0xff]  ;;  %v110_v43 = vld [vmem:[#allocation4 + $0xa8] sm:$0xff] }
  0x50   :  { %10332 = vmatpush3.bf16.msra.mxu0 %v11767_v12  ;;  %10341 = vmatpush3.bf16.msra.mxu1 %v11771_v15  ;;  %v180_v34 = vsel %vm13251_vm2, %v11778_v26, %v177_v32  ;;  %v11803_v37 = vrot.slane %v85_v29, 1  ;;  %v103_v40 = vld [vmem:[#allocation4 + $0x78] sm:$0xff]  ;;  %v11810_v41 = vld [vmem:[#allocation4 + $0x30] sm:$0x1]  ;;  %v11815_v45 = vld [vmem:[#allocation4 + $0x68] sm:$0x1] }
  0x51   :  { %10333 = vmatprep.subr.bf16.mxu0 %v13253_v0  ;;  %10342 = vmatprep.subr.bf16.mxu1 %v13253_v0  ;;  %v183_v36 = vsel %vm182_vm3, %v11780_v27, %v180_v34  ;;  %v111_v44 = vld [vmem:[#allocation4 + $0xb0] sm:$0xff]  ;;  %v11821_v48 = vpack.c.bf16 %v103_v40, %v102_v39  ;;  %v104_v51 = vld [vmem:[#allocation4 + $0x80] sm:$0xff]  ;;  %v105_v52 = vld [vmem:[#allocation4 + $0x88] sm:$0xff]  ;;  %vm845_vm15 = vcmask 195584  }
  0x52   :  { %v186_v38 = vsel %vm185_vm4, %v11785_v30, %v183_v36  ;;  %v11826_v50 = vpack.c.bf16 %v111_v44, %v110_v43  ;;  %v112_v54 = vld [vmem:[#allocation4 + $0xb8] sm:$0xff]  ;;  %v113_v55 = vld [vmem:[#allocation4 + $0xc0] sm:$0xff]  ;;  %v11836_v56 = vpack.c.bf16 %v105_v52, %v104_v51  ;;  %v106_v58 = vld [vmem:[#allocation4 + $0x90] sm:$0xff] }
  0x53   :  { %v189_v42 = vsel %vm188_vm5, %v11794_v33, %v186_v38  ;;  %v11840_v57 = vpack.c.bf16 %v113_v55, %v112_v54  ;;  %v107_v59 = vld [vmem:[#allocation4 + $0x98] sm:$0xff]  ;;  %v114_v60 = vld [vmem:[#allocation4 + $0xc8] sm:$0xff]  ;;  %v115_v61 = vld [vmem:[#allocation4 + $0xd0] sm:$0xff] }
  0x54   :  { %10335 = vmatpush3.bf16.msra.mxu0 %v11783_v28  ;;  %10344 = vmatpush3.bf16.msra.mxu1 %v11789_v31  ;;  %v192_v46 = vsel %vm191_vm6, %v11799_v35, %v189_v42  ;;  %v11848_v62 = vpack.c.bf16 %v107_v59, %v106_v58  ;;  %v11852_v63 = vpack.c.bf16 %v115_v61, %v114_v60  ;;  %v11858_v2 = vld [vmem:[#allocation4 + $0xa0] sm:$0x1]  ;;  %v11861_v3 = vld [vmem:[#allocation4 + $0xd8] sm:$0x1]  ;;  %v118_v6 = vld [vmem:[#allocation6 + $0x8] sm:$0xff] }
  0x55   :  { %8894 = vmatprep.subr.mxu0 %v13249_v1  ;;  %8911 = vmatprep.subr.mxu1 %v13249_v1  ;;  %v195_v47 = vsel %vm194_vm7, %v11803_v37, %v192_v46  ;;  %v117_v4 = vld [vmem:[#allocation6] sm:$0xff]  ;;  %v125_v7 = vld [vmem:[#allocation6 + $0x38] sm:$0xff]  ;;  %v119_v11 = vld [vmem:[#allocation6 + $0x10] sm:$0xff] }
  0x56   :  { %v198_v49 = vsel %vm197_vm9, %v195_v47, 0.0  ;;  %v11875_v8 = vpack.c.bf16 %v118_v6, %v117_v4  ;;  %v126_v10 = vld [vmem:[#allocation6 + $0x40] sm:$0xff]  ;;  %v120_v13 = vld [vmem:[#allocation6 + $0x18] sm:$0xff]  ;;  %v127_v16 = vld [vmem:[#allocation6 + $0x48] sm:$0xff] }
  0x57   :  { %v200_v53 = vsel %vm199_vm10, %v198_v49, 1.0  ;;  %v11877_v14 = vpack.c.bf16 %v126_v10, %v125_v7  ;;  %v128_v17 = vld [vmem:[#allocation6 + $0x50] sm:$0xff]  ;;  %v11880_v19 = vpack.c.bf16 %v120_v13, %v119_v11  ;;  %v121_v21 = vld [vmem:[#allocation6 + $0x20] sm:$0xff]  ;;  %v122_v22 = vld [vmem:[#allocation6 + $0x28] sm:$0xff] }
  0x58   :  { %8895 = vmatpush3.msk.msra.mxu0 %vm205_vm8, %v11810_v41  ;;  %8912 = vmatpush3.msk.msra.mxu1 %vm205_vm8, %v11815_v45  ;;  %v11884_v20 = vpack.c.bf16 %v128_v17, %v127_v16  ;;  %v129_v23 = vld [vmem:[#allocation6 + $0x58] sm:$0xff]  ;;  %v130_v24 = vld [vmem:[#allocation6 + $0x60] sm:$0xff]  ;;  %v11888_v29 = vpack.c.bf16 %v122_v22, %v121_v21  ;;  %v11898_v34 = vld [vmem:[#allocation6 + $0x30] sm:$0x1] }
  0x59   :  { %10345 = vmatprep.subr.bf16.mxu0 %v13253_v0  ;;  %8897 = vmatmul.mubr.msk.f32.vlgmr.msra.gmra.mrb[0].mxu0 %vm201_vm11, %v200_v53  ;;  %13276 = vst [vmem:[#allocation12_spill] sm:$0xff] %v11880_v19  ;;  %v11892_v32 = vpack.c.bf16 %v130_v24, %v129_v23  ;;  %13280 = vst [vmem:[#allocation16_spill] sm:$0xff] %v11898_v34  ;;  %v11901_v36 = vld [vmem:[#allocation6 + $0x68] sm:$0x1]  ;;  %v133_v16 = vld [vmem:[#allocation6 + $0x70] sm:$0xff] }
  0x5a   :  { %8914 = vmatmul.mubr.msk.f32.vlgmr.msra.gmra.mrb[0].mxu1 %vm201_vm11, %v200_v53  ;;  %10354 = vmatprep.subr.bf16.mxu1 %v13253_v0  ;;  %13277 = vst [vmem:[#allocation13_spill] sm:$0xff] %v11884_v20  ;;  %13278 = vst [vmem:[#allocation14_spill] sm:$0xff] %v11888_v29  ;;  %v134_v17 = vld [vmem:[#allocation6 + $0x78] sm:$0xff]  ;;  %v141_v22 = vld [vmem:[#allocation6 + $0xa8] sm:$0xff] }
  0x5b   :  { %10347 = vmatpush3.bf16.msra.mxu0 %v11821_v48  ;;  %10356 = vmatpush3.bf16.msra.mxu1 %v11826_v50  ;;  %13279 = vst [vmem:[#allocation15_spill] sm:$0xff] %v11892_v32  ;;  %13281 = vst [vmem:[#allocation17_spill] sm:$0xff] %v11901_v36  ;;  %v142_v23 = vld [vmem:[#allocation6 + $0xb0] sm:$0xff] }
  0x5c   :  { %10348 = vmatprep.subr.bf16.mxu0 %v13253_v0  ;;  %10357 = vmatprep.subr.bf16.mxu1 %v13253_v0  ;;  %vm11971_vm14 = vmpackc.low %vm205_vm8, %vm11645_vm13  ;;  %vm847_vm13 = vcmask 203776  }
  0x5d   :  { %8930 = vmatprep.mubr.msk.f32.mxu0 %vm11642_vm0, %v13249_v1  ;;  %8947 = vmatprep.mubr.msk.f32.mxu1 %vm11642_vm0, %v13249_v1 }
  0x5f   :  { %10350 = vmatpush3.bf16.msra.mxu0 %v11836_v56  ;;  %10359 = vmatpush3.bf16.msra.mxu1 %v11840_v57 }
  0x60   :  { %10351 = vmatprep.subr.bf16.mxu0 %v13253_v0  ;;  %10360 = vmatprep.subr.bf16.mxu1 %v13253_v0 }
  0x63   :  { %10353 = vmatpush3.bf16.msra.mxu0 %v11848_v62  ;;  %10362 = vmatpush3.bf16.msra.mxu1 %v11852_v63 }
  0x64   :  { %8928 = vmatprep.subr.mxu0 %v13249_v1  ;;  %8945 = vmatprep.subr.mxu1 %v13249_v1 }
  0x67   :  { %8929 = vmatpush3.msk.msra.mxu0 %vm205_vm8, %v11858_v2  ;;  %8946 = vmatpush3.msk.msra.mxu1 %vm205_vm8, %v11861_v3 }
  0x68   :  { %8931 = vmatmul.mubr.msk.f32.vlgmr.msra.gmra.mrb[2].mxu0 %vm201_vm11, %v200_v53  ;;  %8948 = vmatmul.mubr.msk.f32.vlgmr.msra.gmra.mrb[2].mxu1 %vm201_vm11, %v200_v53 }
  0x69   :  { %10363 = vmatprep.subr.bf16.mxu0 %v13253_v0  ;;  %10372 = vmatprep.subr.bf16.mxu1 %v13253_v0 }
  0x6a   :  { %8964 = vmatprep.mubr.msk.f32.mxu0 %vm11642_vm0, %v13249_v1  ;;  %8981 = vmatprep.mubr.msk.f32.mxu1 %vm11642_vm0, %v13249_v1 }
  0x6b   :  { %10365 = vmatpush3.bf16.msra.mxu0 %v11875_v8  ;;  %10374 = vmatpush3.bf16.msra.mxu1 %v11877_v14 }
  0x6c   :  { %10366 = vmatprep.subr.bf16.mxu0 %v13253_v0  ;;  %10375 = vmatprep.subr.bf16.mxu1 %v13253_v0 }
  0x6f   :  { %10368 = vmatpush3.bf16.msra.mxu0 %v11880_v19  ;;  %10377 = vmatpush3.bf16.msra.mxu1 %v11884_v20 }
  0x70   :  { %10369 = vmatprep.subr.bf16.mxu0 %v13253_v0  ;;  %10378 = vmatprep.subr.bf16.mxu1 %v13253_v0 }
  0x73   :  { %10371 = vmatpush3.bf16.msra.mxu0 %v11888_v29  ;;  %10380 = vmatpush3.bf16.msra.mxu1 %v11892_v32 }
  0x74   :  { %8962 = vmatprep.subr.mxu0 %v13249_v1  ;;  %8979 = vmatprep.subr.mxu1 %v13249_v1 }
  0x77   :  { %8963 = vmatpush3.msk.msra.mxu0 %vm205_vm8, %v11898_v34  ;;  %8980 = vmatpush3.msk.msra.mxu1 %vm205_vm8, %v11901_v36 }
  0x78   :  { %10381 = vmatprep.subr.bf16.mxu0 %v13253_v0  ;;  %10390 = vmatprep.subr.bf16.mxu1 %v13253_v0 }
 0x12c   :  { %v275_v38 = vpop.f32.mrb[0].mxu0 }
 0x12d   :  { %v354_v39 = vpop.f32.mrb[0].mxu1  ;;  %v7944_v40 = vmul.f32 -1.442695, %v275_v38  ;;  %v8898_v43 = vpop.f32.mrb[1].mxu0  ;;  %v11912_v38 = vpack.c.bf16 %v134_v17, %v133_v16  ;;  %v154_v16 = vld [vmem:[#allocation7 + $0x28] sm:$0xff]  ;;  %v150_v17 = vld [vmem:[#allocation7 + $0x10] sm:$0xff] }
 0x12e   :  { %v7947_v42 = vmul.f32 -1.442695, %v354_v39  ;;  %v8915_v44 = vpop.f32.mrb[1].mxu1  ;;  %v135_v43 = vld [vmem:[#allocation6 + $0x80] sm:$0xff] }
 0x12f   :  { %11139 = vpow2.f32 %v7944_v40  ;;  %v136_v44 = vld [vmem:[#allocation6 + $0x88] sm:$0xff] }
 0x130   :  { %11141 = vpow2.f32 %v7947_v42  ;;  %v11915_v42 = vpack.c.bf16 %v142_v23, %v141_v22  ;;  %v155_v23 = vld [vmem:[#allocation7 + $0x30] sm:$0xff] }
 0x139   :  { %v11140_v46 = vpop.eup %11139 }
 0x13a   :  { %v11142_v47 = vpop.eup %11141  ;;  %v282_v49 = vadd.f32 1.0, %v11140_v46 }
 0x13b   :  { %v433_v51 = vpop.f32.mrb[2].mxu0  ;;  %v361_v52 = vadd.f32 1.0, %v11142_v47  ;;  %v507_v53 = vpop.f32.mrb[2].mxu1  ;;  %v143_v47 = vld [vmem:[#allocation6 + $0xb8] sm:$0xff] }
 0x13c   :  { %11143 = vtanh.f32 %v433_v51  ;;  %v8932_v54 = vpop.f32.mrb[3].mxu0  ;;  %v7952_v55 = vmul.f32 -1.442695, %v507_v53  ;;  %v8949_v58 = vpop.f32.mrb[3].mxu1  ;;  %v11922_v51 = vpack.c.bf16 %v136_v44, %v135_v43  ;;  %v137_v53 = vld [vmem:[#allocation6 + $0x90] sm:$0xff] }
 0x13d   :  { %11145 = vrcp.f32 %v282_v49  ;;  %v144_v49 = vld [vmem:[#allocation6 + $0xc0] sm:$0xff]  ;;  %v138_v54 = vld [vmem:[#allocation6 + $0x98] sm:$0xff]  ;;  %v146_v58 = vld [vmem:[#allocation6 + $0xd0] sm:$0xff] }
 0x13e   :  { %11147 = vrcp.f32 %v361_v52  ;;  %v11926_v52 = vpack.c.bf16 %v144_v49, %v143_v47 }
 0x13f   :  { %11149 = vpow2.f32 %v7952_v55  ;;  %v145_v55 = vld [vmem:[#allocation6 + $0xc8] sm:$0xff] }
 0x146   :  { %v11144_v59 = vpop.eup %11143 }
 0x147   :  { %v11146_v60 = vpop.eup %11145 }
 0x148   :  { %v11148_v61 = vpop.eup %11147  ;;  %v518_v4 = vmul.f32 %v11146_v60, %v11144_v59  ;;  %v11934_v59 = vpack.c.bf16 %v138_v54, %v137_v53  ;;  %v11938_v60 = vpack.c.bf16 %v146_v58, %v145_v55 }
 0x149   :  { %v11150_v6 = vpop.eup %11149  ;;  %v517_v7 = vmul.f32 0.0, %v11148_v61  ;;  %v11944_v61 = vld [vmem:[#allocation6 + $0xa0] sm:$0x1] }
 0x14a   :  { %v514_v10 = vadd.f32 1.0, %v11150_v6  ;;  %v148_v6 = vld [vmem:[#allocation7] sm:$0xff] }
 0x14b   :  { %v11909_v11 = vadd.f32 %v518_v4, %v517_v7  ;;  %v11947_v4 = vld [vmem:[#allocation6 + $0xd8] sm:$0x1]  ;;  %v149_v7 = vld [vmem:[#allocation7 + $0x8] sm:$0xff] }
 0x14c   :  { %11151 = vrcp.f32 %v514_v10  ;;  %v153_v10 = vld [vmem:[#allocation7 + $0x20] sm:$0xff] }
 0x14d   :  { %11153 = vtanh.f32 %v11909_v11  ;;  %v11963_v22 = vpack.c.bf16 %v154_v16, %v153_v10 }
 0x156   :  { %v11152_v13 = vpop.eup %11151 }
 0x157   :  { %v11154_v21 = vpop.eup %11153 }
 0x158   :  { %v521_v24 = vmul.f32 %v11154_v21, %v11152_v13  ;;  %v11961_v13 = vpack.c.bf16 %v149_v7, %v148_v6  ;;  %v151_v21 = vld [vmem:[#allocation7 + $0x18] sm:$0x1] }
 0x15a   :  { %v1176_v39 = vrot.slane %v521_v24, 7  ;;  %v523_v40 = vsel %vm522_vm12, %v521_v24, 0.0  ;;  %v156_v24 = vld [vmem:[#allocation7 + $0x38] sm:$0x1] }
 0x15b   :  { %v524_v46 = vsel %vm199_vm10, %v523_v40, 1.0  ;;  %v11975_v43 = vpack.c.bf16 %v156_v24, %v155_v23 }
 0x15c   :  { %1177 = vrot.lane.b32.xlu0 %v1176_v39, %s11644_s3  ;;  %8965 = vmatmul.mubr.msk.f32.vlgmr.msra.gmra.mrb[4].mxu0 %vm201_vm11, %v524_v46  ;;  %v11966_v39 = vpack.c.bf16 %v151_v21, %v150_v17 }
 0x15d   :  { %8982 = vmatmul.mubr.msk.f32.vlgmr.msra.gmra.mrb[4].mxu1 %vm201_vm11, %v524_v46  ;;  %10383 = vmatpush3.bf16.msra.mxu0 %v11912_v38  ;;  %13284 = vst [vmem:[#allocation18_spill] sm:$0xff] %v11975_v43 }
 0x15e   :  { %10392 = vmatpush3.bf16.msra.mxu1 %v11915_v42  ;;  %10384 = vmatprep.subr.bf16.mxu0 %v13253_v0 }
 0x15f   :  { %10393 = vmatprep.subr.bf16.mxu1 %v13253_v0  ;;  %8998 = vmatprep.mubr.msk.f32.mxu0 %vm11642_vm0, %v13249_v1 }
 0x160   :  { %9015 = vmatprep.mubr.msk.f32.mxu1 %vm11642_vm0, %v13249_v1 }
 0x161   :  { %10386 = vmatpush3.bf16.msra.mxu0 %v11922_v51 }
 0x162   :  { %10395 = vmatpush3.bf16.msra.mxu1 %v11926_v52  ;;  %10387 = vmatprep.subr.bf16.mxu0 %v13253_v0 }
 0x163   :  { %10396 = vmatprep.subr.bf16.mxu1 %v13253_v0 }
 0x165   :  { %10389 = vmatpush3.bf16.msra.mxu0 %v11934_v59 }
 0x166   :  { %10398 = vmatpush3.bf16.msra.mxu1 %v11938_v60  ;;  %8996 = vmatprep.subr.mxu0 %v13249_v1 }
 0x167   :  { %9013 = vmatprep.subr.mxu1 %v13249_v1 }
 0x169   :  { %8997 = vmatpush3.msk.msra.mxu0 %vm205_vm8, %v11944_v61 }
 0x16a   :  { %9014 = vmatpush3.msk.msra.mxu1 %vm205_vm8, %v11947_v4  ;;  %8999 = vmatmul.mubr.msk.f32.vlgmr.msra.gmra.mrb[6].mxu0 %vm201_vm11, %v524_v46 }
 0x16b   :  { %9016 = vmatmul.mubr.msk.f32.vlgmr.msra.gmra.mrb[6].mxu1 %vm201_vm11, %v524_v46  ;;  %10399 = vmatprep.subr.bf16.mxu0 %v13253_v0 }
 0x16c   :  { %10406 = vmatprep.subr.bf16.mxu1 %v13253_v0  ;;  %9026 = vmatprep.mubr.msk.f32.mxu0 %vm11642_vm0, %v13249_v1 }
 0x16d   :  { %9037 = vmatprep.mubr.msk.f32.mxu1 %vm11642_vm0, %v13249_v1  ;;  %10401 = vmatpush3.bf16.msra.mxu0 %v11961_v13 }
 0x16e   :  { %10408 = vmatpush3.bf16.msra.mxu1 %v11963_v22  ;;  %10402 = vmatprep.subr.bf16.mxu0 %v13253_v0 }
 0x16f   :  { %10409 = vmatprep.subr.bf16.mxu1 %v13253_v0 }
 0x171   :  { %10405 = vmatpush3.bf16.msk.msra.mxu0 %vm11971_vm14, %v11966_v39 }
 0x172   :  { %10412 = vmatpush3.bf16.msk.msra.mxu1 %vm11971_vm14, %v11975_v43  ;;  %10413 = vmatprep.subr.bf16.mxu0 %v13253_v0 }
 0x173   :  { %10420 = vmatprep.subr.bf16.mxu1 %v13253_v0 }
 0x22f   :  { %v597_v44 = vpop.f32.mrb[4].mxu0 }
 0x230   :  { %v7955_v46 = vmul.f32 -1.442695, %v597_v44  ;;  %v676_v47 = vpop.f32.mrb[4].mxu1  ;;  %v8966_v49 = vpop.f32.mrb[5].mxu0 }
 0x231   :  { %v7958_v53 = vmul.f32 -1.442695, %v676_v47  ;;  %v8983_v54 = vpop.f32.mrb[5].mxu1 }
 0x232   :  { %11155 = vpow2.f32 %v7955_v46 }
 0x233   :  { %11157 = vpow2.f32 %v7958_v53 }
 0x23c   :  { %v11156_v55 = vpop.eup %11155 }
 0x23d   :  { %v11158_v58 = vpop.eup %11157  ;;  %v604_v6 = vadd.f32 1.0, %v11156_v55  ;;  %v755_v7 = vpop.f32.mrb[6].mxu0  ;;  %v1167_v55 = vsel %vm13251_vm2, %v11776_v25, %v11773_v18  ;;  %vm1186_vm2 = vcmask 1046528  }
 0x23e   :  { %v683_v10 = vadd.f32 1.0, %v11158_v58  ;;  %11159 = vtanh.f32 %v755_v7  ;;  %v829_v16 = vpop.f32.mrb[6].mxu1  ;;  %v9000_v17 = vpop.f32.mrb[7].mxu0  ;;  %v158_v58 = vld [vmem:[#allocation7 + $0x40] sm:$0xff]  ;;  %v159_v7 = vld [vmem:[#allocation7 + $0x48] sm:$0xff] }
 0x23f   :  { %11161 = vrcp.f32 %v604_v6  ;;  %v7963_v21 = vmul.f32 -1.442695, %v829_v16  ;;  %v9017_v23 = vpop.f32.mrb[7].mxu1  ;;  %v164_v16 = vld [vmem:[#allocation7 + $0x68] sm:$0xff] }
 0x240   :  { %11163 = vrcp.f32 %v683_v10  ;;  %v163_v10 = vld [vmem:[#allocation7 + $0x60] sm:$0xff] }
 0x241   :  { %11165 = vpow2.f32 %v7963_v21  ;;  %v1168_v21 = vsel %vm182_vm3, %v11778_v26, %v1167_v55 }
 0x248   :  { %v11160_v24 = vpop.eup %11159 }
 0x249   :  { %v11162_v44 = vpop.eup %11161 }
 0x24a   :  { %v11164_v49 = vpop.eup %11163  ;;  %v840_v47 = vmul.f32 %v11162_v44, %v11160_v24  ;;  %v11994_v24 = vpack.c.bf16 %v159_v7, %v158_v58  ;;  %v11996_v44 = vpack.c.bf16 %v164_v16, %v163_v10  ;;  %v13285_v10 = vmov 0.0  }
 0x24b   :  { %v11166_v54 = vpop.eup %11165  ;;  %v839_v46 = vmul.f32 0.0, %v11164_v49  ;;  %v160_v49 = vld [vmem:[#allocation7 + $0x50] sm:$0xff] }
 0x24c   :  { %v836_v53 = vadd.f32 1.0, %v11166_v54  ;;  %v165_v54 = vld [vmem:[#allocation7 + $0x70] sm:$0xff] }
 0x24d   :  { %v11986_v1 = vadd.f32 %v840_v47, %v839_v46  ;;  %v161_v47 = vld [vmem:[#allocation7 + $0x58] sm:$0x1] }
 0x24e   :  { %11167 = vrcp.f32 %v836_v53  ;;  %v166_v46 = vld [vmem:[#allocation7 + $0x78] sm:$0x1]  ;;  %v1169_v53 = vsel %vm185_vm4, %v11780_v27, %v1168_v21  ;;  %v12007_v58 = vpack.c.bf16 %v161_v47, %v160_v49  ;;  %v1178_v21 = vpop.permute.xlu0 %1177 }
 0x24f   :  { %11169 = vtanh.f32 %v11986_v1  ;;  %v1170_v7 = vsel %vm188_vm5, %v11785_v30, %v1169_v53  ;;  %v1181_v49 = vsel %vm197_vm9, %v11803_v37, %v1178_v21 }
 0x250   :  { %v1171_v16 = vsel %vm191_vm6, %v11794_v33, %v1170_v7  ;;  %v1183_v47 = vsel %vm199_vm10, %v1181_v49, 1.0 }
 0x258   :  { %v11168_v6 = vpop.eup %11167 }
 0x259   :  { %v11170_v17 = vpop.eup %11169 }
 0x25a   :  { %v843_v23 = vmul.f32 %v11170_v17, %v11168_v6  ;;  %v12009_v6 = vpack.c.bf16 %v166_v46, %v165_v54  ;;  %v1172_v17 = vsel %vm194_vm7, %v11799_v35, %v1171_v16  ;;  %v1188_v46 = vrot.slane %v1183_v47, 1 }
 0x25c   :  { %1497 = vrot.lane.b32.xlu0 %v843_v23, %s11646_s9  ;;  %v844_v18 = vsel %vm197_vm9, %v843_v23, 0.0  ;;  %v1180_v23 = vsel %vm197_vm9, %v1172_v17, %v1178_v21 }
 0x25d   :  { %v846_v55 = vsel %vm845_vm15, %v844_v18, 1.0  ;;  %v1182_v18 = vsel %vm199_vm10, %v1180_v23, 1.0 }
 0x25e   :  { %9027 = vmatmul.mubr.msk.f32.vlgmr.msra.gmra.mrb[8].mxu0 %vm847_vm13, %v846_v55  ;;  %9038 = vmatmul.mubr.msk.f32.vlgmr.msra.gmra.mrb[8].mxu1 %vm847_vm13, %v846_v55  ;;  %v1187_v54 = vrot.slane %v1182_v18, 1 }
 0x25f   :  { %10415 = vmatpush3.bf16.msra.mxu0 %v11994_v24  ;;  %10422 = vmatpush3.bf16.msra.mxu1 %v11996_v44 }
 0x260   :  { %10416 = vmatprep.subr.bf16.mxu0 %v13253_v0  ;;  %10423 = vmatprep.subr.bf16.mxu1 %v13253_v0  ;;  %v1189_v53 = vsel %vm1186_vm2, %v1187_v54, %v1188_v46  ;;  %vm2141_vm2 = vcmask 1045504  }
 0x261   :  { %9048 = vmatprep.mubr.msk.f32.mxu0 %vm11642_vm0, %v13285_v10  ;;  %9059 = vmatprep.mubr.msk.f32.mxu1 %vm11642_vm0, %v13285_v10 }
 0x263   :  { %10419 = vmatpush3.bf16.msk.msra.mxu0 %vm11971_vm14, %v12007_v58  ;;  %10426 = vmatpush3.bf16.msk.msra.mxu1 %vm11971_vm14, %v12009_v6 }
 0x264   :  { %10427 = vmatprep.subr.bf16.mxu0 %v13253_v0  ;;  %10436 = vmatprep.subr.bf16.mxu1 %v13253_v0 }
 0x266   :  { %9049 = vmatmul.mubr.msk.f32.vlgmr.msra.gmra.mrb[10].mxu0 %vm847_vm13, %v846_v55  ;;  %9060 = vmatmul.mubr.msk.f32.vlgmr.msra.gmra.mrb[10].mxu1 %vm847_vm13, %v846_v55 }
 0x267   :  { %10429 = vmatpush3.bf16.msra.mxu0 %v11762_v5  ;;  %10438 = vmatpush3.bf16.msra.mxu1 %v11764_v9 }
 0x268   :  { %10430 = vmatprep.subr.bf16.mxu0 %v13253_v0  ;;  %10439 = vmatprep.subr.bf16.mxu1 %v13253_v0 }
 0x269   :  { %9076 = vmatprep.mubr.msk.f32.mxu0 %vm11642_vm0, %v13285_v10  ;;  %9093 = vmatprep.mubr.msk.f32.mxu1 %vm11642_vm0, %v13285_v10 }
 0x26b   :  { %10432 = vmatpush3.bf16.msra.mxu0 %v11767_v12  ;;  %10441 = vmatpush3.bf16.msra.mxu1 %v11771_v15 }
 0x26c   :  { %10433 = vmatprep.subr.bf16.mxu0 %v13253_v0  ;;  %10442 = vmatprep.subr.bf16.mxu1 %v13253_v0 }
 0x26f   :  { %10435 = vmatpush3.bf16.msra.mxu0 %v11783_v28  ;;  %10444 = vmatpush3.bf16.msra.mxu1 %v11789_v31 }
 0x270   :  { %9074 = vmatprep.subr.mxu0 %v13285_v10  ;;  %9091 = vmatprep.subr.mxu1 %v13285_v10 }
 0x273   :  { %9075 = vmatpush3.msk.msra.mxu0 %vm205_vm8, %v11810_v41  ;;  %9092 = vmatpush3.msk.msra.mxu1 %vm205_vm8, %v11815_v45 }
 0x274   :  { %9077 = vmatmul.mubr.msk.f32.vlgmr.msra.gmra.mrb[12].mxu0 %vm201_vm11, %v1189_v53  ;;  %9094 = vmatmul.mubr.msk.f32.vlgmr.msra.gmra.mrb[12].mxu1 %vm201_vm11, %v1189_v53 }
 0x275   :  { %10445 = vmatprep.subr.bf16.mxu0 %v13253_v0  ;;  %10454 = vmatprep.subr.bf16.mxu1 %v13253_v0 }
 0x276   :  { %10447 = vmatpush3.bf16.msra.mxu0 %v11821_v48  ;;  %10456 = vmatpush3.bf16.msra.mxu1 %v11826_v50 }
 0x277   :  { %10448 = vmatprep.subr.bf16.mxu0 %v13253_v0  ;;  %10457 = vmatprep.subr.bf16.mxu1 %v13253_v0 }
 0x278   :  { %9110 = vmatprep.mubr.msk.f32.mxu0 %vm11642_vm0, %v13285_v10  ;;  %9127 = vmatprep.mubr.msk.f32.mxu1 %vm11642_vm0, %v13285_v10 }
 0x27a   :  { %10450 = vmatpush3.bf16.msra.mxu0 %v11836_v56  ;;  %10459 = vmatpush3.bf16.msra.mxu1 %v11840_v57 }
 0x27b   :  { %10451 = vmatprep.subr.bf16.mxu0 %v13253_v0  ;;  %10460 = vmatprep.subr.bf16.mxu1 %v13253_v0 }
 0x27e   :  { %10453 = vmatpush3.bf16.msra.mxu0 %v11848_v62  ;;  %10462 = vmatpush3.bf16.msra.mxu1 %v11852_v63 }
 0x27f   :  { %9108 = vmatprep.subr.mxu0 %v13285_v10  ;;  %9125 = vmatprep.subr.mxu1 %v13285_v10 }
 0x282   :  { %9109 = vmatpush3.msk.msra.mxu0 %vm205_vm8, %v11858_v2  ;;  %9126 = vmatpush3.msk.msra.mxu1 %vm205_vm8, %v11861_v3 }
 0x283   :  { %9111 = vmatmul.mubr.msk.f32.vlgmr.msra.gmra.mrb[14].mxu0 %vm201_vm11, %v1189_v53  ;;  %9128 = vmatmul.mubr.msk.f32.vlgmr.msra.gmra.mrb[14].mxu1 %vm201_vm11, %v1189_v53 }
 0x284   :  { %10463 = vmatprep.subr.bf16.mxu0 %v13253_v0  ;;  %10472 = vmatprep.subr.bf16.mxu1 %v13253_v0 }
 0x285   :  { %10465 = vmatpush3.bf16.msra.mxu0 %v11875_v8  ;;  %10474 = vmatpush3.bf16.msra.mxu1 %v11877_v14 }
 0x286   :  { %10466 = vmatprep.subr.bf16.mxu0 %v13253_v0  ;;  %10475 = vmatprep.subr.bf16.mxu1 %v13253_v0 }
 0x287   :  { %9144 = vmatprep.mubr.msk.f32.mxu0 %vm11642_vm0, %v13285_v10  ;;  %9161 = vmatprep.mubr.msk.f32.mxu1 %vm11642_vm0, %v13285_v10 }
 0x289   :  { %10468 = vmatpush3.bf16.msra.mxu0 %v11880_v19  ;;  %10477 = vmatpush3.bf16.msra.mxu1 %v11884_v20 }
 0x28a   :  { %10469 = vmatprep.subr.bf16.mxu0 %v13253_v0  ;;  %10478 = vmatprep.subr.bf16.mxu1 %v13253_v0 }
 0x28d   :  { %10471 = vmatpush3.bf16.msra.mxu0 %v11888_v29  ;;  %10480 = vmatpush3.bf16.msra.mxu1 %v11892_v32 }
 0x28e   :  { %9142 = vmatprep.subr.mxu0 %v13285_v10  ;;  %9159 = vmatprep.subr.mxu1 %v13285_v10 }
 0x291   :  { %9143 = vmatpush3.msk.msra.mxu0 %vm205_vm8, %v11898_v34  ;;  %9160 = vmatpush3.msk.msra.mxu1 %vm205_vm8, %v11901_v36 }
 0x292   :  { %10481 = vmatprep.subr.bf16.mxu0 %v13253_v0  ;;  %10490 = vmatprep.subr.bf16.mxu1 %v13253_v0 }
 0x331   :  { %v920_v41 = vpop.f32.mrb[8].mxu0  ;;  %v999_v45 = vpop.f32.mrb[8].mxu1 }
 0x332   :  { %v7966_v55 = vmul.f32 -1.442695, %v920_v41  ;;  %v7969_v7 = vmul.f32 -1.442695, %v999_v45  ;;  %v9028_v16 = vpop.f32.mrb[9].mxu0  ;;  %v9039_v17 = vpop.f32.mrb[9].mxu1 }
 0x334   :  { %11171 = vpow2.f32 %v7966_v55 }
 0x335   :  { %11173 = vpow2.f32 %v7969_v7 }
 0x339   :  { %v1078_v21 = vpop.f32.mrb[10].mxu0  ;;  %v1152_v23 = vpop.f32.mrb[10].mxu1 }
 0x33a   :  { %v9050_v49 = vpop.f32.mrb[11].mxu0  ;;  %v9061_v18 = vpop.f32.mrb[11].mxu1  ;;  %v7974_v47 = vmul.f32 -1.442695, %v1152_v23 }
 0x33c   :  { %11175 = vpow2.f32 %v7974_v47 }
 0x33d   :  { %11177 = vtanh.f32 %v1078_v21 }
 0x33e   :  { %v11172_v54 = vpop.eup %11171 }
 0x33f   :  { %v11174_v46 = vpop.eup %11173  ;;  %v927_v53 = vadd.f32 1.0, %v11172_v54 }
 0x340   :  { %v1006_v36 = vadd.f32 1.0, %v11174_v46 }
 0x341   :  { %11179 = vrcp.f32 %v927_v53 }
 0x342   :  { %11181 = vrcp.f32 %v1006_v36 }
 0x346   :  { %v11176_v7 = vpop.eup %11175 }
 0x347   :  { %v1258_v0 = vpop.f32.mrb[12].mxu0  ;;  %v1334_v41 = vpop.f32.mrb[12].mxu1  ;;  %v1159_v32 = vadd.f32 1.0, %v11176_v7 }
 0x348   :  { %v7977_v45 = vmul.f32 -1.442695, %v1258_v0  ;;  %v7980_v16 = vmul.f32 -1.442695, %v1334_v41  ;;  %v9078_v17 = vpop.f32.mrb[13].mxu0  ;;  %v9095_v55 = vpop.f32.mrb[13].mxu1 }
 0x349   :  { %v11178_v34 = vpop.eup %11177 }
 0x34a   :  { %11183 = vpow2.f32 %v7977_v45 }
 0x34b   :  { %v11180_v49 = vpop.eup %11179  ;;  %11185 = vpow2.f32 %v7980_v16 }
 0x34c   :  { %v11182_v23 = vpop.eup %11181  ;;  %v1163_v18 = vmul.f32 %v11180_v49, %v11178_v34  ;;  %11187 = vrcp.f32 %v1159_v32 }
 0x34d   :  { %v1162_v54 = vmul.f32 0.0, %v11182_v23 }
 0x34f   :  { %v12108_v47 = vadd.f32 %v1163_v18, %v1162_v54 }
 0x351   :  { %11189 = vtanh.f32 %v12108_v47 }
 0x354   :  { %v11184_v36 = vpop.eup %11183 }
 0x355   :  { %v11186_v21 = vpop.eup %11185  ;;  %v1265_v0 = vadd.f32 1.0, %v11184_v36 }
 0x356   :  { %v1341_v46 = vadd.f32 1.0, %v11186_v21  ;;  %v1410_v53 = vpop.f32.mrb[14].mxu0  ;;  %v1481_v41 = vpop.f32.mrb[14].mxu1 }
 0x357   :  { %11191 = vrcp.f32 %v1265_v0  ;;  %v7985_v17 = vmul.f32 -1.442695, %v1481_v41  ;;  %v9112_v45 = vpop.f32.mrb[15].mxu0  ;;  %v9129_v55 = vpop.f32.mrb[15].mxu1 }
 0x358   :  { %11193 = vrcp.f32 %v1341_v46  ;;  %v11188_v34 = vpop.eup %11187 }
 0x359   :  { %11195 = vtanh.f32 %v1410_v53 }
 0x35a   :  { %11197 = vpow2.f32 %v7985_v17  ;;  %v1498_v17 = vpop.permute.xlu0 %1497 }
 0x35b   :  { %v11190_v16 = vpop.eup %11189 }
 0x35c   :  { %v1166_v7 = vmul.f32 %v11190_v16, %v11188_v34 }
 0x35e   :  { %1810 = vrot.lane.b32.xlu1 %v1166_v7, %s11644_s3 }
 0x361   :  { %v11192_v32 = vpop.eup %11191 }
 0x362   :  { %v11194_v49 = vpop.eup %11193 }
 0x363   :  { %v11196_v23 = vpop.eup %11195  ;;  %v1491_v18 = vmul.f32 %v11194_v49, %v11909_v11  ;;  %v13286_v11 = vmov 0.0|0.0  }
 0x364   :  { %v11198_v54 = vpop.eup %11197  ;;  %v1492_v36 = vmul.f32 %v11196_v23, %v11192_v32 }
 0x365   :  { %v1488_v21 = vadd.f32 1.0, %v11198_v54 }
 0x366   :  { %v12113_v0 = vadd.f32 %v1492_v36, %v1491_v18 }
 0x367   :  { %11199 = vrcp.f32 %v1488_v21 }
 0x368   :  { %11201 = vtanh.f32 %v12113_v0 }
 0x371   :  { %v11200_v46 = vpop.eup %11199 }
 0x372   :  { %v11202_v53 = vpop.eup %11201 }
 0x373   :  { %v1495_v41 = vmul.f32 %v11202_v53, %v11200_v46 }
 0x375   :  { %v2131_v45 = vrot.slane %v1495_v41, 6  ;;  %v1500_v55 = vsel %vm522_vm12, %v1495_v41, %v1498_v17 }
 0x376   :  { %v1501_v34 = vsel %vm199_vm10, %v1500_v55, 1.0 }
 0x377   :  { %2132 = vrot.lane.b32.xlu1 %v2131_v45, %s11644_s3  ;;  %9145 = vmatmul.mubr.msk.f32.vlgmr.msra.gmra.mrb[16].mxu0 %vm201_vm11, %v1501_v34 }
 0x378   :  { %9162 = vmatmul.mubr.msk.f32.vlgmr.msra.gmra.mrb[16].mxu1 %vm201_vm11, %v1501_v34  ;;  %10483 = vmatpush3.bf16.msra.mxu0 %v11912_v38 }
 0x379   :  { %10492 = vmatpush3.bf16.msra.mxu1 %v11915_v42  ;;  %10484 = vmatprep.subr.bf16.mxu0 %v13286_v11 }
 0x37a   :  { %10493 = vmatprep.subr.bf16.mxu1 %v13286_v11  ;;  %9178 = vmatprep.mubr.msk.f32.mxu0 %vm11642_vm0, %v13285_v10 }
 0x37b   :  { %9195 = vmatprep.mubr.msk.f32.mxu1 %vm11642_vm0, %v13285_v10 }
 0x37c   :  { %10486 = vmatpush3.bf16.msra.mxu0 %v11922_v51 }
 0x37d   :  { %10495 = vmatpush3.bf16.msra.mxu1 %v11926_v52  ;;  %10487 = vmatprep.subr.bf16.mxu0 %v13286_v11 }
 0x37e   :  { %10496 = vmatprep.subr.bf16.mxu1 %v13286_v11 }
 0x380   :  { %10489 = vmatpush3.bf16.msra.mxu0 %v11934_v59 }
 0x381   :  { %10498 = vmatpush3.bf16.msra.mxu1 %v11938_v60  ;;  %9176 = vmatprep.subr.mxu0 %v13285_v10 }
 0x382   :  { %9193 = vmatprep.subr.mxu1 %v13285_v10 }
 0x384   :  { %9177 = vmatpush3.msk.msra.mxu0 %vm205_vm8, %v11944_v61 }
 0x385   :  { %9194 = vmatpush3.msk.msra.mxu1 %vm205_vm8, %v11947_v4  ;;  %9179 = vmatmul.mubr.msk.f32.vlgmr.msra.gmra.mrb[18].mxu0 %vm201_vm11, %v1501_v34 }
 0x386   :  { %9196 = vmatmul.mubr.msk.f32.vlgmr.msra.gmra.mrb[18].mxu1 %vm201_vm11, %v1501_v34  ;;  %10499 = vmatprep.subr.bf16.mxu0 %v13286_v11 }
 0x387   :  { %10506 = vmatprep.subr.bf16.mxu1 %v13286_v11  ;;  %10501 = vmatpush3.bf16.msra.mxu0 %v11961_v13 }
 0x388   :  { %10508 = vmatpush3.bf16.msra.mxu1 %v11963_v22  ;;  %10502 = vmatprep.subr.bf16.mxu0 %v13286_v11 }
 0x389   :  { %10509 = vmatprep.subr.bf16.mxu1 %v13286_v11  ;;  %9206 = vmatprep.mubr.msk.f32.mxu0 %vm11642_vm0, %v13285_v10 }
 0x38a   :  { %9217 = vmatprep.mubr.msk.f32.mxu1 %vm11642_vm0, %v13285_v10 }
 0x38b   :  { %10505 = vmatpush3.bf16.msk.msra.mxu0 %vm11971_vm14, %v11966_v39 }
 0x38c   :  { %10512 = vmatpush3.bf16.msk.msra.mxu1 %vm11971_vm14, %v11975_v43  ;;  %10513 = vmatprep.subr.bf16.mxu0 %v13286_v11 }
 0x38d   :  { %10520 = vmatprep.subr.bf16.mxu1 %v13286_v11 }
 0x44a   :  { %v1571_v16 = vpop.f32.mrb[16].mxu0 }
 0x44b   :  { %v7988_v7 = vmul.f32 -1.442695, %v1571_v16  ;;  %v1647_v32 = vpop.f32.mrb[16].mxu1  ;;  %v9146_v49 = vpop.f32.mrb[17].mxu0 }
 0x44c   :  { %v7991_v23 = vmul.f32 -1.442695, %v1647_v32  ;;  %v9163_v18 = vpop.f32.mrb[17].mxu1 }
 0x44d   :  { %11203 = vpow2.f32 %v7988_v7 }
 0x44e   :  { %11205 = vpow2.f32 %v7991_v23 }
 0x457   :  { %v11204_v54 = vpop.eup %11203 }
 0x458   :  { %v11206_v36 = vpop.eup %11205  ;;  %v1578_v21 = vadd.f32 1.0, %v11204_v54  ;;  %v1723_v46 = vpop.f32.mrb[18].mxu0 }
 0x459   :  { %v1654_v53 = vadd.f32 1.0, %v11206_v36  ;;  %11207 = vtanh.f32 %v1723_v46  ;;  %v1794_v41 = vpop.f32.mrb[18].mxu1  ;;  %v9180_v17 = vpop.f32.mrb[19].mxu0 }
 0x45a   :  { %11209 = vrcp.f32 %v1578_v21  ;;  %v7996_v45 = vmul.f32 -1.442695, %v1794_v41  ;;  %v9197_v55 = vpop.f32.mrb[19].mxu1  ;;  %v12165_v21 = vld [vmem:[#allocation2] sm:$0xff]  ;;  %v1811_v41 = vpop.permute.xlu1 %1810 }
 0x45b   :  { %11211 = vrcp.f32 %v1654_v53  ;;  %v2122_v46 = vsel %vm182_vm3, %v11776_v25, %v12165_v21 }
 0x45c   :  { %11213 = vpow2.f32 %v7996_v45  ;;  %v2123_v17 = vsel %vm185_vm4, %v11778_v26, %v2122_v46 }
 0x45d   :  { %v2124_v55 = vsel %vm188_vm5, %v11780_v27, %v2123_v17  ;;  %v13289_v17 = vld [vmem:[#allocation17_spill] sm:$0xff] }
 0x463   :  { %v11208_v34 = vpop.eup %11207 }
 0x464   :  { %v11210_v16 = vpop.eup %11209 }
 0x465   :  { %v11212_v49 = vpop.eup %11211  ;;  %v1805_v32 = vmul.f32 %v11210_v16, %v11208_v34  ;;  %v2125_v34 = vsel %vm191_vm6, %v11785_v30, %v2124_v55 }
 0x466   :  { %v11214_v18 = vpop.eup %11213  ;;  %v1804_v7 = vmul.f32 %v11212_v49, %v11986_v1  ;;  %v2126_v16 = vsel %vm194_vm7, %v11794_v33, %v2125_v34  ;;  %v2127_v49 = vsel %vm176_vm1, %v11803_v37, %v11799_v35 }
 0x467   :  { %v1801_v23 = vadd.f32 1.0, %v11214_v18 }
 0x468   :  { %v12162_v43 = vadd.f32 %v1805_v32, %v1804_v7  ;;  %v2133_v32 = vpop.permute.xlu1 %2132 }
 0x469   :  { %11215 = vrcp.f32 %v1801_v23  ;;  %v2135_v18 = vsel %vm197_vm9, %v2126_v16, %v2133_v32  ;;  %v2136_v7 = vsel %vm197_vm9, %v2127_v49, %v2133_v32 }
 0x46a   :  { %11217 = vtanh.f32 %v12162_v43  ;;  %v2137_v23 = vsel %vm199_vm10, %v2135_v18, 1.0 }
 0x473   :  { %v11216_v54 = vpop.eup %11215 }
 0x474   :  { %v11218_v36 = vpop.eup %11217 }
 0x475   :  { %v1808_v53 = vmul.f32 %v11218_v36, %v11216_v54  ;;  %v2138_v54 = vsel %vm199_vm10, %v2136_v7, 1.0  ;;  %v2142_v36 = vrot.slane %v2137_v23, 2 }
 0x476   :  { %v2143_v46 = vrot.slane %v2138_v54, 2 }
 0x477   :  { %2452 = vrot.lane.b32.xlu0 %v1808_v53, %s11646_s9  ;;  %v1813_v1 = vsel %vm197_vm9, %v1808_v53, %v1811_v41  ;;  %v12224_v53 = vld [vmem:[#allocation4 + $0x30] sm:$0x1]  ;;  %v12228_v41 = vld [vmem:[#allocation4 + $0x68] sm:$0x1] }
 0x478   :  { %v1814_v45 = vsel %vm845_vm15, %v1813_v1, 1.0  ;;  %v2144_v1 = vsel %vm2141_vm2, %v2142_v36, %v2143_v46  ;;  %vm13291_vm2 = vcmask 1042434  }
 0x479   :  { %9207 = vmatmul.mubr.msk.f32.vlgmr.msra.gmra.mrb[20].mxu0 %vm847_vm13, %v1814_v45  ;;  %9218 = vmatmul.mubr.msk.f32.vlgmr.msra.gmra.mrb[20].mxu1 %vm847_vm13, %v1814_v45 }
 0x47a   :  { %10515 = vmatpush3.bf16.msra.mxu0 %v11994_v24  ;;  %10522 = vmatpush3.bf16.msra.mxu1 %v11996_v44 }
 0x47b   :  { %10516 = vmatprep.subr.bf16.mxu0 %v13286_v11  ;;  %10523 = vmatprep.subr.bf16.mxu1 %v13286_v11 }
 0x47c   :  { %9228 = vmatprep.mubr.msk.f32.mxu0 %vm11642_vm0, %v13285_v10  ;;  %9239 = vmatprep.mubr.msk.f32.mxu1 %vm11642_vm0, %v13285_v10 }
 0x47e   :  { %10519 = vmatpush3.bf16.msk.msra.mxu0 %vm11971_vm14, %v12007_v58  ;;  %10526 = vmatpush3.bf16.msk.msra.mxu1 %vm11971_vm14, %v12009_v6 }
 0x47f   :  { %10527 = vmatprep.subr.bf16.mxu0 %v13286_v11  ;;  %10536 = vmatprep.subr.bf16.mxu1 %v13286_v11 }
 0x481   :  { %9229 = vmatmul.mubr.msk.f32.vlgmr.msra.gmra.mrb[22].mxu0 %vm847_vm13, %v1814_v45  ;;  %9240 = vmatmul.mubr.msk.f32.vlgmr.msra.gmra.mrb[22].mxu1 %vm847_vm13, %v1814_v45 }
 0x482   :  { %10529 = vmatpush3.bf16.msra.mxu0 %v11762_v5  ;;  %10538 = vmatpush3.bf16.msra.mxu1 %v11764_v9 }
 0x483   :  { %10530 = vmatprep.subr.bf16.mxu0 %v13286_v11  ;;  %10539 = vmatprep.subr.bf16.mxu1 %v13286_v11 }
 0x484   :  { %9256 = vmatprep.mubr.msk.f32.mxu0 %vm11642_vm0, %v13285_v10  ;;  %9273 = vmatprep.mubr.msk.f32.mxu1 %vm11642_vm0, %v13285_v10 }
 0x486   :  { %10532 = vmatpush3.bf16.msra.mxu0 %v11767_v12  ;;  %10541 = vmatpush3.bf16.msra.mxu1 %v11771_v15 }
 0x487   :  { %10533 = vmatprep.subr.bf16.mxu0 %v13286_v11  ;;  %10542 = vmatprep.subr.bf16.mxu1 %v13286_v11 }
 0x48a   :  { %10535 = vmatpush3.bf16.msra.mxu0 %v11783_v28  ;;  %10544 = vmatpush3.bf16.msra.mxu1 %v11789_v31 }
 0x48b   :  { %9254 = vmatprep.subr.mxu0 %v13285_v10  ;;  %9271 = vmatprep.subr.mxu1 %v13285_v10 }
 0x48e   :  { %9255 = vmatpush3.msk.msra.mxu0 %vm205_vm8, %v12224_v53  ;;  %9272 = vmatpush3.msk.msra.mxu1 %vm205_vm8, %v12228_v41 }
 0x48f   :  { %9257 = vmatmul.mubr.msk.f32.vlgmr.msra.gmra.mrb[24].mxu0 %vm201_vm11, %v2144_v1  ;;  %9274 = vmatmul.mubr.msk.f32.vlgmr.msra.gmra.mrb[24].mxu1 %vm201_vm11, %v2144_v1 }
 0x490   :  { %10545 = vmatprep.subr.bf16.mxu0 %v13286_v11  ;;  %10554 = vmatprep.subr.bf16.mxu1 %v13286_v11 }
 0x491   :  { %10547 = vmatpush3.bf16.msra.mxu0 %v11821_v48  ;;  %10556 = vmatpush3.bf16.msra.mxu1 %v11826_v50 }
 0x492   :  { %10548 = vmatprep.subr.bf16.mxu0 %v13286_v11  ;;  %10557 = vmatprep.subr.bf16.mxu1 %v13286_v11 }
 0x493   :  { %9290 = vmatprep.mubr.msk.f32.mxu0 %vm11642_vm0, %v13285_v10  ;;  %9307 = vmatprep.mubr.msk.f32.mxu1 %vm11642_vm0, %v13285_v10 }
 0x495   :  { %10550 = vmatpush3.bf16.msra.mxu0 %v11836_v56  ;;  %10559 = vmatpush3.bf16.msra.mxu1 %v11840_v57 }
 0x496   :  { %10551 = vmatprep.subr.bf16.mxu0 %v13286_v11  ;;  %10560 = vmatprep.subr.bf16.mxu1 %v13286_v11 }
 0x499   :  { %10553 = vmatpush3.bf16.msra.mxu0 %v11848_v62  ;;  %10562 = vmatpush3.bf16.msra.mxu1 %v11852_v63 }
 0x49a   :  { %9288 = vmatprep.subr.mxu0 %v13285_v10  ;;  %9305 = vmatprep.subr.mxu1 %v13285_v10 }
 0x49d   :  { %9289 = vmatpush3.msk.msra.mxu0 %vm205_vm8, %v11858_v2  ;;  %9306 = vmatpush3.msk.msra.mxu1 %vm205_vm8, %v11861_v3  ;;  %v13287_v2 = vld [vmem:[#allocation15_spill] sm:$0xff]  ;;  %v13288_v3 = vld [vmem:[#allocation16_spill] sm:$0xff] }
 0x49e   :  { %9291 = vmatmul.mubr.msk.f32.vlgmr.msra.gmra.mrb[26].mxu0 %vm201_vm11, %v2144_v1  ;;  %9308 = vmatmul.mubr.msk.f32.vlgmr.msra.gmra.mrb[26].mxu1 %vm201_vm11, %v2144_v1 }
 0x49f   :  { %10563 = vmatprep.subr.bf16.mxu0 %v13286_v11  ;;  %10572 = vmatprep.subr.bf16.mxu1 %v13286_v11 }
 0x4a0   :  { %10565 = vmatpush3.bf16.msra.mxu0 %v11875_v8  ;;  %10574 = vmatpush3.bf16.msra.mxu1 %v11877_v14 }
 0x4a1   :  { %10566 = vmatprep.subr.bf16.mxu0 %v13286_v11  ;;  %10575 = vmatprep.subr.bf16.mxu1 %v13286_v11 }
 0x4a2   :  { %9324 = vmatprep.mubr.msk.f32.mxu0 %vm11642_vm0, %v13285_v10  ;;  %9341 = vmatprep.mubr.msk.f32.mxu1 %vm11642_vm0, %v13285_v10 }
 0x4a4   :  { %10568 = vmatpush3.bf16.msra.mxu0 %v11880_v19  ;;  %10577 = vmatpush3.bf16.msra.mxu1 %v11884_v20 }
 0x4a5   :  { %10569 = vmatprep.subr.bf16.mxu0 %v13286_v11  ;;  %10578 = vmatprep.subr.bf16.mxu1 %v13286_v11 }
 0x4a8   :  { %10571 = vmatpush3.bf16.msra.mxu0 %v11888_v29  ;;  %10580 = vmatpush3.bf16.msra.mxu1 %v13287_v2 }
 0x4a9   :  { %9322 = vmatprep.subr.mxu0 %v13285_v10  ;;  %9339 = vmatprep.subr.mxu1 %v13285_v10 }
 0x4ac   :  { %9323 = vmatpush3.msk.msra.mxu0 %vm205_vm8, %v13288_v3  ;;  %9340 = vmatpush3.msk.msra.mxu1 %vm205_vm8, %v13289_v17 }
 0x4ad   :  { %10581 = vmatprep.subr.bf16.mxu0 %v13286_v11  ;;  %10590 = vmatprep.subr.bf16.mxu1 %v13286_v11 }
 0x54c   :  { %v1884_v45 = vpop.f32.mrb[20].mxu0  ;;  %v1960_v55 = vpop.f32.mrb[20].mxu1 }
 0x54d   :  { %v7999_v34 = vmul.f32 -1.442695, %v1884_v45  ;;  %v8002_v16 = vmul.f32 -1.442695, %v1960_v55  ;;  %v9208_v49 = vpop.f32.mrb[21].mxu0  ;;  %v9219_v32 = vpop.f32.mrb[21].mxu1 }
 0x54f   :  { %11219 = vpow2.f32 %v7999_v34 }
 0x550   :  { %11221 = vpow2.f32 %v8002_v16 }
 0x554   :  { %v2036_v18 = vpop.f32.mrb[22].mxu0  ;;  %v2107_v7 = vpop.f32.mrb[22].mxu1 }
 0x555   :  { %v9230_v23 = vpop.f32.mrb[23].mxu0  ;;  %v9241_v54 = vpop.f32.mrb[23].mxu1  ;;  %v8007_v36 = vmul.f32 -1.442695, %v2107_v7 }
 0x557   :  { %11223 = vpow2.f32 %v8007_v36 }
 0x558   :  { %11225 = vtanh.f32 %v2036_v18 }
 0x559   :  { %v11220_v46 = vpop.eup %11219 }
 0x55a   :  { %v11222_v1 = vpop.eup %11221  ;;  %v1891_v3 = vadd.f32 1.0, %v11220_v46 }
 0x55b   :  { %v1967_v17 = vadd.f32 1.0, %v11222_v1 }
 0x55c   :  { %11227 = vrcp.f32 %v1891_v3 }
 0x55d   :  { %11229 = vrcp.f32 %v1967_v17 }
 0x561   :  { %v11224_v16 = vpop.eup %11223 }
 0x562   :  { %v2213_v2 = vpop.f32.mrb[24].mxu0  ;;  %v2289_v45 = vpop.f32.mrb[24].mxu1  ;;  %v2114_v20 = vadd.f32 1.0, %v11224_v16 }
 0x563   :  { %v8010_v55 = vmul.f32 -1.442695, %v2213_v2  ;;  %v8013_v49 = vmul.f32 -1.442695, %v2289_v45  ;;  %v9258_v32 = vpop.f32.mrb[25].mxu0  ;;  %v9275_v34 = vpop.f32.mrb[25].mxu1 }
 0x564   :  { %v11226_v29 = vpop.eup %11225 }
 0x565   :  { %11231 = vpow2.f32 %v8010_v55 }
 0x566   :  { %v11228_v23 = vpop.eup %11227  ;;  %11233 = vpow2.f32 %v8013_v49 }
 0x567   :  { %v11230_v7 = vpop.eup %11229  ;;  %v2118_v54 = vmul.f32 %v11228_v23, %v11226_v29  ;;  %11235 = vrcp.f32 %v2114_v20 }
 0x568   :  { %v2117_v36 = vmul.f32 %v11230_v7, %v12108_v47 }
 0x56a   :  { %v12283_v46 = vadd.f32 %v2118_v54, %v2117_v36 }
 0x56c   :  { %11237 = vtanh.f32 %v12283_v46 }
 0x56f   :  { %v11232_v18 = vpop.eup %11231 }
 0x570   :  { %v11234_v2 = vpop.eup %11233  ;;  %v2220_v1 = vadd.f32 1.0, %v11232_v18 }
 0x571   :  { %v2296_v3 = vadd.f32 1.0, %v11234_v2  ;;  %v2365_v17 = vpop.f32.mrb[26].mxu0  ;;  %v2436_v45 = vpop.f32.mrb[26].mxu1 }
 0x572   :  { %11239 = vrcp.f32 %v2220_v1  ;;  %v8018_v55 = vmul.f32 -1.442695, %v2436_v45  ;;  %v9292_v32 = vpop.f32.mrb[27].mxu0  ;;  %v9309_v49 = vpop.f32.mrb[27].mxu1 }
 0x573   :  { %11241 = vrcp.f32 %v2296_v3  ;;  %v11236_v29 = vpop.eup %11235  ;;  %v2453_v45 = vpop.permute.xlu0 %2452 }
 0x574   :  { %11243 = vtanh.f32 %v2365_v17 }
 0x575   :  { %11245 = vpow2.f32 %v8018_v55 }
 0x576   :  { %v11238_v47 = vpop.eup %11237 }
 0x577   :  { %v2121_v34 = vmul.f32 %v11238_v47, %v11236_v29 }
 0x579   :  { %2765 = vrot.lane.b32.xlu1 %v2121_v34, %s11644_s3 }
 0x57c   :  { %v11240_v20 = vpop.eup %11239 }
 0x57d   :  { %v11242_v16 = vpop.eup %11241 }
 0x57e   :  { %v11244_v23 = vpop.eup %11243  ;;  %v2446_v7 = vmul.f32 %v11242_v16, %v12113_v0 }
 0x57f   :  { %v11246_v54 = vpop.eup %11245  ;;  %v2447_v36 = vmul.f32 %v11244_v23, %v11240_v20 }
 0x580   :  { %v2443_v18 = vadd.f32 1.0, %v11246_v54 }
 0x581   :  { %v12288_v2 = vadd.f32 %v2447_v36, %v2446_v7 }
 0x582   :  { %11247 = vrcp.f32 %v2443_v18 }
 0x583   :  { %11249 = vtanh.f32 %v12288_v2 }
 0x58c   :  { %v11248_v1 = vpop.eup %11247 }
 0x58d   :  { %v11250_v3 = vpop.eup %11249 }
 0x58e   :  { %v2450_v17 = vmul.f32 %v11250_v3, %v11248_v1 }
 0x590   :  { %v3086_v55 = vrot.slane %v2450_v17, 5  ;;  %v2455_v32 = vsel %vm522_vm12, %v2450_v17, %v2453_v45 }
 0x591   :  { %v2456_v49 = vsel %vm199_vm10, %v2455_v32, 1.0 }
 0x592   :  { %3087 = vrot.lane.b32.xlu0 %v3086_v55, %s11644_s3  ;;  %9325 = vmatmul.mubr.msk.f32.vlgmr.msra.gmra.mrb[28].mxu0 %vm201_vm11, %v2456_v49 }
 0x593   :  { %9342 = vmatmul.mubr.msk.f32.vlgmr.msra.gmra.mrb[28].mxu1 %vm201_vm11, %v2456_v49  ;;  %10583 = vmatpush3.bf16.msra.mxu0 %v11912_v38 }
 0x594   :  { %10592 = vmatpush3.bf16.msra.mxu1 %v11915_v42  ;;  %10584 = vmatprep.subr.bf16.mxu0 %v13286_v11 }
 0x595   :  { %10593 = vmatprep.subr.bf16.mxu1 %v13286_v11  ;;  %9358 = vmatprep.mubr.msk.f32.mxu0 %vm11642_vm0, %v13285_v10 }
 0x596   :  { %9375 = vmatprep.mubr.msk.f32.mxu1 %vm11642_vm0, %v13285_v10 }
 0x597   :  { %10586 = vmatpush3.bf16.msra.mxu0 %v11922_v51 }
 0x598   :  { %10595 = vmatpush3.bf16.msra.mxu1 %v11926_v52  ;;  %10587 = vmatprep.subr.bf16.mxu0 %v13286_v11 }
 0x599   :  { %10596 = vmatprep.subr.bf16.mxu1 %v13286_v11 }
 0x59b   :  { %10589 = vmatpush3.bf16.msra.mxu0 %v11934_v59 }
 0x59c   :  { %10598 = vmatpush3.bf16.msra.mxu1 %v11938_v60  ;;  %9356 = vmatprep.subr.mxu0 %v13285_v10 }
 0x59d   :  { %9373 = vmatprep.subr.mxu1 %v13285_v10 }
 0x59f   :  { %9357 = vmatpush3.msk.msra.mxu0 %vm205_vm8, %v11944_v61  ;;  %v13290_v61 = vld [vmem:[#allocation18_spill] sm:$0xff] }
 0x5a0   :  { %9374 = vmatpush3.msk.msra.mxu1 %vm205_vm8, %v11947_v4  ;;  %9359 = vmatmul.mubr.msk.f32.vlgmr.msra.gmra.mrb[30].mxu0 %vm201_vm11, %v2456_v49 }
 0x5a1   :  { %9376 = vmatmul.mubr.msk.f32.vlgmr.msra.gmra.mrb[30].mxu1 %vm201_vm11, %v2456_v49  ;;  %10599 = vmatprep.subr.bf16.mxu0 %v13286_v11 }
 0x5a2   :  { %10606 = vmatprep.subr.bf16.mxu1 %v13286_v11  ;;  %10601 = vmatpush3.bf16.msra.mxu0 %v11961_v13 }
 0x5a3   :  { %10608 = vmatpush3.bf16.msra.mxu1 %v11963_v22  ;;  %10602 = vmatprep.subr.bf16.mxu0 %v13286_v11 }
 0x5a4   :  { %10609 = vmatprep.subr.bf16.mxu1 %v13286_v11  ;;  %9386 = vmatprep.mubr.msk.f32.mxu0 %vm11642_vm0, %v13285_v10 }
 0x5a5   :  { %9397 = vmatprep.mubr.msk.f32.mxu1 %vm11642_vm0, %v13285_v10 }
 0x5a6   :  { %10605 = vmatpush3.bf16.msk.msra.mxu0 %vm11971_vm14, %v11966_v39 }
 0x5a7   :  { %10612 = vmatpush3.bf16.msk.msra.mxu1 %vm11971_vm14, %v13290_v61  ;;  %10613 = vmatprep.subr.bf16.mxu0 %v13286_v11 }
 0x5a8   :  { %10620 = vmatprep.subr.bf16.mxu1 %v13286_v11 }
 0x665   :  { %v2526_v4 = vpop.f32.mrb[28].mxu0 }
 0x666   :  { %v8021_v0 = vmul.f32 -1.442695, %v2526_v4  ;;  %v2602_v29 = vpop.f32.mrb[28].mxu1  ;;  %v9326_v47 = vpop.f32.mrb[29].mxu0 }
 0x667   :  { %v8024_v34 = vmul.f32 -1.442695, %v2602_v29  ;;  %v9343_v20 = vpop.f32.mrb[29].mxu1 }
 0x668   :  { %11251 = vpow2.f32 %v8021_v0 }
 0x669   :  { %11253 = vpow2.f32 %v8024_v34 }
 0x672   :  { %v11252_v16 = vpop.eup %11251 }
 0x673   :  { %v11254_v23 = vpop.eup %11253  ;;  %v2533_v7 = vadd.f32 1.0, %v11252_v16  ;;  %v2678_v54 = vpop.f32.mrb[30].mxu0 }
 0x674   :  { %v2609_v36 = vadd.f32 1.0, %v11254_v23  ;;  %11255 = vtanh.f32 %v2678_v54  ;;  %v2749_v18 = vpop.f32.mrb[30].mxu1  ;;  %v9360_v1 = vpop.f32.mrb[31].mxu0  ;;  %v3077_v54 = vsel %vm185_vm4, %v11776_v25, %v12165_v21 }
 0x675   :  { %11257 = vrcp.f32 %v2533_v7  ;;  %v8029_v3 = vmul.f32 -1.442695, %v2749_v18  ;;  %v9377_v17 = vpop.f32.mrb[31].mxu1  ;;  %v2766_v23 = vpop.permute.xlu1 %2765  ;;  %v3081_v1 = vsel %vm176_vm1, %v11799_v35, %v11794_v33 }
 0x676   :  { %11259 = vrcp.f32 %v2609_v36  ;;  %v3078_v36 = vsel %vm188_vm5, %v11778_v26, %v3077_v54  ;;  %v3082_v17 = vsel %vm13291_vm2, %v11803_v37, %v3081_v1  ;;  %vm3096_vm2 = vcmask 1044480   ;;  %v13294_v54 = vld [vmem:[#allocation15_spill] sm:$0xff] }
 0x677   :  { %11261 = vpow2.f32 %v8029_v3  ;;  %v3079_v18 = vsel %vm191_vm6, %v11780_v27, %v3078_v36  ;;  %v12453_v36 = vld [vmem:[#allocation6 + $0x68] sm:$0x1] }
 0x678   :  { %v3080_v3 = vsel %vm194_vm7, %v11785_v30, %v3079_v18  ;;  %13296 = vst [vmem:[#allocation17_spill] sm:$0xff] %v12453_v36 }
 0x67e   :  { %v11256_v45 = vpop.eup %11255 }
 0x67f   :  { %v11258_v55 = vpop.eup %11257 }
 0x680   :  { %v11260_v32 = vpop.eup %11259  ;;  %v2760_v49 = vmul.f32 %v11258_v55, %v11256_v45  ;;  %v3088_v45 = vpop.permute.xlu0 %3087 }
 0x681   :  { %v11262_v4 = vpop.eup %11261  ;;  %v2759_v0 = vmul.f32 %v11260_v32, %v12162_v43  ;;  %v3090_v55 = vsel %vm197_vm9, %v3080_v3, %v3088_v45  ;;  %v3091_v32 = vsel %vm197_vm9, %v3082_v17, %v3088_v45 }
 0x682   :  { %v2756_v29 = vadd.f32 1.0, %v11262_v4  ;;  %v3093_v4 = vsel %vm199_vm10, %v3091_v32, 1.0 }
 0x683   :  { %v12337_v47 = vadd.f32 %v2760_v49, %v2759_v0  ;;  %v3092_v49 = vsel %vm199_vm10, %v3090_v55, 1.0 }
 0x684   :  { %11263 = vrcp.f32 %v2756_v29  ;;  %v3097_v0 = vrot.slane %v3092_v49, 3  ;;  %v3098_v29 = vrot.slane %v3093_v4, 3 }
 0x685   :  { %11265 = vtanh.f32 %v12337_v47 }
 0x68e   :  { %v11264_v34 = vpop.eup %11263 }
 0x68f   :  { %v11266_v20 = vpop.eup %11265 }
 0x690   :  { %v2763_v16 = vmul.f32 %v11266_v20, %v11264_v34  ;;  %v3099_v34 = vsel %vm3096_vm2, %v3097_v0, %v3098_v29  ;;  %v12421_v20 = vld [vmem:[#allocation4 + $0xa0] sm:$0x1]  ;;  %vm13297_vm2 = vcmask 1042434  }
 0x692   :  { %3407 = vrot.lane.b32.xlu1 %v2763_v16, %s11646_s9  ;;  %v2768_v7 = vsel %vm197_vm9, %v2763_v16, %v2766_v23  ;;  %v12425_v16 = vld [vmem:[#allocation4 + $0xd8] sm:$0x1]  ;;  %v13292_v23 = vld [vmem:[#allocation13_spill] sm:$0xff] }
 0x693   :  { %v2769_v43 = vsel %vm845_vm15, %v2768_v7, 1.0  ;;  %v13293_v7 = vld [vmem:[#allocation14_spill] sm:$0xff] }
 0x694   :  { %9387 = vmatmul.mubr.msk.f32.vlgmr.msra.gmra.mrb[32].mxu0 %vm847_vm13, %v2769_v43  ;;  %9398 = vmatmul.mubr.msk.f32.vlgmr.msra.gmra.mrb[32].mxu1 %vm847_vm13, %v2769_v43 }
 0x695   :  { %10615 = vmatpush3.bf16.msra.mxu0 %v11994_v24  ;;  %10622 = vmatpush3.bf16.msra.mxu1 %v11996_v44 }
 0x696   :  { %10616 = vmatprep.subr.bf16.mxu0 %v13286_v11  ;;  %10623 = vmatprep.subr.bf16.mxu1 %v13286_v11 }
 0x697   :  { %9408 = vmatprep.mubr.msk.f32.mxu0 %vm11642_vm0, %v13285_v10  ;;  %9419 = vmatprep.mubr.msk.f32.mxu1 %vm11642_vm0, %v13285_v10 }
 0x699   :  { %10619 = vmatpush3.bf16.msk.msra.mxu0 %vm11971_vm14, %v12007_v58  ;;  %10626 = vmatpush3.bf16.msk.msra.mxu1 %vm11971_vm14, %v12009_v6 }
 0x69a   :  { %10627 = vmatprep.subr.bf16.mxu0 %v13286_v11  ;;  %10636 = vmatprep.subr.bf16.mxu1 %v13286_v11 }
 0x69c   :  { %9409 = vmatmul.mubr.msk.f32.vlgmr.msra.gmra.mrb[34].mxu0 %vm847_vm13, %v2769_v43  ;;  %9420 = vmatmul.mubr.msk.f32.vlgmr.msra.gmra.mrb[34].mxu1 %vm847_vm13, %v2769_v43  ;;  %v12449_v43 = vld [vmem:[#allocation6 + $0x30] sm:$0x1] }
 0x69d   :  { %10629 = vmatpush3.bf16.msra.mxu0 %v11762_v5  ;;  %10638 = vmatpush3.bf16.msra.mxu1 %v11764_v9  ;;  %13295 = vst [vmem:[#allocation16_spill] sm:$0xff] %v12449_v43 }
 0x69e   :  { %10630 = vmatprep.subr.bf16.mxu0 %v13286_v11  ;;  %10639 = vmatprep.subr.bf16.mxu1 %v13286_v11 }
 0x69f   :  { %9436 = vmatprep.mubr.msk.f32.mxu0 %vm11642_vm0, %v13285_v10  ;;  %9453 = vmatprep.mubr.msk.f32.mxu1 %vm11642_vm0, %v13285_v10 }
 0x6a1   :  { %10632 = vmatpush3.bf16.msra.mxu0 %v11767_v12  ;;  %10641 = vmatpush3.bf16.msra.mxu1 %v11771_v15 }
 0x6a2   :  { %10633 = vmatprep.subr.bf16.mxu0 %v13286_v11  ;;  %10642 = vmatprep.subr.bf16.mxu1 %v13286_v11 }
 0x6a5   :  { %10635 = vmatpush3.bf16.msra.mxu0 %v11783_v28  ;;  %10644 = vmatpush3.bf16.msra.mxu1 %v11789_v31 }
 0x6a6   :  { %9434 = vmatprep.subr.mxu0 %v13285_v10  ;;  %9451 = vmatprep.subr.mxu1 %v13285_v10 }
 0x6a9   :  { %9435 = vmatpush3.msk.msra.mxu0 %vm205_vm8, %v12224_v53  ;;  %9452 = vmatpush3.msk.msra.mxu1 %vm205_vm8, %v12228_v41 }
 0x6aa   :  { %9437 = vmatmul.mubr.msk.f32.vlgmr.msra.gmra.mrb[36].mxu0 %vm201_vm11, %v3099_v34  ;;  %9454 = vmatmul.mubr.msk.f32.vlgmr.msra.gmra.mrb[36].mxu1 %vm201_vm11, %v3099_v34 }
 0x6ab   :  { %10645 = vmatprep.subr.bf16.mxu0 %v13286_v11  ;;  %10654 = vmatprep.subr.bf16.mxu1 %v13286_v11 }
 0x6ac   :  { %10647 = vmatpush3.bf16.msra.mxu0 %v11821_v48  ;;  %10656 = vmatpush3.bf16.msra.mxu1 %v11826_v50 }
 0x6ad   :  { %10648 = vmatprep.subr.bf16.mxu0 %v13286_v11  ;;  %10657 = vmatprep.subr.bf16.mxu1 %v13286_v11 }
 0x6ae   :  { %9470 = vmatprep.mubr.msk.f32.mxu0 %vm11642_vm0, %v13285_v10  ;;  %9487 = vmatprep.mubr.msk.f32.mxu1 %vm11642_vm0, %v13285_v10 }
 0x6b0   :  { %10650 = vmatpush3.bf16.msra.mxu0 %v11836_v56  ;;  %10659 = vmatpush3.bf16.msra.mxu1 %v11840_v57 }
 0x6b1   :  { %10651 = vmatprep.subr.bf16.mxu0 %v13286_v11  ;;  %10660 = vmatprep.subr.bf16.mxu1 %v13286_v11 }
 0x6b4   :  { %10653 = vmatpush3.bf16.msra.mxu0 %v11848_v62  ;;  %10662 = vmatpush3.bf16.msra.mxu1 %v11852_v63 }
 0x6b5   :  { %9468 = vmatprep.subr.mxu0 %v13285_v10  ;;  %9485 = vmatprep.subr.mxu1 %v13285_v10 }
 0x6b8   :  { %9469 = vmatpush3.msk.msra.mxu0 %vm205_vm8, %v12421_v20  ;;  %9486 = vmatpush3.msk.msra.mxu1 %vm205_vm8, %v12425_v16 }
 0x6b9   :  { %9471 = vmatmul.mubr.msk.f32.vlgmr.msra.gmra.mrb[38].mxu0 %vm201_vm11, %v3099_v34  ;;  %9488 = vmatmul.mubr.msk.f32.vlgmr.msra.gmra.mrb[38].mxu1 %vm201_vm11, %v3099_v34 }
 0x6ba   :  { %10663 = vmatprep.subr.bf16.mxu0 %v13286_v11  ;;  %10672 = vmatprep.subr.bf16.mxu1 %v13286_v11 }
 0x6bb   :  { %10665 = vmatpush3.bf16.msra.mxu0 %v11875_v8  ;;  %10674 = vmatpush3.bf16.msra.mxu1 %v11877_v14 }
 0x6bc   :  { %10666 = vmatprep.subr.bf16.mxu0 %v13286_v11  ;;  %10675 = vmatprep.subr.bf16.mxu1 %v13286_v11 }
 0x6bd   :  { %9504 = vmatprep.mubr.msk.f32.mxu0 %vm11642_vm0, %v13285_v10  ;;  %9521 = vmatprep.mubr.msk.f32.mxu1 %vm11642_vm0, %v13285_v10 }
 0x6bf   :  { %10668 = vmatpush3.bf16.msra.mxu0 %v11880_v19  ;;  %10677 = vmatpush3.bf16.msra.mxu1 %v13292_v23 }
 0x6c0   :  { %10669 = vmatprep.subr.bf16.mxu0 %v13286_v11  ;;  %10678 = vmatprep.subr.bf16.mxu1 %v13286_v11 }
 0x6c3   :  { %10671 = vmatpush3.bf16.msra.mxu0 %v13293_v7  ;;  %10680 = vmatpush3.bf16.msra.mxu1 %v13294_v54 }
 0x6c4   :  { %9502 = vmatprep.subr.mxu0 %v13285_v10  ;;  %9519 = vmatprep.subr.mxu1 %v13285_v10 }
 0x6c7   :  { %9503 = vmatpush3.msk.msra.mxu0 %vm205_vm8, %v12449_v43  ;;  %9520 = vmatpush3.msk.msra.mxu1 %vm205_vm8, %v12453_v36 }
 0x6c8   :  { %10681 = vmatprep.subr.bf16.mxu0 %v13286_v11  ;;  %10690 = vmatprep.subr.bf16.mxu1 %v13286_v11 }
 0x767   :  { %v2839_v18 = vpop.f32.mrb[32].mxu0  ;;  %v2915_v1 = vpop.f32.mrb[32].mxu1 }
 0x768   :  { %v8032_v3 = vmul.f32 -1.442695, %v2839_v18  ;;  %v8035_v17 = vmul.f32 -1.442695, %v2915_v1  ;;  %v9388_v45 = vpop.f32.mrb[33].mxu0  ;;  %v9399_v55 = vpop.f32.mrb[33].mxu1 }
 0x76a   :  { %11267 = vpow2.f32 %v8032_v3 }
 0x76b   :  { %11269 = vpow2.f32 %v8035_v17 }
 0x76f   :  { %v2991_v32 = vpop.f32.mrb[34].mxu0  ;;  %v3062_v49 = vpop.f32.mrb[34].mxu1 }
 0x770   :  { %v9410_v4 = vpop.f32.mrb[35].mxu0  ;;  %v9421_v0 = vpop.f32.mrb[35].mxu1  ;;  %v8040_v29 = vmul.f32 -1.442695, %v3062_v49 }
 0x772   :  { %11271 = vpow2.f32 %v8040_v29 }
 0x773   :  { %11273 = vtanh.f32 %v2991_v32 }
 0x774   :  { %v11268_v34 = vpop.eup %11267 }
 0x775   :  { %v11270_v43 = vpop.eup %11269  ;;  %v2846_v36 = vadd.f32 1.0, %v11268_v34 }
 0x776   :  { %v2922_v54 = vadd.f32 1.0, %v11270_v43 }
 0x777   :  { %11275 = vrcp.f32 %v2846_v36 }
 0x778   :  { %11277 = vrcp.f32 %v2922_v54 }
 0x77c   :  { %v11272_v17 = vpop.eup %11271 }
 0x77d   :  { %v3168_v7 = vpop.f32.mrb[36].mxu0  ;;  %v3244_v18 = vpop.f32.mrb[36].mxu1  ;;  %v3069_v19 = vadd.f32 1.0, %v11272_v17 }
 0x77e   :  { %v8043_v1 = vmul.f32 -1.442695, %v3168_v7  ;;  %v8046_v45 = vmul.f32 -1.442695, %v3244_v18  ;;  %v9438_v55 = vpop.f32.mrb[37].mxu0  ;;  %v9455_v3 = vpop.f32.mrb[37].mxu1 }
 0x77f   :  { %v11274_v23 = vpop.eup %11273 }
 0x780   :  { %11279 = vpow2.f32 %v8043_v1 }
 0x781   :  { %v11276_v4 = vpop.eup %11275  ;;  %11281 = vpow2.f32 %v8046_v45 }
 0x782   :  { %v11278_v49 = vpop.eup %11277  ;;  %v3073_v0 = vmul.f32 %v11276_v4, %v11274_v23  ;;  %11283 = vrcp.f32 %v3069_v19 }
 0x783   :  { %v3072_v29 = vmul.f32 %v11278_v49, %v12283_v46 }
 0x785   :  { %v12460_v43 = vadd.f32 %v3073_v0, %v3072_v29 }
 0x787   :  { %11285 = vtanh.f32 %v12460_v43 }
 0x78a   :  { %v11280_v54 = vpop.eup %11279 }
 0x78b   :  { %v11282_v7 = vpop.eup %11281  ;;  %v3175_v36 = vadd.f32 1.0, %v11280_v54 }
 0x78c   :  { %v3251_v32 = vadd.f32 1.0, %v11282_v7  ;;  %v3320_v34 = vpop.f32.mrb[38].mxu0  ;;  %v3391_v18 = vpop.f32.mrb[38].mxu1 }
 0x78d   :  { %11287 = vrcp.f32 %v3175_v36  ;;  %v8051_v1 = vmul.f32 -1.442695, %v3391_v18  ;;  %v9472_v55 = vpop.f32.mrb[39].mxu0  ;;  %v9489_v45 = vpop.f32.mrb[39].mxu1 }
 0x78e   :  { %11289 = vrcp.f32 %v3251_v32  ;;  %v11284_v23 = vpop.eup %11283  ;;  %v3408_v18 = vpop.permute.xlu1 %3407 }
 0x78f   :  { %11291 = vtanh.f32 %v3320_v34 }
 0x790   :  { %11293 = vpow2.f32 %v8051_v1 }
 0x791   :  { %v11286_v46 = vpop.eup %11285 }
 0x792   :  { %v3076_v3 = vmul.f32 %v11286_v46, %v11284_v23  ;;  %v12493_v23 = vld [vmem:[#allocation6 + $0xd8] sm:$0x1] }
 0x794   :  { %3720 = vrot.lane.b32.xlu0 %v3076_v3, %s11644_s3 }
 0x797   :  { %v11288_v19 = vpop.eup %11287 }
 0x798   :  { %v11290_v17 = vpop.eup %11289 }
 0x799   :  { %v11292_v4 = vpop.eup %11291  ;;  %v3401_v49 = vmul.f32 %v11290_v17, %v12288_v2  ;;  %v12489_v2 = vld [vmem:[#allocation6 + $0xa0] sm:$0x1] }
 0x79a   :  { %v11294_v0 = vpop.eup %11293  ;;  %v3402_v29 = vmul.f32 %v11292_v4, %v11288_v19 }
 0x79b   :  { %v3398_v54 = vadd.f32 1.0, %v11294_v0 }
 0x79c   :  { %v12465_v7 = vadd.f32 %v3402_v29, %v3401_v49 }
 0x79d   :  { %11295 = vrcp.f32 %v3398_v54 }
 0x79e   :  { %11297 = vtanh.f32 %v12465_v7 }
 0x7a7   :  { %v11296_v36 = vpop.eup %11295 }
 0x7a8   :  { %v11298_v32 = vpop.eup %11297 }
 0x7a9   :  { %v3405_v34 = vmul.f32 %v11298_v32, %v11296_v36 }
 0x7ab   :  { %v4041_v1 = vrot.slane %v3405_v34, 4  ;;  %v3410_v55 = vsel %vm522_vm12, %v3405_v34, %v3408_v18 }
 0x7ac   :  { %v3411_v45 = vsel %vm199_vm10, %v3410_v55, 1.0 }
 0x7ad   :  { %4042 = vrot.lane.b32.xlu1 %v4041_v1, %s11644_s3  ;;  %9505 = vmatmul.mubr.msk.f32.vlgmr.msra.gmra.mrb[40].mxu0 %vm201_vm11, %v3411_v45 }
 0x7ae   :  { %9522 = vmatmul.mubr.msk.f32.vlgmr.msra.gmra.mrb[40].mxu1 %vm201_vm11, %v3411_v45  ;;  %10683 = vmatpush3.bf16.msra.mxu0 %v11912_v38 }
 0x7af   :  { %10692 = vmatpush3.bf16.msra.mxu1 %v11915_v42  ;;  %10684 = vmatprep.subr.bf16.mxu0 %v13286_v11 }
 0x7b0   :  { %10693 = vmatprep.subr.bf16.mxu1 %v13286_v11  ;;  %9538 = vmatprep.mubr.msk.f32.mxu0 %vm11642_vm0, %v13285_v10 }
 0x7b1   :  { %9555 = vmatprep.mubr.msk.f32.mxu1 %vm11642_vm0, %v13285_v10 }
 0x7b2   :  { %10686 = vmatpush3.bf16.msra.mxu0 %v11922_v51 }
 0x7b3   :  { %10695 = vmatpush3.bf16.msra.mxu1 %v11926_v52  ;;  %10687 = vmatprep.subr.bf16.mxu0 %v13286_v11 }
 0x7b4   :  { %10696 = vmatprep.subr.bf16.mxu1 %v13286_v11 }
 0x7b6   :  { %10689 = vmatpush3.bf16.msra.mxu0 %v11934_v59 }
 0x7b7   :  { %10698 = vmatpush3.bf16.msra.mxu1 %v11938_v60  ;;  %9536 = vmatprep.subr.mxu0 %v13285_v10 }
 0x7b8   :  { %9553 = vmatprep.subr.mxu1 %v13285_v10 }
 0x7ba   :  { %9537 = vmatpush3.msk.msra.mxu0 %vm205_vm8, %v12489_v2 }
 0x7bb   :  { %9554 = vmatpush3.msk.msra.mxu1 %vm205_vm8, %v12493_v23  ;;  %9539 = vmatmul.mubr.msk.f32.vlgmr.msra.gmra.mrb[42].mxu0 %vm201_vm11, %v3411_v45 }
 0x7bc   :  { %9556 = vmatmul.mubr.msk.f32.vlgmr.msra.gmra.mrb[42].mxu1 %vm201_vm11, %v3411_v45  ;;  %10699 = vmatprep.subr.bf16.mxu0 %v13286_v11 }
 0x7bd   :  { %10706 = vmatprep.subr.bf16.mxu1 %v13286_v11  ;;  %10701 = vmatpush3.bf16.msra.mxu0 %v11961_v13 }
 0x7be   :  { %10708 = vmatpush3.bf16.msra.mxu1 %v11963_v22  ;;  %10702 = vmatprep.subr.bf16.mxu0 %v13286_v11 }
 0x7bf   :  { %10709 = vmatprep.subr.bf16.mxu1 %v13286_v11  ;;  %9566 = vmatprep.mubr.msk.f32.mxu0 %vm11642_vm0, %v13285_v10 }
 0x7c0   :  { %9577 = vmatprep.mubr.msk.f32.mxu1 %vm11642_vm0, %v13285_v10 }
 0x7c1   :  { %10705 = vmatpush3.bf16.msk.msra.mxu0 %vm11971_vm14, %v11966_v39 }
 0x7c2   :  { %10712 = vmatpush3.bf16.msk.msra.mxu1 %vm11971_vm14, %v13290_v61  ;;  %10713 = vmatprep.subr.bf16.mxu0 %v13286_v11 }
 0x7c3   :  { %10720 = vmatprep.subr.bf16.mxu1 %v13286_v11 }
 0x880   :  { %v3481_v46 = vpop.f32.mrb[40].mxu0 }
 0x881   :  { %v8054_v3 = vmul.f32 -1.442695, %v3481_v46  ;;  %v3557_v19 = vpop.f32.mrb[40].mxu1  ;;  %v9506_v17 = vpop.f32.mrb[41].mxu0 }
 0x882   :  { %v8057_v4 = vmul.f32 -1.442695, %v3557_v19  ;;  %v9523_v49 = vpop.f32.mrb[41].mxu1 }
 0x883   :  { %11299 = vpow2.f32 %v8054_v3 }
 0x884   :  { %11301 = vpow2.f32 %v8057_v4 }
 0x88d   :  { %v11300_v0 = vpop.eup %11299 }
 0x88e   :  { %v11302_v29 = vpop.eup %11301  ;;  %v3488_v54 = vadd.f32 1.0, %v11300_v0  ;;  %v3633_v36 = vpop.f32.mrb[42].mxu0 }
 0x88f   :  { %v3564_v32 = vadd.f32 1.0, %v11302_v29  ;;  %11303 = vtanh.f32 %v3633_v36  ;;  %v3704_v34 = vpop.f32.mrb[42].mxu1  ;;  %v9540_v18 = vpop.f32.mrb[43].mxu0 }
 0x890   :  { %11305 = vrcp.f32 %v3488_v54  ;;  %v8062_v1 = vmul.f32 -1.442695, %v3704_v34  ;;  %v9557_v55 = vpop.f32.mrb[43].mxu1  ;;  %v3721_v36 = vpop.permute.xlu0 %3720  ;;  %v4035_v18 = vsel %vm176_vm1, %v11794_v33, %v11785_v30 }
 0x891   :  { %11307 = vrcp.f32 %v3564_v32 }
 0x892   :  { %11309 = vpow2.f32 %v8062_v1 }
 0x899   :  { %v11304_v45 = vpop.eup %11303 }
 0x89a   :  { %v11306_v46 = vpop.eup %11305 }
 0x89b   :  { %v11308_v17 = vpop.eup %11307  ;;  %v3715_v19 = vmul.f32 %v11306_v46, %v11304_v45  ;;  %v4043_v46 = vpop.permute.xlu1 %4042 }
 0x89c   :  { %v11310_v49 = vpop.eup %11309  ;;  %v3714_v3 = vmul.f32 %v11308_v17, %v12337_v47  ;;  %v4032_v47 = vsel %vm188_vm5, %v11776_v25, %v12165_v21  ;;  %v4036_v21 = vsel %vm13297_vm2, %v11799_v35, %v4035_v18  ;;  %vm4051_vm2 = vcmask 1043456  }
 0x89d   :  { %v3711_v4 = vadd.f32 1.0, %v11310_v49  ;;  %v4033_v1 = vsel %vm191_vm6, %v11778_v26, %v4032_v47  ;;  %v4037_v45 = vsel %vm182_vm3, %v11803_v37, %v4036_v21 }
 0x89e   :  { %v12518_v61 = vadd.f32 %v3715_v19, %v3714_v3  ;;  %v4034_v55 = vsel %vm194_vm7, %v11780_v27, %v4033_v1  ;;  %v4046_v19 = vsel %vm197_vm9, %v4037_v45, %v4043_v46 }
 0x89f   :  { %11311 = vrcp.f32 %v3711_v4  ;;  %v4045_v17 = vsel %vm197_vm9, %v4034_v55, %v4043_v46  ;;  %v4048_v3 = vsel %vm199_vm10, %v4046_v19, 1.0 }
 0x8a0   :  { %11313 = vtanh.f32 %v12518_v61  ;;  %v4047_v49 = vsel %vm199_vm10, %v4045_v17, 1.0 }
 0x8a1   :  { %v4052_v4 = vrot.slane %v4047_v49, 4 }
 0x8a9   :  { %v11312_v0 = vpop.eup %11311 }
 0x8aa   :  { %v11314_v29 = vpop.eup %11313 }
 0x8ab   :  { %v3718_v54 = vmul.f32 %v11314_v29, %v11312_v0  ;;  %v4053_v0 = vrot.slane %v4048_v3, 4 }
 0x8ad   :  { %4362 = vrot.lane.b32.xlu0 %v3718_v54, %s11646_s9  ;;  %v3723_v32 = vsel %vm197_vm9, %v3718_v54, %v3721_v36  ;;  %v4054_v29 = vsel %vm4051_vm2, %v4052_v4, %v4053_v0  ;;  %v13300_v54 = vld [vmem:[#allocation14_spill] sm:$0xff]  ;;  %v13301_v36 = vld [vmem:[#allocation15_spill] sm:$0xff]  ;;  %vm13305_vm2 = vcmask 1042434  }
 0x8ae   :  { %v3724_v34 = vsel %vm845_vm15, %v3723_v32, 1.0  ;;  %v13302_v32 = vld [vmem:[#allocation16_spill] sm:$0xff] }
 0x8af   :  { %9567 = vmatmul.mubr.msk.f32.vlgmr.msra.gmra.mrb[44].mxu0 %vm847_vm13, %v3724_v34  ;;  %9578 = vmatmul.mubr.msk.f32.vlgmr.msra.gmra.mrb[44].mxu1 %vm847_vm13, %v3724_v34 }
 0x8b0   :  { %10715 = vmatpush3.bf16.msra.mxu0 %v11994_v24  ;;  %10722 = vmatpush3.bf16.msra.mxu1 %v11996_v44 }
 0x8b1   :  { %10716 = vmatprep.subr.bf16.mxu0 %v13286_v11  ;;  %10723 = vmatprep.subr.bf16.mxu1 %v13286_v11 }
 0x8b2   :  { %9588 = vmatprep.mubr.msk.f32.mxu0 %vm11642_vm0, %v13285_v10  ;;  %9599 = vmatprep.mubr.msk.f32.mxu1 %vm11642_vm0, %v13285_v10 }
 0x8b4   :  { %10719 = vmatpush3.bf16.msk.msra.mxu0 %vm11971_vm14, %v12007_v58  ;;  %10726 = vmatpush3.bf16.msk.msra.mxu1 %vm11971_vm14, %v12009_v6 }
 0x8b5   :  { %10727 = vmatprep.subr.bf16.mxu0 %v13286_v11  ;;  %10736 = vmatprep.subr.bf16.mxu1 %v13286_v11 }
 0x8b7   :  { %9589 = vmatmul.mubr.msk.f32.vlgmr.msra.gmra.mrb[46].mxu0 %vm847_vm13, %v3724_v34  ;;  %9600 = vmatmul.mubr.msk.f32.vlgmr.msra.gmra.mrb[46].mxu1 %vm847_vm13, %v3724_v34  ;;  %v13303_v34 = vld [vmem:[#allocation17_spill] sm:$0xff] }
 0x8b8   :  { %10729 = vmatpush3.bf16.msra.mxu0 %v11762_v5  ;;  %10738 = vmatpush3.bf16.msra.mxu1 %v11764_v9 }
 0x8b9   :  { %10730 = vmatprep.subr.bf16.mxu0 %v13286_v11  ;;  %10739 = vmatprep.subr.bf16.mxu1 %v13286_v11 }
 0x8ba   :  { %9616 = vmatprep.mubr.msk.f32.mxu0 %vm11642_vm0, %v13285_v10  ;;  %9633 = vmatprep.mubr.msk.f32.mxu1 %vm11642_vm0, %v13285_v10 }
 0x8bc   :  { %10732 = vmatpush3.bf16.msra.mxu0 %v11767_v12  ;;  %10741 = vmatpush3.bf16.msra.mxu1 %v11771_v15 }
 0x8bd   :  { %10733 = vmatprep.subr.bf16.mxu0 %v13286_v11  ;;  %10742 = vmatprep.subr.bf16.mxu1 %v13286_v11 }
 0x8c0   :  { %10735 = vmatpush3.bf16.msra.mxu0 %v11783_v28  ;;  %10744 = vmatpush3.bf16.msra.mxu1 %v11789_v31 }
 0x8c1   :  { %9614 = vmatprep.subr.mxu0 %v13285_v10  ;;  %9631 = vmatprep.subr.mxu1 %v13285_v10 }
 0x8c4   :  { %9615 = vmatpush3.msk.msra.mxu0 %vm205_vm8, %v12224_v53  ;;  %9632 = vmatpush3.msk.msra.mxu1 %vm205_vm8, %v12228_v41  ;;  %v13298_v53 = vld [vmem:[#allocation12_spill] sm:$0xff]  ;;  %v13299_v41 = vld [vmem:[#allocation13_spill] sm:$0xff] }
 0x8c5   :  { %9617 = vmatmul.mubr.msk.f32.vlgmr.msra.gmra.mrb[48].mxu0 %vm201_vm11, %v4054_v29  ;;  %9634 = vmatmul.mubr.msk.f32.vlgmr.msra.gmra.mrb[48].mxu1 %vm201_vm11, %v4054_v29 }
 0x8c6   :  { %10745 = vmatprep.subr.bf16.mxu0 %v13286_v11  ;;  %10754 = vmatprep.subr.bf16.mxu1 %v13286_v11 }
 0x8c7   :  { %10747 = vmatpush3.bf16.msra.mxu0 %v11821_v48  ;;  %10756 = vmatpush3.bf16.msra.mxu1 %v11826_v50 }
 0x8c8   :  { %10748 = vmatprep.subr.bf16.mxu0 %v13286_v11  ;;  %10757 = vmatprep.subr.bf16.mxu1 %v13286_v11 }
 0x8c9   :  { %9650 = vmatprep.mubr.msk.f32.mxu0 %vm11642_vm0, %v13285_v10  ;;  %9667 = vmatprep.mubr.msk.f32.mxu1 %vm11642_vm0, %v13285_v10 }
 0x8cb   :  { %10750 = vmatpush3.bf16.msra.mxu0 %v11836_v56  ;;  %10759 = vmatpush3.bf16.msra.mxu1 %v11840_v57 }
 0x8cc   :  { %10751 = vmatprep.subr.bf16.mxu0 %v13286_v11  ;;  %10760 = vmatprep.subr.bf16.mxu1 %v13286_v11 }
 0x8cf   :  { %10753 = vmatpush3.bf16.msra.mxu0 %v11848_v62  ;;  %10762 = vmatpush3.bf16.msra.mxu1 %v11852_v63 }
 0x8d0   :  { %9648 = vmatprep.subr.mxu0 %v13285_v10  ;;  %9665 = vmatprep.subr.mxu1 %v13285_v10 }
 0x8d3   :  { %9649 = vmatpush3.msk.msra.mxu0 %vm205_vm8, %v12421_v20  ;;  %9666 = vmatpush3.msk.msra.mxu1 %vm205_vm8, %v12425_v16 }
 0x8d4   :  { %9651 = vmatmul.mubr.msk.f32.vlgmr.msra.gmra.mrb[50].mxu0 %vm201_vm11, %v4054_v29  ;;  %9668 = vmatmul.mubr.msk.f32.vlgmr.msra.gmra.mrb[50].mxu1 %vm201_vm11, %v4054_v29 }
 0x8d5   :  { %10763 = vmatprep.subr.bf16.mxu0 %v13286_v11  ;;  %10772 = vmatprep.subr.bf16.mxu1 %v13286_v11 }
 0x8d6   :  { %10765 = vmatpush3.bf16.msra.mxu0 %v11875_v8  ;;  %10774 = vmatpush3.bf16.msra.mxu1 %v11877_v14 }
 0x8d7   :  { %10766 = vmatprep.subr.bf16.mxu0 %v13286_v11  ;;  %10775 = vmatprep.subr.bf16.mxu1 %v13286_v11 }
 0x8d8   :  { %9684 = vmatprep.mubr.msk.f32.mxu0 %vm11642_vm0, %v13285_v10  ;;  %9701 = vmatprep.mubr.msk.f32.mxu1 %vm11642_vm0, %v13285_v10 }
 0x8da   :  { %10768 = vmatpush3.bf16.msra.mxu0 %v13298_v53  ;;  %10777 = vmatpush3.bf16.msra.mxu1 %v13299_v41 }
 0x8db   :  { %10769 = vmatprep.subr.bf16.mxu0 %v13286_v11  ;;  %10778 = vmatprep.subr.bf16.mxu1 %v13286_v11 }
 0x8de   :  { %10771 = vmatpush3.bf16.msra.mxu0 %v13300_v54  ;;  %10780 = vmatpush3.bf16.msra.mxu1 %v13301_v36 }
 0x8df   :  { %9682 = vmatprep.subr.mxu0 %v13285_v10  ;;  %9699 = vmatprep.subr.mxu1 %v13285_v10 }
 0x8e2   :  { %9683 = vmatpush3.msk.msra.mxu0 %vm205_vm8, %v13302_v32  ;;  %9700 = vmatpush3.msk.msra.mxu1 %vm205_vm8, %v13303_v34 }
 0x8e3   :  { %10781 = vmatprep.subr.bf16.mxu0 %v13286_v11  ;;  %10790 = vmatprep.subr.bf16.mxu1 %v13286_v11 }
 0x982   :  { %v3794_v47 = vpop.f32.mrb[44].mxu0  ;;  %v3870_v18 = vpop.f32.mrb[44].mxu1 }
 0x983   :  { %v8065_v1 = vmul.f32 -1.442695, %v3794_v47  ;;  %v8068_v21 = vmul.f32 -1.442695, %v3870_v18  ;;  %v9568_v55 = vpop.f32.mrb[45].mxu0  ;;  %v9579_v45 = vpop.f32.mrb[45].mxu1 }
 0x985   :  { %11315 = vpow2.f32 %v8065_v1 }
 0x986   :  { %11317 = vpow2.f32 %v8068_v21 }
 0x98a   :  { %v3946_v46 = vpop.f32.mrb[46].mxu0  ;;  %v4017_v17 = vpop.f32.mrb[46].mxu1 }
 0x98b   :  { %v9590_v19 = vpop.f32.mrb[47].mxu0  ;;  %v9601_v49 = vpop.f32.mrb[47].mxu1  ;;  %v8073_v3 = vmul.f32 -1.442695, %v4017_v17 }
 0x98d   :  { %11319 = vpow2.f32 %v8073_v3 }
 0x98e   :  { %11321 = vtanh.f32 %v3946_v46 }
 0x98f   :  { %v11316_v4 = vpop.eup %11315 }
 0x990   :  { %v11318_v0 = vpop.eup %11317  ;;  %v3801_v29 = vadd.f32 1.0, %v11316_v4 }
 0x991   :  { %v3877_v34 = vadd.f32 1.0, %v11318_v0 }
 0x992   :  { %11323 = vrcp.f32 %v3801_v29 }
 0x993   :  { %11325 = vrcp.f32 %v3877_v34 }
 0x997   :  { %v11320_v21 = vpop.eup %11319 }
 0x998   :  { %v4123_v32 = vpop.f32.mrb[48].mxu0  ;;  %v4199_v47 = vpop.f32.mrb[48].mxu1  ;;  %v4024_v54 = vadd.f32 1.0, %v11320_v21 }
 0x999   :  { %v8076_v18 = vmul.f32 -1.442695, %v4123_v32  ;;  %v8079_v55 = vmul.f32 -1.442695, %v4199_v47  ;;  %v9618_v45 = vpop.f32.mrb[49].mxu0  ;;  %v9635_v1 = vpop.f32.mrb[49].mxu1 }
 0x99a   :  { %v11322_v36 = vpop.eup %11321 }
 0x99b   :  { %11327 = vpow2.f32 %v8076_v18 }
 0x99c   :  { %v11324_v19 = vpop.eup %11323  ;;  %11329 = vpow2.f32 %v8079_v55 }
 0x99d   :  { %v11326_v17 = vpop.eup %11325  ;;  %v4028_v49 = vmul.f32 %v11324_v19, %v11322_v36  ;;  %11331 = vrcp.f32 %v4024_v54 }
 0x99e   :  { %v4027_v3 = vmul.f32 %v11326_v17, %v12460_v43 }
 0x9a0   :  { %v12633_v4 = vadd.f32 %v4028_v49, %v4027_v3 }
 0x9a2   :  { %11333 = vtanh.f32 %v12633_v4 }
 0x9a5   :  { %v11328_v34 = vpop.eup %11327 }
 0x9a6   :  { %v11330_v32 = vpop.eup %11329  ;;  %v4130_v46 = vadd.f32 1.0, %v11328_v34 }
 0x9a7   :  { %v4206_v0 = vadd.f32 1.0, %v11330_v32  ;;  %v4275_v29 = vpop.f32.mrb[50].mxu0  ;;  %v4346_v47 = vpop.f32.mrb[50].mxu1 }
 0x9a8   :  { %11335 = vrcp.f32 %v4130_v46  ;;  %v8084_v18 = vmul.f32 -1.442695, %v4346_v47  ;;  %v9652_v45 = vpop.f32.mrb[51].mxu0  ;;  %v9669_v55 = vpop.f32.mrb[51].mxu1 }
 0x9a9   :  { %11337 = vrcp.f32 %v4206_v0  ;;  %v11332_v36 = vpop.eup %11331  ;;  %v4363_v47 = vpop.permute.xlu0 %4362 }
 0x9aa   :  { %11339 = vtanh.f32 %v4275_v29 }
 0x9ab   :  { %11341 = vpow2.f32 %v8084_v18 }
 0x9ac   :  { %v11334_v43 = vpop.eup %11333 }
 0x9ad   :  { %v4031_v1 = vmul.f32 %v11334_v43, %v11332_v36 }
 0x9af   :  { %4675 = vrot.lane.b32.xlu1 %v4031_v1, %s11644_s3 }
 0x9b2   :  { %v11336_v54 = vpop.eup %11335 }
 0x9b3   :  { %v11338_v21 = vpop.eup %11337 }
 0x9b4   :  { %v11340_v19 = vpop.eup %11339  ;;  %v4356_v17 = vmul.f32 %v11338_v21, %v12465_v7  ;;  %v13304_v7 = vld [vmem:[#allocation18_spill] sm:$0xff] }
 0x9b5   :  { %v11342_v49 = vpop.eup %11341  ;;  %v4357_v3 = vmul.f32 %v11340_v19, %v11336_v54 }
 0x9b6   :  { %v4353_v34 = vadd.f32 1.0, %v11342_v49 }
 0x9b7   :  { %v12638_v32 = vadd.f32 %v4357_v3, %v4356_v17 }
 0x9b8   :  { %11343 = vrcp.f32 %v4353_v34 }
 0x9b9   :  { %11345 = vtanh.f32 %v12638_v32 }
 0x9c2   :  { %v11344_v46 = vpop.eup %11343 }
 0x9c3   :  { %v11346_v0 = vpop.eup %11345 }
 0x9c4   :  { %v4360_v29 = vmul.f32 %v11346_v0, %v11344_v46 }
 0x9c6   :  { %v4996_v18 = vrot.slane %v4360_v29, 3  ;;  %v4365_v45 = vsel %vm522_vm12, %v4360_v29, %v4363_v47 }
 0x9c7   :  { %v4366_v55 = vsel %vm199_vm10, %v4365_v45, 1.0 }
 0x9c8   :  { %4997 = vrot.lane.b32.xlu0 %v4996_v18, %s11644_s3  ;;  %9685 = vmatmul.mubr.msk.f32.vlgmr.msra.gmra.mrb[52].mxu0 %vm201_vm11, %v4366_v55 }
 0x9c9   :  { %9702 = vmatmul.mubr.msk.f32.vlgmr.msra.gmra.mrb[52].mxu1 %vm201_vm11, %v4366_v55  ;;  %10783 = vmatpush3.bf16.msra.mxu0 %v11912_v38 }
 0x9ca   :  { %10792 = vmatpush3.bf16.msra.mxu1 %v11915_v42  ;;  %10784 = vmatprep.subr.bf16.mxu0 %v13286_v11 }
 0x9cb   :  { %10793 = vmatprep.subr.bf16.mxu1 %v13286_v11  ;;  %9718 = vmatprep.mubr.msk.f32.mxu0 %vm11642_vm0, %v13285_v10 }
 0x9cc   :  { %9735 = vmatprep.mubr.msk.f32.mxu1 %vm11642_vm0, %v13285_v10 }
 0x9cd   :  { %10786 = vmatpush3.bf16.msra.mxu0 %v11922_v51 }
 0x9ce   :  { %10795 = vmatpush3.bf16.msra.mxu1 %v11926_v52  ;;  %10787 = vmatprep.subr.bf16.mxu0 %v13286_v11 }
 0x9cf   :  { %10796 = vmatprep.subr.bf16.mxu1 %v13286_v11 }
 0x9d1   :  { %10789 = vmatpush3.bf16.msra.mxu0 %v11934_v59 }
 0x9d2   :  { %10798 = vmatpush3.bf16.msra.mxu1 %v11938_v60  ;;  %9716 = vmatprep.subr.mxu0 %v13285_v10 }
 0x9d3   :  { %9733 = vmatprep.subr.mxu1 %v13285_v10 }
 0x9d5   :  { %9717 = vmatpush3.msk.msra.mxu0 %vm205_vm8, %v12489_v2 }
 0x9d6   :  { %9734 = vmatpush3.msk.msra.mxu1 %vm205_vm8, %v12493_v23  ;;  %9719 = vmatmul.mubr.msk.f32.vlgmr.msra.gmra.mrb[54].mxu0 %vm201_vm11, %v4366_v55 }
 0x9d7   :  { %9736 = vmatmul.mubr.msk.f32.vlgmr.msra.gmra.mrb[54].mxu1 %vm201_vm11, %v4366_v55  ;;  %10799 = vmatprep.subr.bf16.mxu0 %v13286_v11 }
 0x9d8   :  { %10806 = vmatprep.subr.bf16.mxu1 %v13286_v11  ;;  %10801 = vmatpush3.bf16.msra.mxu0 %v11961_v13 }
 0x9d9   :  { %10808 = vmatpush3.bf16.msra.mxu1 %v11963_v22  ;;  %10802 = vmatprep.subr.bf16.mxu0 %v13286_v11 }
 0x9da   :  { %10809 = vmatprep.subr.bf16.mxu1 %v13286_v11  ;;  %9746 = vmatprep.mubr.msk.f32.mxu0 %vm11642_vm0, %v13285_v10 }
 0x9db   :  { %9757 = vmatprep.mubr.msk.f32.mxu1 %vm11642_vm0, %v13285_v10 }
 0x9dc   :  { %10805 = vmatpush3.bf16.msk.msra.mxu0 %vm11971_vm14, %v11966_v39 }
 0x9dd   :  { %10812 = vmatpush3.bf16.msk.msra.mxu1 %vm11971_vm14, %v13304_v7  ;;  %10813 = vmatprep.subr.bf16.mxu0 %v13286_v11 }
 0x9de   :  { %10820 = vmatprep.subr.bf16.mxu1 %v13286_v11 }
 0xa9b   :  { %v4436_v36 = vpop.f32.mrb[52].mxu0 }
 0xa9c   :  { %v8087_v43 = vmul.f32 -1.442695, %v4436_v36  ;;  %v4512_v1 = vpop.f32.mrb[52].mxu1  ;;  %v9686_v54 = vpop.f32.mrb[53].mxu0 }
 0xa9d   :  { %v8090_v21 = vmul.f32 -1.442695, %v4512_v1  ;;  %v9703_v19 = vpop.f32.mrb[53].mxu1 }
 0xa9e   :  { %11347 = vpow2.f32 %v8087_v43 }
 0xa9f   :  { %11349 = vpow2.f32 %v8090_v21 }
 0xaa8   :  { %v11348_v17 = vpop.eup %11347 }
 0xaa9   :  { %v11350_v49 = vpop.eup %11349  ;;  %v4443_v3 = vadd.f32 1.0, %v11348_v17  ;;  %v4588_v34 = vpop.f32.mrb[54].mxu0 }
 0xaaa   :  { %v4519_v46 = vadd.f32 1.0, %v11350_v49  ;;  %11351 = vtanh.f32 %v4588_v34  ;;  %v4659_v0 = vpop.f32.mrb[54].mxu1  ;;  %v9720_v29 = vpop.f32.mrb[55].mxu0 }
 0xaab   :  { %11353 = vrcp.f32 %v4443_v3  ;;  %v8095_v47 = vmul.f32 -1.442695, %v4659_v0  ;;  %v9737_v18 = vpop.f32.mrb[55].mxu1  ;;  %v4676_v34 = vpop.permute.xlu1 %4675  ;;  %v4989_v0 = vsel %vm176_vm1, %v11785_v30, %v11780_v27 }
 0xaac   :  { %11355 = vrcp.f32 %v4519_v46  ;;  %v4990_v29 = vsel %vm13305_vm2, %v11794_v33, %v4989_v0  ;;  %vm5006_vm2 = vcmask 1042432  }
 0xaad   :  { %11357 = vpow2.f32 %v8095_v47  ;;  %v12708_v47 = vld [vmem:[#allocation2] sm:$0xff] }
 0xaae   :  { %v4987_v18 = vsel %vm191_vm6, %v11776_v25, %v12708_v47 }
 0xab4   :  { %v11352_v45 = vpop.eup %11351 }
 0xab5   :  { %v11354_v55 = vpop.eup %11353 }
 0xab6   :  { %v11356_v36 = vpop.eup %11355  ;;  %v4670_v1 = vmul.f32 %v11354_v55, %v11352_v45  ;;  %v4991_v45 = vsel %vm182_vm3, %v11799_v35, %v4990_v29  ;;  %v4988_v55 = vsel %vm194_vm7, %v11778_v26, %v4987_v18  ;;  %v13309_v29 = vld [vmem:[#allocation17_spill] sm:$0xff] }
 0xab7   :  { %v11358_v54 = vpop.eup %11357  ;;  %v4669_v43 = vmul.f32 %v11356_v36, %v12518_v61  ;;  %v4992_v36 = vsel %vm185_vm4, %v11803_v37, %v4991_v45 }
 0xab8   :  { %v4666_v21 = vadd.f32 1.0, %v11358_v54 }
 0xab9   :  { %v12687_v19 = vadd.f32 %v4670_v1, %v4669_v43  ;;  %v4998_v1 = vpop.permute.xlu0 %4997 }
 0xaba   :  { %11359 = vrcp.f32 %v4666_v21  ;;  %v5000_v54 = vsel %vm197_vm9, %v4988_v55, %v4998_v1  ;;  %v5001_v43 = vsel %vm197_vm9, %v4992_v36, %v4998_v1 }
 0xabb   :  { %11361 = vtanh.f32 %v12687_v19  ;;  %v5002_v21 = vsel %vm199_vm10, %v5000_v54, 1.0 }
 0xac4   :  { %v11360_v17 = vpop.eup %11359 }
 0xac5   :  { %v11362_v49 = vpop.eup %11361 }
 0xac6   :  { %v4673_v3 = vmul.f32 %v11362_v49, %v11360_v17  ;;  %v5003_v17 = vsel %vm199_vm10, %v5001_v43, 1.0  ;;  %v5007_v49 = vrot.slane %v5002_v21, 5 }
 0xac8   :  { %5317 = vrot.lane.b32.xlu1 %v4673_v3, %s11646_s9  ;;  %v4678_v46 = vsel %vm197_vm9, %v4673_v3, %v4676_v34  ;;  %v5008_v3 = vrot.slane %v5003_v17, 5  ;;  %v12749_v34 = vld [vmem:[#allocation4 + $0x30] sm:$0x1] }
 0xac9   :  { %v4679_v61 = vsel %vm845_vm15, %v4678_v46, 1.0  ;;  %v12753_v46 = vld [vmem:[#allocation4 + $0x68] sm:$0x1] }
 0xaca   :  { %9747 = vmatmul.mubr.msk.f32.vlgmr.msra.gmra.mrb[56].mxu0 %vm847_vm13, %v4679_v61  ;;  %9758 = vmatmul.mubr.msk.f32.vlgmr.msra.gmra.mrb[56].mxu1 %vm847_vm13, %v4679_v61  ;;  %v5009_v0 = vsel %vm5006_vm2, %v5007_v49, %v5008_v3  ;;  %vm13310_vm2 = vcmask 1042434  }
 0xacb   :  { %10815 = vmatpush3.bf16.msra.mxu0 %v11994_v24  ;;  %10822 = vmatpush3.bf16.msra.mxu1 %v11996_v44 }
 0xacc   :  { %10816 = vmatprep.subr.bf16.mxu0 %v13286_v11  ;;  %10823 = vmatprep.subr.bf16.mxu1 %v13286_v11 }
 0xacd   :  { %9768 = vmatprep.mubr.msk.f32.mxu0 %vm11642_vm0, %v13285_v10  ;;  %9779 = vmatprep.mubr.msk.f32.mxu1 %vm11642_vm0, %v13285_v10 }
 0xacf   :  { %10819 = vmatpush3.bf16.msk.msra.mxu0 %vm11971_vm14, %v12007_v58  ;;  %10826 = vmatpush3.bf16.msk.msra.mxu1 %vm11971_vm14, %v12009_v6 }
 0xad0   :  { %10827 = vmatprep.subr.bf16.mxu0 %v13286_v11  ;;  %10836 = vmatprep.subr.bf16.mxu1 %v13286_v11 }
 0xad2   :  { %9769 = vmatmul.mubr.msk.f32.vlgmr.msra.gmra.mrb[58].mxu0 %vm847_vm13, %v4679_v61  ;;  %9780 = vmatmul.mubr.msk.f32.vlgmr.msra.gmra.mrb[58].mxu1 %vm847_vm13, %v4679_v61  ;;  %v13308_v61 = vld [vmem:[#allocation16_spill] sm:$0xff] }
 0xad3   :  { %10829 = vmatpush3.bf16.msra.mxu0 %v11762_v5  ;;  %10838 = vmatpush3.bf16.msra.mxu1 %v11764_v9 }
 0xad4   :  { %10830 = vmatprep.subr.bf16.mxu0 %v13286_v11  ;;  %10839 = vmatprep.subr.bf16.mxu1 %v13286_v11 }
 0xad5   :  { %9796 = vmatprep.mubr.msk.f32.mxu0 %vm11642_vm0, %v13285_v10  ;;  %9813 = vmatprep.mubr.msk.f32.mxu1 %vm11642_vm0, %v13285_v10 }
 0xad7   :  { %10832 = vmatpush3.bf16.msra.mxu0 %v11767_v12  ;;  %10841 = vmatpush3.bf16.msra.mxu1 %v11771_v15 }
 0xad8   :  { %10833 = vmatprep.subr.bf16.mxu0 %v13286_v11  ;;  %10842 = vmatprep.subr.bf16.mxu1 %v13286_v11 }
 0xadb   :  { %10835 = vmatpush3.bf16.msra.mxu0 %v11783_v28  ;;  %10844 = vmatpush3.bf16.msra.mxu1 %v11789_v31 }
 0xadc   :  { %9794 = vmatprep.subr.mxu0 %v13285_v10  ;;  %9811 = vmatprep.subr.mxu1 %v13285_v10 }
 0xadf   :  { %9795 = vmatpush3.msk.msra.mxu0 %vm205_vm8, %v12749_v34  ;;  %9812 = vmatpush3.msk.msra.mxu1 %vm205_vm8, %v12753_v46 }
 0xae0   :  { %9797 = vmatmul.mubr.msk.f32.vlgmr.msra.gmra.mrb[60].mxu0 %vm201_vm11, %v5009_v0  ;;  %9814 = vmatmul.mubr.msk.f32.vlgmr.msra.gmra.mrb[60].mxu1 %vm201_vm11, %v5009_v0 }
 0xae1   :  { %10845 = vmatprep.subr.bf16.mxu0 %v13286_v11  ;;  %10854 = vmatprep.subr.bf16.mxu1 %v13286_v11 }
 0xae2   :  { %10847 = vmatpush3.bf16.msra.mxu0 %v11821_v48  ;;  %10856 = vmatpush3.bf16.msra.mxu1 %v11826_v50 }
 0xae3   :  { %10848 = vmatprep.subr.bf16.mxu0 %v13286_v11  ;;  %10857 = vmatprep.subr.bf16.mxu1 %v13286_v11 }
 0xae4   :  { %9830 = vmatprep.mubr.msk.f32.mxu0 %vm11642_vm0, %v13285_v10  ;;  %9847 = vmatprep.mubr.msk.f32.mxu1 %vm11642_vm0, %v13285_v10 }
 0xae6   :  { %10850 = vmatpush3.bf16.msra.mxu0 %v11836_v56  ;;  %10859 = vmatpush3.bf16.msra.mxu1 %v11840_v57 }
 0xae7   :  { %10851 = vmatprep.subr.bf16.mxu0 %v13286_v11  ;;  %10860 = vmatprep.subr.bf16.mxu1 %v13286_v11 }
 0xaea   :  { %10853 = vmatpush3.bf16.msra.mxu0 %v11848_v62  ;;  %10862 = vmatpush3.bf16.msra.mxu1 %v11852_v63 }
 0xaeb   :  { %9828 = vmatprep.subr.mxu0 %v13285_v10  ;;  %9845 = vmatprep.subr.mxu1 %v13285_v10 }
 0xaee   :  { %9829 = vmatpush3.msk.msra.mxu0 %vm205_vm8, %v12421_v20  ;;  %9846 = vmatpush3.msk.msra.mxu1 %vm205_vm8, %v12425_v16  ;;  %v13306_v20 = vld [vmem:[#allocation14_spill] sm:$0xff]  ;;  %v13307_v16 = vld [vmem:[#allocation15_spill] sm:$0xff] }
 0xaef   :  { %9831 = vmatmul.mubr.msk.f32.vlgmr.msra.gmra.mrb[62].mxu0 %vm201_vm11, %v5009_v0  ;;  %9848 = vmatmul.mubr.msk.f32.vlgmr.msra.gmra.mrb[62].mxu1 %vm201_vm11, %v5009_v0 }
 0xaf0   :  { %10863 = vmatprep.subr.bf16.mxu0 %v13286_v11  ;;  %10872 = vmatprep.subr.bf16.mxu1 %v13286_v11 }
 0xaf1   :  { %10865 = vmatpush3.bf16.msra.mxu0 %v11875_v8  ;;  %10874 = vmatpush3.bf16.msra.mxu1 %v11877_v14 }
 0xaf2   :  { %10866 = vmatprep.subr.bf16.mxu0 %v13286_v11  ;;  %10875 = vmatprep.subr.bf16.mxu1 %v13286_v11 }
 0xaf3   :  { %9864 = vmatprep.mubr.msk.f32.mxu0 %vm11642_vm0, %v13285_v10  ;;  %9881 = vmatprep.mubr.msk.f32.mxu1 %vm11642_vm0, %v13285_v10 }
 0xaf5   :  { %10868 = vmatpush3.bf16.msra.mxu0 %v13298_v53  ;;  %10877 = vmatpush3.bf16.msra.mxu1 %v13299_v41 }
 0xaf6   :  { %10869 = vmatprep.subr.bf16.mxu0 %v13286_v11  ;;  %10878 = vmatprep.subr.bf16.mxu1 %v13286_v11 }
 0xaf9   :  { %10871 = vmatpush3.bf16.msra.mxu0 %v13306_v20  ;;  %10880 = vmatpush3.bf16.msra.mxu1 %v13307_v16 }
 0xafa   :  { %9862 = vmatprep.subr.mxu0 %v13285_v10  ;;  %9879 = vmatprep.subr.mxu1 %v13285_v10 }
 0xafd   :  { %9863 = vmatpush3.msk.msra.mxu0 %vm205_vm8, %v13308_v61  ;;  %9880 = vmatpush3.msk.msra.mxu1 %vm205_vm8, %v13309_v29 }
 0xafe   :  { %10881 = vmatprep.subr.bf16.mxu0 %v13286_v11  ;;  %10890 = vmatprep.subr.bf16.mxu1 %v13286_v11 }
 0xb9d   :  { %v4749_v18 = vpop.f32.mrb[56].mxu0  ;;  %v4825_v45 = vpop.f32.mrb[56].mxu1 }
 0xb9e   :  { %v8098_v55 = vmul.f32 -1.442695, %v4749_v18  ;;  %v8101_v36 = vmul.f32 -1.442695, %v4825_v45  ;;  %v9748_v1 = vpop.f32.mrb[57].mxu0  ;;  %v9759_v54 = vpop.f32.mrb[57].mxu1 }
 0xba0   :  { %11363 = vpow2.f32 %v8098_v55 }
 0xba1   :  { %11365 = vpow2.f32 %v8101_v36 }
 0xba5   :  { %v4901_v43 = vpop.f32.mrb[58].mxu0  ;;  %v4972_v21 = vpop.f32.mrb[58].mxu1 }
 0xba6   :  { %v9770_v17 = vpop.f32.mrb[59].mxu0  ;;  %v9781_v49 = vpop.f32.mrb[59].mxu1  ;;  %v8106_v3 = vmul.f32 -1.442695, %v4972_v21 }
 0xba8   :  { %11367 = vpow2.f32 %v8106_v3 }
 0xba9   :  { %11369 = vtanh.f32 %v4901_v43 }
 0xbaa   :  { %v11364_v0 = vpop.eup %11363 }
 0xbab   :  { %v11366_v61 = vpop.eup %11365  ;;  %v4756_v29 = vadd.f32 1.0, %v11364_v0 }
 0xbac   :  { %v4832_v16 = vadd.f32 1.0, %v11366_v61 }
 0xbad   :  { %11371 = vrcp.f32 %v4756_v29 }
 0xbae   :  { %11373 = vrcp.f32 %v4832_v16 }
 0xbb2   :  { %v11368_v36 = vpop.eup %11367 }
 0xbb3   :  { %v5078_v20 = vpop.f32.mrb[60].mxu0  ;;  %v5154_v18 = vpop.f32.mrb[60].mxu1  ;;  %v4979_v53 = vadd.f32 1.0, %v11368_v36 }
 0xbb4   :  { %v8109_v45 = vmul.f32 -1.442695, %v5078_v20  ;;  %v8112_v1 = vmul.f32 -1.442695, %v5154_v18  ;;  %v9798_v54 = vpop.f32.mrb[61].mxu0  ;;  %v9815_v55 = vpop.f32.mrb[61].mxu1 }
 0xbb5   :  { %v11370_v41 = vpop.eup %11369 }
 0xbb6   :  { %11375 = vpow2.f32 %v8109_v45 }
 0xbb7   :  { %v11372_v17 = vpop.eup %11371  ;;  %11377 = vpow2.f32 %v8112_v1 }
 0xbb8   :  { %v11374_v21 = vpop.eup %11373  ;;  %v4983_v49 = vmul.f32 %v11372_v17, %v11370_v41  ;;  %11379 = vrcp.f32 %v4979_v53 }
 0xbb9   :  { %v4982_v3 = vmul.f32 %v11374_v21, %v12633_v4 }
 0xbbb   :  { %v12808_v0 = vadd.f32 %v4983_v49, %v4982_v3 }
 0xbbd   :  { %11381 = vtanh.f32 %v12808_v0 }
 0xbc0   :  { %v11376_v16 = vpop.eup %11375 }
 0xbc1   :  { %v11378_v20 = vpop.eup %11377  ;;  %v5085_v43 = vadd.f32 1.0, %v11376_v16 }
 0xbc2   :  { %v5161_v61 = vadd.f32 1.0, %v11378_v20  ;;  %v5230_v29 = vpop.f32.mrb[62].mxu0  ;;  %v5301_v18 = vpop.f32.mrb[62].mxu1 }
 0xbc3   :  { %11383 = vrcp.f32 %v5085_v43  ;;  %v8117_v45 = vmul.f32 -1.442695, %v5301_v18  ;;  %v9832_v54 = vpop.f32.mrb[63].mxu0  ;;  %v9849_v1 = vpop.f32.mrb[63].mxu1 }
 0xbc4   :  { %11385 = vrcp.f32 %v5161_v61  ;;  %v11380_v41 = vpop.eup %11379  ;;  %v5318_v18 = vpop.permute.xlu1 %5317 }
 0xbc5   :  { %11387 = vtanh.f32 %v5230_v29 }
 0xbc6   :  { %11389 = vpow2.f32 %v8117_v45 }
 0xbc7   :  { %v11382_v4 = vpop.eup %11381 }
 0xbc8   :  { %v4986_v55 = vmul.f32 %v11382_v4, %v11380_v41 }
 0xbca   :  { %5630 = vrot.lane.b32.xlu0 %v4986_v55, %s11644_s3 }
 0xbcd   :  { %v11384_v53 = vpop.eup %11383 }
 0xbce   :  { %v11386_v36 = vpop.eup %11385 }
 0xbcf   :  { %v11388_v17 = vpop.eup %11387  ;;  %v5311_v21 = vmul.f32 %v11386_v36, %v12638_v32 }
 0xbd0   :  { %v11390_v49 = vpop.eup %11389  ;;  %v5312_v3 = vmul.f32 %v11388_v17, %v11384_v53 }
 0xbd1   :  { %v5308_v16 = vadd.f32 1.0, %v11390_v49 }
 0xbd2   :  { %v12813_v20 = vadd.f32 %v5312_v3, %v5311_v21 }
 0xbd3   :  { %11391 = vrcp.f32 %v5308_v16 }
 0xbd4   :  { %11393 = vtanh.f32 %v12813_v20 }
 0xbdd   :  { %v11392_v43 = vpop.eup %11391 }
 0xbde   :  { %v11394_v61 = vpop.eup %11393 }
 0xbdf   :  { %v5315_v29 = vmul.f32 %v11394_v61, %v11392_v43 }
 0xbe1   :  { %v5951_v45 = vrot.slane %v5315_v29, 2  ;;  %v5320_v54 = vsel %vm522_vm12, %v5315_v29, %v5318_v18 }
 0xbe2   :  { %v5321_v1 = vsel %vm199_vm10, %v5320_v54, 1.0 }
 0xbe3   :  { %5952 = vrot.lane.b32.xlu1 %v5951_v45, %s11644_s3  ;;  %9865 = vmatmul.mubr.msk.f32.vlgmr.msra.gmra.mrb[64].mxu0 %vm201_vm11, %v5321_v1 }
 0xbe4   :  { %9882 = vmatmul.mubr.msk.f32.vlgmr.msra.gmra.mrb[64].mxu1 %vm201_vm11, %v5321_v1  ;;  %10883 = vmatpush3.bf16.msra.mxu0 %v11912_v38 }
 0xbe5   :  { %10892 = vmatpush3.bf16.msra.mxu1 %v11915_v42  ;;  %10884 = vmatprep.subr.bf16.mxu0 %v13286_v11 }
 0xbe6   :  { %10893 = vmatprep.subr.bf16.mxu1 %v13286_v11  ;;  %9898 = vmatprep.mubr.msk.f32.mxu0 %vm11642_vm0, %v13285_v10 }
 0xbe7   :  { %9915 = vmatprep.mubr.msk.f32.mxu1 %vm11642_vm0, %v13285_v10 }
 0xbe8   :  { %10886 = vmatpush3.bf16.msra.mxu0 %v11922_v51 }
 0xbe9   :  { %10895 = vmatpush3.bf16.msra.mxu1 %v11926_v52  ;;  %10887 = vmatprep.subr.bf16.mxu0 %v13286_v11 }
 0xbea   :  { %10896 = vmatprep.subr.bf16.mxu1 %v13286_v11 }
 0xbec   :  { %10889 = vmatpush3.bf16.msra.mxu0 %v11934_v59 }
 0xbed   :  { %10898 = vmatpush3.bf16.msra.mxu1 %v11938_v60  ;;  %9896 = vmatprep.subr.mxu0 %v13285_v10 }
 0xbee   :  { %9913 = vmatprep.subr.mxu1 %v13285_v10 }
 0xbf0   :  { %9897 = vmatpush3.msk.msra.mxu0 %vm205_vm8, %v12489_v2 }
 0xbf1   :  { %9914 = vmatpush3.msk.msra.mxu1 %vm205_vm8, %v12493_v23  ;;  %9899 = vmatmul.mubr.msk.f32.vlgmr.msra.gmra.mrb[66].mxu0 %vm201_vm11, %v5321_v1 }
 0xbf2   :  { %9916 = vmatmul.mubr.msk.f32.vlgmr.msra.gmra.mrb[66].mxu1 %vm201_vm11, %v5321_v1  ;;  %10899 = vmatprep.subr.bf16.mxu0 %v13286_v11 }
 0xbf3   :  { %10906 = vmatprep.subr.bf16.mxu1 %v13286_v11  ;;  %10901 = vmatpush3.bf16.msra.mxu0 %v11961_v13 }
 0xbf4   :  { %10908 = vmatpush3.bf16.msra.mxu1 %v11963_v22  ;;  %10902 = vmatprep.subr.bf16.mxu0 %v13286_v11 }
 0xbf5   :  { %10909 = vmatprep.subr.bf16.mxu1 %v13286_v11  ;;  %9926 = vmatprep.mubr.msk.f32.mxu0 %vm11642_vm0, %v13285_v10 }
 0xbf6   :  { %9937 = vmatprep.mubr.msk.f32.mxu1 %vm11642_vm0, %v13285_v10 }
 0xbf7   :  { %10905 = vmatpush3.bf16.msk.msra.mxu0 %vm11971_vm14, %v11966_v39 }
 0xbf8   :  { %10912 = vmatpush3.bf16.msk.msra.mxu1 %vm11971_vm14, %v13304_v7  ;;  %10913 = vmatprep.subr.bf16.mxu0 %v13286_v11 }
 0xbf9   :  { %10920 = vmatprep.subr.bf16.mxu1 %v13286_v11 }
 0xcb6   :  { %v5391_v2 = vpop.f32.mrb[64].mxu0 }
 0xcb7   :  { %v8120_v23 = vmul.f32 -1.442695, %v5391_v2  ;;  %v5467_v32 = vpop.f32.mrb[64].mxu1  ;;  %v9866_v41 = vpop.f32.mrb[65].mxu0 }
 0xcb8   :  { %v8123_v4 = vmul.f32 -1.442695, %v5467_v32  ;;  %v9883_v55 = vpop.f32.mrb[65].mxu1 }
 0xcb9   :  { %11395 = vpow2.f32 %v8120_v23  ;;  %v5943_v55 = vsel %vm176_vm1, %v11780_v27, %v11778_v26 }
 0xcba   :  { %11397 = vpow2.f32 %v8123_v4 }
 0xcc3   :  { %v11396_v53 = vpop.eup %11395 }
 0xcc4   :  { %v11398_v36 = vpop.eup %11397  ;;  %v5398_v17 = vadd.f32 1.0, %v11396_v53  ;;  %v5543_v21 = vpop.f32.mrb[66].mxu0 }
 0xcc5   :  { %v5474_v49 = vadd.f32 1.0, %v11398_v36  ;;  %11399 = vtanh.f32 %v5543_v21  ;;  %v5614_v3 = vpop.f32.mrb[66].mxu1  ;;  %v9900_v16 = vpop.f32.mrb[67].mxu0 }
 0xcc6   :  { %11401 = vrcp.f32 %v5398_v17  ;;  %v8128_v43 = vmul.f32 -1.442695, %v5614_v3  ;;  %v9917_v61 = vpop.f32.mrb[67].mxu1  ;;  %v5631_v36 = vpop.permute.xlu0 %5630  ;;  %v5942_v16 = vsel %vm194_vm7, %v11776_v25, %v12708_v47  ;;  %vm5961_vm7 = vcmask 1041408  }
 0xcc7   :  { %11403 = vrcp.f32 %v5474_v49  ;;  %v5953_v61 = vpop.permute.xlu1 %5952 }
 0xcc8   :  { %11405 = vpow2.f32 %v8128_v43 }
 0xccf   :  { %v11400_v29 = vpop.eup %11399 }
 0xcd0   :  { %v11402_v18 = vpop.eup %11401 }
 0xcd1   :  { %v11404_v45 = vpop.eup %11403  ;;  %v5625_v54 = vmul.f32 %v11402_v18, %v11400_v29  ;;  %v5955_v29 = vsel %vm197_vm9, %v5942_v16, %v5953_v61 }
 0xcd2   :  { %v11406_v1 = vpop.eup %11405  ;;  %v5624_v2 = vmul.f32 %v11404_v45, %v12687_v19  ;;  %v5944_v19 = vsel %vm13310_vm2, %v11785_v30, %v5943_v55  ;;  %v5957_v45 = vsel %vm199_vm10, %v5955_v29, 1.0  ;;  %v13311_v55 = vld [vmem:[#allocation12_spill] sm:$0xff] }
 0xcd3   :  { %v5621_v23 = vadd.f32 1.0, %v11406_v1  ;;  %v5945_v49 = vsel %vm182_vm3, %v11794_v33, %v5944_v19  ;;  %v5962_v1 = vrot.slane %v5957_v45, 6  ;;  %v12974_v19 = vld [vmem:[#allocation6 + $0x30] sm:$0x1] }
 0xcd4   :  { %v12862_v32 = vadd.f32 %v5625_v54, %v5624_v2  ;;  %v5946_v3 = vsel %vm185_vm4, %v11799_v35, %v5945_v49  ;;  %13315 = vst [vmem:[#allocation16_spill] sm:$0xff] %v12974_v19 }
 0xcd5   :  { %11407 = vrcp.f32 %v5621_v23  ;;  %v5947_v43 = vsel %vm188_vm5, %v11803_v37, %v5946_v3 }
 0xcd6   :  { %11409 = vtanh.f32 %v12862_v32  ;;  %v5956_v18 = vsel %vm197_vm9, %v5947_v43, %v5953_v61 }
 0xcd7   :  { %v5958_v54 = vsel %vm199_vm10, %v5956_v18, 1.0 }
 0xcd8   :  { %v5963_v2 = vrot.slane %v5958_v54, 6 }
 0xcda   :  { %v5964_v23 = vsel %vm5961_vm7, %v5962_v1, %v5963_v2 }
 0xcdf   :  { %v11408_v41 = vpop.eup %11407 }
 0xce0   :  { %v11410_v4 = vpop.eup %11409 }
 0xce1   :  { %v5628_v53 = vmul.f32 %v11410_v4, %v11408_v41  ;;  %v12946_v41 = vld [vmem:[#allocation4 + $0xa0] sm:$0x1]  ;;  %v12950_v4 = vld [vmem:[#allocation4 + $0xd8] sm:$0x1] }
 0xce3   :  { %6272 = vrot.lane.b32.xlu0 %v5628_v53, %s11646_s9  ;;  %v5633_v17 = vsel %vm197_vm9, %v5628_v53, %v5631_v36  ;;  %v13312_v53 = vld [vmem:[#allocation13_spill] sm:$0xff]  ;;  %v13313_v36 = vld [vmem:[#allocation14_spill] sm:$0xff] }
 0xce4   :  { %v5634_v21 = vsel %vm845_vm15, %v5633_v17, 1.0  ;;  %v13314_v17 = vld [vmem:[#allocation15_spill] sm:$0xff] }
 0xce5   :  { %9927 = vmatmul.mubr.msk.f32.vlgmr.msra.gmra.mrb[68].mxu0 %vm847_vm13, %v5634_v21  ;;  %9938 = vmatmul.mubr.msk.f32.vlgmr.msra.gmra.mrb[68].mxu1 %vm847_vm13, %v5634_v21 }
 0xce6   :  { %10915 = vmatpush3.bf16.msra.mxu0 %v11994_v24  ;;  %10922 = vmatpush3.bf16.msra.mxu1 %v11996_v44 }
 0xce7   :  { %10916 = vmatprep.subr.bf16.mxu0 %v13286_v11  ;;  %10923 = vmatprep.subr.bf16.mxu1 %v13286_v11 }
 0xce8   :  { %9948 = vmatprep.mubr.msk.f32.mxu0 %vm11642_vm0, %v13285_v10  ;;  %9959 = vmatprep.mubr.msk.f32.mxu1 %vm11642_vm0, %v13285_v10 }
 0xcea   :  { %10919 = vmatpush3.bf16.msk.msra.mxu0 %vm11971_vm14, %v12007_v58  ;;  %10926 = vmatpush3.bf16.msk.msra.mxu1 %vm11971_vm14, %v12009_v6 }
 0xceb   :  { %10927 = vmatprep.subr.bf16.mxu0 %v13286_v11  ;;  %10936 = vmatprep.subr.bf16.mxu1 %v13286_v11 }
 0xced   :  { %9949 = vmatmul.mubr.msk.f32.vlgmr.msra.gmra.mrb[70].mxu0 %vm847_vm13, %v5634_v21  ;;  %9960 = vmatmul.mubr.msk.f32.vlgmr.msra.gmra.mrb[70].mxu1 %vm847_vm13, %v5634_v21  ;;  %v12978_v21 = vld [vmem:[#allocation6 + $0x68] sm:$0x1] }
 0xcee   :  { %10929 = vmatpush3.bf16.msra.mxu0 %v11762_v5  ;;  %10938 = vmatpush3.bf16.msra.mxu1 %v11764_v9  ;;  %13316 = vst [vmem:[#allocation17_spill] sm:$0xff] %v12978_v21 }
 0xcef   :  { %10930 = vmatprep.subr.bf16.mxu0 %v13286_v11  ;;  %10939 = vmatprep.subr.bf16.mxu1 %v13286_v11 }
 0xcf0   :  { %9976 = vmatprep.mubr.msk.f32.mxu0 %vm11642_vm0, %v13285_v10  ;;  %9993 = vmatprep.mubr.msk.f32.mxu1 %vm11642_vm0, %v13285_v10 }
 0xcf2   :  { %10932 = vmatpush3.bf16.msra.mxu0 %v11767_v12  ;;  %10941 = vmatpush3.bf16.msra.mxu1 %v11771_v15 }
 0xcf3   :  { %10933 = vmatprep.subr.bf16.mxu0 %v13286_v11  ;;  %10942 = vmatprep.subr.bf16.mxu1 %v13286_v11 }
 0xcf6   :  { %10935 = vmatpush3.bf16.msra.mxu0 %v11783_v28  ;;  %10944 = vmatpush3.bf16.msra.mxu1 %v11789_v31 }
 0xcf7   :  { %9974 = vmatprep.subr.mxu0 %v13285_v10  ;;  %9991 = vmatprep.subr.mxu1 %v13285_v10 }
 0xcfa   :  { %9975 = vmatpush3.msk.msra.mxu0 %vm205_vm8, %v12749_v34  ;;  %9992 = vmatpush3.msk.msra.mxu1 %vm205_vm8, %v12753_v46 }
 0xcfb   :  { %9977 = vmatmul.mubr.msk.f32.vlgmr.msra.gmra.mrb[72].mxu0 %vm201_vm11, %v5964_v23  ;;  %9994 = vmatmul.mubr.msk.f32.vlgmr.msra.gmra.mrb[72].mxu1 %vm201_vm11, %v5964_v23 }
 0xcfc   :  { %10945 = vmatprep.subr.bf16.mxu0 %v13286_v11  ;;  %10954 = vmatprep.subr.bf16.mxu1 %v13286_v11 }
 0xcfd   :  { %10947 = vmatpush3.bf16.msra.mxu0 %v11821_v48  ;;  %10956 = vmatpush3.bf16.msra.mxu1 %v11826_v50 }
 0xcfe   :  { %10948 = vmatprep.subr.bf16.mxu0 %v13286_v11  ;;  %10957 = vmatprep.subr.bf16.mxu1 %v13286_v11 }
 0xcff   :  { %10010 = vmatprep.mubr.msk.f32.mxu0 %vm11642_vm0, %v13285_v10  ;;  %10027 = vmatprep.mubr.msk.f32.mxu1 %vm11642_vm0, %v13285_v10 }
 0xd01   :  { %10950 = vmatpush3.bf16.msra.mxu0 %v11836_v56  ;;  %10959 = vmatpush3.bf16.msra.mxu1 %v11840_v57 }
 0xd02   :  { %10951 = vmatprep.subr.bf16.mxu0 %v13286_v11  ;;  %10960 = vmatprep.subr.bf16.mxu1 %v13286_v11 }
 0xd05   :  { %10953 = vmatpush3.bf16.msra.mxu0 %v11848_v62  ;;  %10962 = vmatpush3.bf16.msra.mxu1 %v11852_v63 }
 0xd06   :  { %10008 = vmatprep.subr.mxu0 %v13285_v10  ;;  %10025 = vmatprep.subr.mxu1 %v13285_v10 }
 0xd09   :  { %10009 = vmatpush3.msk.msra.mxu0 %vm205_vm8, %v12946_v41  ;;  %10026 = vmatpush3.msk.msra.mxu1 %vm205_vm8, %v12950_v4 }
 0xd0a   :  { %10011 = vmatmul.mubr.msk.f32.vlgmr.msra.gmra.mrb[74].mxu0 %vm201_vm11, %v5964_v23  ;;  %10028 = vmatmul.mubr.msk.f32.vlgmr.msra.gmra.mrb[74].mxu1 %vm201_vm11, %v5964_v23 }
 0xd0b   :  { %10963 = vmatprep.subr.bf16.mxu0 %v13286_v11  ;;  %10972 = vmatprep.subr.bf16.mxu1 %v13286_v11 }
 0xd0c   :  { %10965 = vmatpush3.bf16.msra.mxu0 %v11875_v8  ;;  %10974 = vmatpush3.bf16.msra.mxu1 %v11877_v14 }
 0xd0d   :  { %10966 = vmatprep.subr.bf16.mxu0 %v13286_v11  ;;  %10975 = vmatprep.subr.bf16.mxu1 %v13286_v11 }
 0xd0e   :  { %10044 = vmatprep.mubr.msk.f32.mxu0 %vm11642_vm0, %v13285_v10  ;;  %10061 = vmatprep.mubr.msk.f32.mxu1 %vm11642_vm0, %v13285_v10 }
 0xd10   :  { %10968 = vmatpush3.bf16.msra.mxu0 %v13311_v55  ;;  %10977 = vmatpush3.bf16.msra.mxu1 %v13312_v53 }
 0xd11   :  { %10969 = vmatprep.subr.bf16.mxu0 %v13286_v11  ;;  %10978 = vmatprep.subr.bf16.mxu1 %v13286_v11 }
 0xd14   :  { %10971 = vmatpush3.bf16.msra.mxu0 %v13313_v36  ;;  %10980 = vmatpush3.bf16.msra.mxu1 %v13314_v17 }
 0xd15   :  { %10042 = vmatprep.subr.mxu0 %v13285_v10  ;;  %10059 = vmatprep.subr.mxu1 %v13285_v10 }
 0xd18   :  { %10043 = vmatpush3.msk.msra.mxu0 %vm205_vm8, %v12974_v19  ;;  %10060 = vmatpush3.msk.msra.mxu1 %vm205_vm8, %v12978_v21 }
 0xd19   :  { %10981 = vmatprep.subr.bf16.mxu0 %v13286_v11  ;;  %10990 = vmatprep.subr.bf16.mxu1 %v13286_v11 }
 0xdb8   :  { %v5704_v49 = vpop.f32.mrb[68].mxu0  ;;  %v5780_v3 = vpop.f32.mrb[68].mxu1 }
 0xdb9   :  { %v8131_v16 = vmul.f32 -1.442695, %v5704_v49  ;;  %v8134_v43 = vmul.f32 -1.442695, %v5780_v3  ;;  %v9928_v61 = vpop.f32.mrb[69].mxu0  ;;  %v9939_v29 = vpop.f32.mrb[69].mxu1 }
 0xdbb   :  { %11411 = vpow2.f32 %v8131_v16 }
 0xdbc   :  { %11413 = vpow2.f32 %v8134_v43 }
 0xdc0   :  { %v5856_v18 = vpop.f32.mrb[70].mxu0  ;;  %v5927_v45 = vpop.f32.mrb[70].mxu1 }
 0xdc1   :  { %v9950_v54 = vpop.f32.mrb[71].mxu0  ;;  %v9961_v1 = vpop.f32.mrb[71].mxu1  ;;  %v8139_v2 = vmul.f32 -1.442695, %v5927_v45 }
 0xdc3   :  { %11415 = vpow2.f32 %v8139_v2 }
 0xdc4   :  { %11417 = vtanh.f32 %v5856_v18 }
 0xdc5   :  { %v11412_v23 = vpop.eup %11411 }
 0xdc6   :  { %v11414_v19 = vpop.eup %11413  ;;  %v5711_v21 = vadd.f32 1.0, %v11412_v23 }
 0xdc7   :  { %v5787_v17 = vadd.f32 1.0, %v11414_v19 }
 0xdc8   :  { %11419 = vrcp.f32 %v5711_v21 }
 0xdc9   :  { %11421 = vrcp.f32 %v5787_v17 }
 0xdcd   :  { %v11416_v43 = vpop.eup %11415 }
 0xdce   :  { %v6033_v36 = vpop.f32.mrb[72].mxu0  ;;  %v6109_v49 = vpop.f32.mrb[72].mxu1  ;;  %v5934_v55 = vadd.f32 1.0, %v11416_v43 }
 0xdcf   :  { %v8142_v3 = vmul.f32 -1.442695, %v6033_v36  ;;  %v8145_v61 = vmul.f32 -1.442695, %v6109_v49  ;;  %v9978_v29 = vpop.f32.mrb[73].mxu0  ;;  %v9995_v16 = vpop.f32.mrb[73].mxu1 }
 0xdd0   :  { %v11418_v53 = vpop.eup %11417 }
 0xdd1   :  { %11423 = vpow2.f32 %v8142_v3 }
 0xdd2   :  { %v11420_v54 = vpop.eup %11419  ;;  %11425 = vpow2.f32 %v8145_v61 }
 0xdd3   :  { %v11422_v45 = vpop.eup %11421  ;;  %v5938_v1 = vmul.f32 %v11420_v54, %v11418_v53  ;;  %11427 = vrcp.f32 %v5934_v55 }
 0xdd4   :  { %v5937_v2 = vmul.f32 %v11422_v45, %v12808_v0 }
 0xdd6   :  { %v12985_v19 = vadd.f32 %v5938_v1, %v5937_v2 }
 0xdd8   :  { %11429 = vtanh.f32 %v12985_v19 }
 0xddb   :  { %v11424_v17 = vpop.eup %11423 }
 0xddc   :  { %v11426_v36 = vpop.eup %11425  ;;  %v6040_v21 = vadd.f32 1.0, %v11424_v17 }
 0xddd   :  { %v6116_v18 = vadd.f32 1.0, %v11426_v36  ;;  %v6185_v23 = vpop.f32.mrb[74].mxu0  ;;  %v6256_v49 = vpop.f32.mrb[74].mxu1 }
 0xdde   :  { %11431 = vrcp.f32 %v6040_v21  ;;  %v8150_v3 = vmul.f32 -1.442695, %v6256_v49  ;;  %v10012_v29 = vpop.f32.mrb[75].mxu0  ;;  %v10029_v61 = vpop.f32.mrb[75].mxu1 }
 0xddf   :  { %11433 = vrcp.f32 %v6116_v18  ;;  %v11428_v53 = vpop.eup %11427  ;;  %v6273_v49 = vpop.permute.xlu0 %6272 }
 0xde0   :  { %11435 = vtanh.f32 %v6185_v23 }
 0xde1   :  { %11437 = vpow2.f32 %v8150_v3 }
 0xde2   :  { %v11430_v0 = vpop.eup %11429 }
 0xde3   :  { %v5941_v16 = vmul.f32 %v11430_v0, %v11428_v53  ;;  %v13018_v53 = vld [vmem:[#allocation6 + $0xd8] sm:$0x1] }
 0xde5   :  { %6585 = vrot.lane.b32.xlu1 %v5941_v16, %s11644_s3 }
 0xde8   :  { %v11432_v55 = vpop.eup %11431 }
 0xde9   :  { %v11434_v43 = vpop.eup %11433 }
 0xdea   :  { %v11436_v54 = vpop.eup %11435  ;;  %v6266_v45 = vmul.f32 %v11434_v43, %v12813_v20  ;;  %v13014_v20 = vld [vmem:[#allocation6 + $0xa0] sm:$0x1] }
 0xdeb   :  { %v11438_v1 = vpop.eup %11437  ;;  %v6267_v2 = vmul.f32 %v11436_v54, %v11432_v55 }
 0xdec   :  { %v6263_v17 = vadd.f32 1.0, %v11438_v1 }
 0xded   :  { %v12990_v36 = vadd.f32 %v6267_v2, %v6266_v45 }
 0xdee   :  { %11439 = vrcp.f32 %v6263_v17 }
 0xdef   :  { %11441 = vtanh.f32 %v12990_v36 }
 0xdf8   :  { %v11440_v21 = vpop.eup %11439 }
 0xdf9   :  { %v11442_v18 = vpop.eup %11441 }
 0xdfa   :  { %v6270_v23 = vmul.f32 %v11442_v18, %v11440_v21 }
 0xdfc   :  { %v6906_v3 = vrot.slane %v6270_v23, 1  ;;  %v6275_v29 = vsel %vm522_vm12, %v6270_v23, %v6273_v49 }
 0xdfd   :  { %v6276_v61 = vsel %vm199_vm10, %v6275_v29, 1.0 }
 0xdfe   :  { %6907 = vrot.lane.b32.xlu0 %v6906_v3, %s11644_s3  ;;  %10045 = vmatmul.mubr.msk.f32.vlgmr.msra.gmra.mrb[76].mxu0 %vm201_vm11, %v6276_v61 }
 0xdff   :  { %10062 = vmatmul.mubr.msk.f32.vlgmr.msra.gmra.mrb[76].mxu1 %vm201_vm11, %v6276_v61  ;;  %10983 = vmatpush3.bf16.msra.mxu0 %v11912_v38 }
 0xe00   :  { %10992 = vmatpush3.bf16.msra.mxu1 %v11915_v42  ;;  %10984 = vmatprep.subr.bf16.mxu0 %v13286_v11 }
 0xe01   :  { %10993 = vmatprep.subr.bf16.mxu1 %v13286_v11  ;;  %10078 = vmatprep.mubr.msk.f32.mxu0 %vm11642_vm0, %v13285_v10 }
 0xe02   :  { %10095 = vmatprep.mubr.msk.f32.mxu1 %vm11642_vm0, %v13285_v10 }
 0xe03   :  { %10986 = vmatpush3.bf16.msra.mxu0 %v11922_v51 }
 0xe04   :  { %10995 = vmatpush3.bf16.msra.mxu1 %v11926_v52  ;;  %10987 = vmatprep.subr.bf16.mxu0 %v13286_v11 }
 0xe05   :  { %10996 = vmatprep.subr.bf16.mxu1 %v13286_v11 }
 0xe07   :  { %10989 = vmatpush3.bf16.msra.mxu0 %v11934_v59 }
 0xe08   :  { %10998 = vmatpush3.bf16.msra.mxu1 %v11938_v60  ;;  %10076 = vmatprep.subr.mxu0 %v13285_v10 }
 0xe09   :  { %10093 = vmatprep.subr.mxu1 %v13285_v10 }
 0xe0b   :  { %10077 = vmatpush3.msk.msra.mxu0 %vm205_vm8, %v13014_v20 }
 0xe0c   :  { %10094 = vmatpush3.msk.msra.mxu1 %vm205_vm8, %v13018_v53  ;;  %10079 = vmatmul.mubr.msk.f32.vlgmr.msra.gmra.mrb[78].mxu0 %vm201_vm11, %v6276_v61 }
 0xe0d   :  { %10096 = vmatmul.mubr.msk.f32.vlgmr.msra.gmra.mrb[78].mxu1 %vm201_vm11, %v6276_v61  ;;  %10999 = vmatprep.subr.bf16.mxu0 %v13286_v11 }
 0xe0e   :  { %11006 = vmatprep.subr.bf16.mxu1 %v13286_v11  ;;  %11001 = vmatpush3.bf16.msra.mxu0 %v11961_v13 }
 0xe0f   :  { %11008 = vmatpush3.bf16.msra.mxu1 %v11963_v22  ;;  %11002 = vmatprep.subr.bf16.mxu0 %v13286_v11 }
 0xe10   :  { %11009 = vmatprep.subr.bf16.mxu1 %v13286_v11  ;;  %10106 = vmatprep.mubr.msk.f32.mxu0 %vm11642_vm0, %v13285_v10 }
 0xe11   :  { %10117 = vmatprep.mubr.msk.f32.mxu1 %vm11642_vm0, %v13285_v10 }
 0xe12   :  { %11005 = vmatpush3.bf16.msk.msra.mxu0 %vm11971_vm14, %v11966_v39 }
 0xe13   :  { %11012 = vmatpush3.bf16.msk.msra.mxu1 %vm11971_vm14, %v13304_v7  ;;  %11013 = vmatprep.subr.bf16.mxu0 %v13286_v11 }
 0xe14   :  { %11020 = vmatprep.subr.bf16.mxu1 %v13286_v11 }
 0xed1   :  { %v6346_v0 = vpop.f32.mrb[76].mxu0 }
 0xed2   :  { %v8153_v16 = vmul.f32 -1.442695, %v6346_v0  ;;  %v6422_v55 = vpop.f32.mrb[76].mxu1  ;;  %v10046_v43 = vpop.f32.mrb[77].mxu0 }
 0xed3   :  { %v8156_v54 = vmul.f32 -1.442695, %v6422_v55  ;;  %v10063_v45 = vpop.f32.mrb[77].mxu1 }
 0xed4   :  { %11443 = vpow2.f32 %v8153_v16 }
 0xed5   :  { %11445 = vpow2.f32 %v8156_v54 }
 0xede   :  { %v11444_v1 = vpop.eup %11443 }
 0xedf   :  { %v11446_v2 = vpop.eup %11445  ;;  %v6353_v17 = vadd.f32 1.0, %v11444_v1  ;;  %v6498_v21 = vpop.f32.mrb[78].mxu0  ;;  %v6897_v1 = vsel %vm176_vm1, %v11778_v26, %v11776_v25  ;;  %vm7933_vm1 = vcmask 31744  }
 0xee0   :  { %v6429_v18 = vadd.f32 1.0, %v11446_v2  ;;  %11447 = vtanh.f32 %v6498_v21  ;;  %v6569_v23 = vpop.f32.mrb[78].mxu1  ;;  %v10080_v49 = vpop.f32.mrb[79].mxu0  ;;  %v6898_v21 = vsel %vm13310_vm2, %v11780_v27, %v6897_v1 }
 0xee1   :  { %11449 = vrcp.f32 %v6353_v17  ;;  %v8161_v3 = vmul.f32 -1.442695, %v6569_v23  ;;  %v10097_v29 = vpop.f32.mrb[79].mxu1  ;;  %v6586_v23 = vpop.permute.xlu1 %6585  ;;  %v6899_v49 = vsel %vm182_vm3, %v11785_v30, %v6898_v21 }
 0xee2   :  { %11451 = vrcp.f32 %v6429_v18  ;;  %v6900_v25 = vsel %vm185_vm4, %v11794_v33, %v6899_v49  ;;  %v6908_v30 = vpop.permute.xlu0 %6907 }
 0xee3   :  { %11453 = vpow2.f32 %v8161_v3  ;;  %v6901_v26 = vsel %vm188_vm5, %v11799_v35, %v6900_v25  ;;  %v6910_v33 = vsel %vm197_vm9, %v12708_v47, %v6908_v30 }
 0xee4   :  { %v6902_v27 = vsel %vm191_vm6, %v11803_v37, %v6901_v26 }
 0xee5   :  { %v6911_v35 = vsel %vm197_vm9, %v6902_v27, %v6908_v30 }
 0xeea   :  { %v11448_v61 = vpop.eup %11447 }
 0xeeb   :  { %v11450_v0 = vpop.eup %11449 }
 0xeec   :  { %v11452_v43 = vpop.eup %11451  ;;  %v6580_v55 = vmul.f32 %v11450_v0, %v11448_v61 }
 0xeed   :  { %v11454_v45 = vpop.eup %11453  ;;  %v6579_v16 = vmul.f32 %v11452_v43, %v12862_v32 }
 0xeee   :  { %v6576_v54 = vadd.f32 1.0, %v11454_v45 }
 0xeef   :  { %v13043_v7 = vadd.f32 %v6580_v55, %v6579_v16 }
 0xef0   :  { %11455 = vrcp.f32 %v6576_v54 }
 0xef1   :  { %11457 = vtanh.f32 %v13043_v7 }
 0xefa   :  { %v11456_v2 = vpop.eup %11455 }
 0xefb   :  { %v11458_v17 = vpop.eup %11457 }
 0xefc   :  { %v6583_v18 = vmul.f32 %v11458_v17, %v11456_v2 }
 0xefe   :  { %7226 = vrot.lane.b32.xlu1 %v6583_v18, %s11646_s9  ;;  %v6588_v32 = vsel %vm197_vm9, %v6583_v18, %v6586_v23 }
 0xeff   :  { %v6589_v3 = vsel %vm845_vm15, %v6588_v32, 1.0 }
 0xf00   :  { %10107 = vmatmul.mubr.msk.f32.vlgmr.msra.gmra.mrb[80].mxu0 %vm847_vm13, %v6589_v3  ;;  %10118 = vmatmul.mubr.msk.f32.vlgmr.msra.gmra.mrb[80].mxu1 %vm847_vm13, %v6589_v3 }
 0xf01   :  { %11015 = vmatpush3.bf16.msra.mxu0 %v11994_v24  ;;  %11022 = vmatpush3.bf16.msra.mxu1 %v11996_v44 }
 0xf02   :  { %11016 = vmatprep.subr.bf16.mxu0 %v13286_v11  ;;  %11023 = vmatprep.subr.bf16.mxu1 %v13286_v11 }
 0xf03   :  { %10128 = vmatprep.mubr.msk.f32.mxu0 %vm11642_vm0, %v13285_v10  ;;  %10139 = vmatprep.mubr.msk.f32.mxu1 %vm11642_vm0, %v13285_v10 }
 0xf05   :  { %11019 = vmatpush3.bf16.msk.msra.mxu0 %vm11971_vm14, %v12007_v58  ;;  %11026 = vmatpush3.bf16.msk.msra.mxu1 %vm11971_vm14, %v12009_v6 }
 0xf06   :  { %11027 = vmatprep.subr.bf16.mxu0 %v13286_v11  ;;  %11036 = vmatprep.subr.bf16.mxu1 %v13286_v11 }
 0xf08   :  { %10129 = vmatmul.mubr.msk.f32.vlgmr.msra.gmra.mrb[82].mxu0 %vm847_vm13, %v6589_v3  ;;  %10140 = vmatmul.mubr.msk.f32.vlgmr.msra.gmra.mrb[82].mxu1 %vm847_vm13, %v6589_v3 }
 0xf09   :  { %11029 = vmatpush3.bf16.msra.mxu0 %v11762_v5  ;;  %11038 = vmatpush3.bf16.msra.mxu1 %v11764_v9  ;;  %v6912_v5 = vsel %vm199_vm10, %v6910_v33, 1.0  ;;  %v6913_v9 = vsel %vm199_vm10, %v6911_v35, 1.0 }
 0xf0a   :  { %11030 = vmatprep.subr.bf16.mxu0 %v13286_v11  ;;  %11039 = vmatprep.subr.bf16.mxu1 %v13286_v11  ;;  %v6916_v37 = vrot.slane %v6912_v5, 7  ;;  %v6917_v47 = vrot.slane %v6913_v9, 7 }
 0xf0b   :  { %10156 = vmatprep.mubr.msk.f32.mxu0 %vm11642_vm0, %v13285_v10  ;;  %10173 = vmatprep.mubr.msk.f32.mxu1 %vm11642_vm0, %v13285_v10 }
 0xf0d   :  { %11032 = vmatpush3.bf16.msra.mxu0 %v11767_v12  ;;  %11041 = vmatpush3.bf16.msra.mxu1 %v11771_v15  ;;  %v6918_v12 = vsel %vm205_vm8, %v6916_v37, %v6917_v47  ;;  %v13317_v15 = vld [vmem:[#allocation12_spill] sm:$0xff] }
 0xf0e   :  { %11033 = vmatprep.subr.bf16.mxu0 %v13286_v11  ;;  %11042 = vmatprep.subr.bf16.mxu1 %v13286_v11 }
 0xf11   :  { %11035 = vmatpush3.bf16.msra.mxu0 %v11783_v28  ;;  %11044 = vmatpush3.bf16.msra.mxu1 %v11789_v31  ;;  %v13318_v28 = vld [vmem:[#allocation13_spill] sm:$0xff]  ;;  %v13319_v31 = vld [vmem:[#allocation14_spill] sm:$0xff] }
 0xf12   :  { %10154 = vmatprep.subr.mxu0 %v13285_v10  ;;  %10171 = vmatprep.subr.mxu1 %v13285_v10 }
 0xf15   :  { %10155 = vmatpush3.msk.msra.mxu0 %vm205_vm8, %v12749_v34  ;;  %10172 = vmatpush3.msk.msra.mxu1 %vm205_vm8, %v12753_v46 }
 0xf16   :  { %10157 = vmatmul.mubr.msk.f32.vlgmr.msra.gmra.mrb[84].mxu0 %vm201_vm11, %v6918_v12  ;;  %10174 = vmatmul.mubr.msk.f32.vlgmr.msra.gmra.mrb[84].mxu1 %vm201_vm11, %v6918_v12 }
 0xf17   :  { %11045 = vmatprep.subr.bf16.mxu0 %v13286_v11  ;;  %11054 = vmatprep.subr.bf16.mxu1 %v13286_v11 }
 0xf18   :  { %11047 = vmatpush3.bf16.msra.mxu0 %v11821_v48  ;;  %11056 = vmatpush3.bf16.msra.mxu1 %v11826_v50  ;;  %v13320_v48 = vld [vmem:[#allocation15_spill] sm:$0xff]  ;;  %v13321_v50 = vld [vmem:[#allocation16_spill] sm:$0xff] }
 0xf19   :  { %11048 = vmatprep.subr.bf16.mxu0 %v13286_v11  ;;  %11057 = vmatprep.subr.bf16.mxu1 %v13286_v11 }
 0xf1a   :  { %10190 = vmatprep.mubr.msk.f32.mxu0 %vm11642_vm0, %v13285_v10  ;;  %10207 = vmatprep.mubr.msk.f32.mxu1 %vm11642_vm0, %v13285_v10 }
 0xf1c   :  { %11050 = vmatpush3.bf16.msra.mxu0 %v11836_v56  ;;  %11059 = vmatpush3.bf16.msra.mxu1 %v11840_v57  ;;  %v13322_v56 = vld [vmem:[#allocation17_spill] sm:$0xff] }
 0xf1d   :  { %11051 = vmatprep.subr.bf16.mxu0 %v13286_v11  ;;  %11060 = vmatprep.subr.bf16.mxu1 %v13286_v11 }
 0xf20   :  { %11053 = vmatpush3.bf16.msra.mxu0 %v11848_v62  ;;  %11062 = vmatpush3.bf16.msra.mxu1 %v11852_v63 }
 0xf21   :  { %10188 = vmatprep.subr.mxu0 %v13285_v10  ;;  %10205 = vmatprep.subr.mxu1 %v13285_v10 }
 0xf24   :  { %10189 = vmatpush3.msk.msra.mxu0 %vm205_vm8, %v12946_v41  ;;  %10206 = vmatpush3.msk.msra.mxu1 %vm205_vm8, %v12950_v4 }
 0xf25   :  { %10191 = vmatmul.mubr.msk.f32.vlgmr.msra.gmra.mrb[86].mxu0 %vm201_vm11, %v6918_v12  ;;  %10208 = vmatmul.mubr.msk.f32.vlgmr.msra.gmra.mrb[86].mxu1 %vm201_vm11, %v6918_v12 }
 0xf26   :  { %11063 = vmatprep.subr.bf16.mxu0 %v13286_v11  ;;  %11072 = vmatprep.subr.bf16.mxu1 %v13286_v11 }
 0xf27   :  { %11065 = vmatpush3.bf16.msra.mxu0 %v11875_v8  ;;  %11074 = vmatpush3.bf16.msra.mxu1 %v11877_v14 }
 0xf28   :  { %11066 = vmatprep.subr.bf16.mxu0 %v13286_v11  ;;  %11075 = vmatprep.subr.bf16.mxu1 %v13286_v11 }
 0xf29   :  { %10224 = vmatprep.mubr.msk.f32.mxu0 %vm11642_vm0, %v13285_v10  ;;  %10241 = vmatprep.mubr.msk.f32.mxu1 %vm11642_vm0, %v13285_v10 }
 0xf2b   :  { %11068 = vmatpush3.bf16.msra.mxu0 %v13317_v15  ;;  %11077 = vmatpush3.bf16.msra.mxu1 %v13318_v28 }
 0xf2c   :  { %11069 = vmatprep.subr.bf16.mxu0 %v13286_v11  ;;  %11078 = vmatprep.subr.bf16.mxu1 %v13286_v11 }
 0xf2f   :  { %11071 = vmatpush3.bf16.msra.mxu0 %v13319_v31  ;;  %11080 = vmatpush3.bf16.msra.mxu1 %v13320_v48 }
 0xf30   :  { %10222 = vmatprep.subr.mxu0 %v13285_v10  ;;  %10239 = vmatprep.subr.mxu1 %v13285_v10 }
 0xf33   :  { %10223 = vmatpush3.msk.msra.mxu0 %vm205_vm8, %v13321_v50  ;;  %10240 = vmatpush3.msk.msra.mxu1 %vm205_vm8, %v13322_v56 }
 0xf34   :  { %11081 = vmatprep.subr.bf16.mxu0 %v13286_v11  ;;  %11090 = vmatprep.subr.bf16.mxu1 %v13286_v11 }
 0xfd3   :  { %v6659_v57 = vpop.f32.mrb[80].mxu0  ;;  %v6735_v62 = vpop.f32.mrb[80].mxu1 }
 0xfd4   :  { %v8164_v63 = vmul.f32 -1.442695, %v6659_v57  ;;  %v8167_v8 = vmul.f32 -1.442695, %v6735_v62  ;;  %v10108_v14 = vpop.f32.mrb[81].mxu0  ;;  %v10119_v34 = vpop.f32.mrb[81].mxu1 }
 0xfd6   :  { %11459 = vpow2.f32 %v8164_v63 }
 0xfd7   :  { %11461 = vpow2.f32 %v8167_v8 }
 0xfdb   :  { %v6811_v46 = vpop.f32.mrb[82].mxu0  ;;  %v6882_v41 = vpop.f32.mrb[82].mxu1 }
 0xfdc   :  { %v10130_v4 = vpop.f32.mrb[83].mxu0  ;;  %v10141_v29 = vpop.f32.mrb[83].mxu1  ;;  %v8172_v61 = vmul.f32 -1.442695, %v6882_v41 }
 0xfdd   :  { %v7227_v4 = vpop.permute.xlu1 %7226 }
 0xfde   :  { %11463 = vpow2.f32 %v8172_v61 }
 0xfdf   :  { %11465 = vtanh.f32 %v6811_v46 }
 0xfe0   :  { %v11460_v0 = vpop.eup %11459 }
 0xfe1   :  { %v11462_v43 = vpop.eup %11461  ;;  %v6666_v55 = vadd.f32 1.0, %v11460_v0 }
 0xfe2   :  { %v6742_v45 = vadd.f32 1.0, %v11462_v43 }
 0xfe3   :  { %11467 = vrcp.f32 %v6666_v55 }
 0xfe4   :  { %11469 = vrcp.f32 %v6742_v45 }
 0xfe8   :  { %v11464_v18 = vpop.eup %11463 }
 0xfe9   :  { %v6987_v16 = vpop.f32.mrb[84].mxu0  ;;  %v7063_v54 = vpop.f32.mrb[84].mxu1  ;;  %v6889_v25 = vadd.f32 1.0, %v11464_v18 }
 0xfea   :  { %v8175_v1 = vmul.f32 -1.442695, %v6987_v16  ;;  %v8178_v2 = vmul.f32 -1.442695, %v7063_v54  ;;  %v10158_v17 = vpop.f32.mrb[85].mxu0  ;;  %v10175_v21 = vpop.f32.mrb[85].mxu1 }
 0xfeb   :  { %v11466_v23 = vpop.eup %11465 }
 0xfec   :  { %11471 = vpow2.f32 %v8175_v1 }
 0xfed   :  { %v11468_v32 = vpop.eup %11467  ;;  %11473 = vpow2.f32 %v8178_v2 }
 0xfee   :  { %v11470_v49 = vpop.eup %11469  ;;  %v6893_v3 = vmul.f32 %v11468_v32, %v11466_v23  ;;  %11475 = vrcp.f32 %v6889_v25 }
 0xfef   :  { %v6892_v26 = vmul.f32 %v11470_v49, %v12985_v19 }
 0xff1   :  { %v13159_v27 = vadd.f32 %v6893_v3, %v6892_v26 }
 0xff3   :  { %11477 = vtanh.f32 %v13159_v27 }
 0xff6   :  { %v11472_v30 = vpop.eup %11471 }
 0xff7   :  { %v11474_v33 = vpop.eup %11473  ;;  %v6994_v35 = vadd.f32 1.0, %v11472_v30 }
 0xff8   :  { %v7070_v5 = vadd.f32 1.0, %v11474_v33  ;;  %v7139_v9 = vpop.f32.mrb[86].mxu0  ;;  %v7210_v37 = vpop.f32.mrb[86].mxu1 }
 0xff9   :  { %11479 = vrcp.f32 %v6994_v35  ;;  %v8183_v47 = vmul.f32 -1.442695, %v7210_v37  ;;  %v10192_v12 = vpop.f32.mrb[87].mxu0  ;;  %v10209_v15 = vpop.f32.mrb[87].mxu1 }
 0xffa   :  { %11481 = vrcp.f32 %v7070_v5  ;;  %v11476_v28 = vpop.eup %11475 }
 0xffb   :  { %11483 = vtanh.f32 %v7139_v9 }
 0xffc   :  { %11485 = vpow2.f32 %v8183_v47 }
 0xffd   :  { %v11478_v19 = vpop.eup %11477 }
 0xffe   :  { %v6896_v31 = vmul.f32 %v11478_v19, %v11476_v28 }
0x1000   :  { %7539 = vrot.lane.b32.xlu0 %v6896_v31, %s11644_s3 }
0x1003   :  { %v11480_v48 = vpop.eup %11479 }
0x1004   :  { %v11482_v50 = vpop.eup %11481 }
0x1005   :  { %v11484_v56 = vpop.eup %11483  ;;  %v7220_v57 = vmul.f32 %v11482_v50, %v12990_v36 }
0x1006   :  { %v11486_v62 = vpop.eup %11485  ;;  %v7221_v63 = vmul.f32 %v11484_v56, %v11480_v48 }
0x1007   :  { %v7217_v8 = vadd.f32 1.0, %v11486_v62 }
0x1008   :  { %v7222_v14 = vadd.f32 %v7221_v63, %v7220_v57 }
0x1009   :  { %11487 = vrcp.f32 %v7217_v8 }
0x100a   :  { %11489 = vtanh.f32 %v7222_v14 }
0x1013   :  { %v11488_v34 = vpop.eup %11487 }
0x1014   :  { %v11490_v46 = vpop.eup %11489 }
0x1015   :  { %v7224_v41 = vmul.f32 %v11490_v46, %v11488_v34  ;;  %v8206_v34 = vld [vmem:[%s13247_s5] ss:$0 sm:$0xff] }
0x1017   :  { %v7229_v29 = vsel %vm522_vm12, %v7224_v41, %v7227_v4 }
0x1018   :  { %v7230_v61 = vsel %vm199_vm10, %v7229_v29, 1.0 }
0x1019   :  { %10225 = vmatmul.mubr.msk.f32.vlgmr.msra.gmra.mrb[88].mxu0 %vm201_vm11, %v7230_v61  ;;  %10242 = vmatmul.mubr.msk.f32.vlgmr.msra.gmra.mrb[88].mxu1 %vm201_vm11, %v7230_v61 }
0x101a   :  { %11083 = vmatpush3.bf16.msra.mxu0 %v11912_v38  ;;  %11092 = vmatpush3.bf16.msra.mxu1 %v11915_v42  ;;  %v13323_v38 = vld [vmem:[#allocation18_spill] sm:$0xff] }
0x101b   :  { %11084 = vmatprep.subr.bf16.mxu0 %v13286_v11  ;;  %11093 = vmatprep.subr.bf16.mxu1 %v13286_v11 }
0x101c   :  { %10258 = vmatprep.mubr.msk.f32.mxu0 %vm11642_vm0, %v13285_v10  ;;  %10275 = vmatprep.mubr.msk.f32.mxu1 %vm11642_vm0, %v13285_v10 }
0x101e   :  { %11086 = vmatpush3.bf16.msra.mxu0 %v11922_v51  ;;  %11095 = vmatpush3.bf16.msra.mxu1 %v11926_v52 }
0x101f   :  { %11087 = vmatprep.subr.bf16.mxu0 %v13286_v11  ;;  %11096 = vmatprep.subr.bf16.mxu1 %v13286_v11 }
0x1022   :  { %11089 = vmatpush3.bf16.msra.mxu0 %v11934_v59  ;;  %11098 = vmatpush3.bf16.msra.mxu1 %v11938_v60 }
0x1023   :  { %10256 = vmatprep.subr.mxu0 %v13285_v10  ;;  %10273 = vmatprep.subr.mxu1 %v13285_v10 }
0x1026   :  { %10257 = vmatpush3.msk.msra.mxu0 %vm205_vm8, %v13014_v20  ;;  %10274 = vmatpush3.msk.msra.mxu1 %vm205_vm8, %v13018_v53 }
0x1027   :  { %10259 = vmatmul.mubr.msk.f32.vlgmr.msra.gmra.mrb[90].mxu0 %vm201_vm11, %v7230_v61  ;;  %10276 = vmatmul.mubr.msk.f32.vlgmr.msra.gmra.mrb[90].mxu1 %vm201_vm11, %v7230_v61 }
0x1028   :  { %11099 = vmatprep.subr.bf16.mxu0 %v13286_v11  ;;  %11106 = vmatprep.subr.bf16.mxu1 %v13286_v11 }
0x1029   :  { %11101 = vmatpush3.bf16.msra.mxu0 %v11961_v13  ;;  %11108 = vmatpush3.bf16.msra.mxu1 %v11963_v22 }
0x102a   :  { %11102 = vmatprep.subr.bf16.mxu0 %v13286_v11  ;;  %11109 = vmatprep.subr.bf16.mxu1 %v13286_v11 }
0x102b   :  { %10286 = vmatprep.mubr.msk.f32.mxu0 %vm11642_vm0, %v13285_v10  ;;  %10297 = vmatprep.mubr.msk.f32.mxu1 %vm11642_vm0, %v13285_v10 }
0x102d   :  { %11105 = vmatpush3.bf16.msk.msra.mxu0 %vm11971_vm14, %v11966_v39  ;;  %11112 = vmatpush3.bf16.msk.msra.mxu1 %vm11971_vm14, %v13323_v38 }
0x102e   :  { %11113 = vmatprep.subr.bf16.mxu0 %v13286_v11  ;;  %11120 = vmatprep.subr.bf16.mxu1 %v13286_v11 }
0x1072   :  { %v7540_v25 = vpop.permute.xlu0 %7539 }
0x10ec   :  { %v7300_v42 = vpop.f32.mrb[88].mxu0  ;;  %v7376_v51 = vpop.f32.mrb[88].mxu1 }
0x10ed   :  { %v8186_v52 = vmul.f32 -1.442695, %v7300_v42  ;;  %v8189_v59 = vmul.f32 -1.442695, %v7376_v51  ;;  %v10226_v60 = vpop.f32.mrb[89].mxu0  ;;  %v10243_v13 = vpop.f32.mrb[89].mxu1 }
0x10ef   :  { %11491 = vpow2.f32 %v8186_v52 }
0x10f0   :  { %11493 = vpow2.f32 %v8189_v59 }
0x10f9   :  { %v11492_v22 = vpop.eup %11491 }
0x10fa   :  { %v11494_v36 = vpop.eup %11493  ;;  %v7307_v20 = vadd.f32 1.0, %v11492_v22  ;;  %v7452_v39 = vpop.f32.mrb[90].mxu0 }
0x10fb   :  { %v7523_v53 = vpop.f32.mrb[90].mxu1  ;;  %v7383_v0 = vadd.f32 1.0, %v11494_v36  ;;  %11495 = vtanh.f32 %v7452_v39  ;;  %v10260_v55 = vpop.f32.mrb[91].mxu0 }
0x10fc   :  { %v8194_v43 = vmul.f32 -1.442695, %v7523_v53  ;;  %v10277_v45 = vpop.f32.mrb[91].mxu1  ;;  %11497 = vrcp.f32 %v7307_v20 }
0x10fd   :  { %11499 = vrcp.f32 %v7383_v0 }
0x10fe   :  { %11501 = vpow2.f32 %v8194_v43 }
0x1105   :  { %v11496_v16 = vpop.eup %11495 }
0x1106   :  { %v11498_v54 = vpop.eup %11497 }
0x1107   :  { %v11500_v1 = vpop.eup %11499  ;;  %v7534_v2 = vmul.f32 %v11498_v54, %v11496_v16 }
0x1108   :  { %v11502_v17 = vpop.eup %11501  ;;  %v7533_v21 = vmul.f32 %v11500_v1, %v13043_v7 }
0x1109   :  { %v7530_v18 = vadd.f32 1.0, %v11502_v17 }
0x110a   :  { %v7535_v23 = vadd.f32 %v7534_v2, %v7533_v21 }
0x110b   :  { %11503 = vrcp.f32 %v7530_v18 }
0x110c   :  { %11505 = vtanh.f32 %v7535_v23 }
0x1115   :  { %v11504_v32 = vpop.eup %11503 }
0x1116   :  { %v11506_v49 = vpop.eup %11505 }
0x1117   :  { %v7537_v3 = vmul.f32 %v11506_v49, %v11504_v32 }
0x1119   :  { %v7542_v26 = vsel %vm197_vm9, %v7537_v3, %v7540_v25 }
0x111a   :  { %v7543_v30 = vsel %vm845_vm15, %v7542_v26, 1.0 }
0x111b   :  { %10287 = vmatmul.mubr.msk.f32.vlgmr.msra.gmra.mrb[92].mxu0 %vm847_vm13, %v7543_v30  ;;  %10298 = vmatmul.mubr.msk.f32.vlgmr.msra.gmra.mrb[92].mxu1 %vm847_vm13, %v7543_v30 }
0x111c   :  { %11115 = vmatpush3.bf16.msra.mxu0 %v11994_v24  ;;  %11122 = vmatpush3.bf16.msra.mxu1 %v11996_v44  ;;  %v7851_v24 = vld [vmem:[%s13246_s4] sm:$0xff] }
0x111d   :  { %11116 = vmatprep.subr.bf16.mxu0 %v13286_v11  ;;  %11123 = vmatprep.subr.bf16.mxu1 %v13286_v11 }
0x111e   :  { %10308 = vmatprep.mubr.msk.f32.mxu0 %vm11642_vm0, %v13285_v10  ;;  %10319 = vmatprep.mubr.msk.f32.mxu1 %vm11642_vm0, %v13285_v10 }
0x1120   :  { %11119 = vmatpush3.bf16.msk.msra.mxu0 %vm11971_vm14, %v12007_v58  ;;  %11126 = vmatpush3.bf16.msk.msra.mxu1 %vm11971_vm14, %v12009_v6 }
0x1121   :  { %10322 = vmatprep.subr.mxu0 %v13285_v10 }
0x1123   :  { %10309 = vmatmul.mubr.msk.f32.vlgmr.msra.gmra.mrb[94].mxu0 %vm847_vm13, %v7543_v30  ;;  %10320 = vmatmul.mubr.msk.f32.vlgmr.msra.gmra.mrb[94].mxu1 %vm847_vm13, %v7543_v30 }
0x1124   :  { %10324 = vmatprep.mubr.msk.f32.mxu0 %vm11642_vm0, %v13285_v10  ;;  %10323 = vmatpush3.msra.mxu0 %v7851_v24  ;;  %vm7859_vm0 = vcmask 64512  }
0x11ee   :  { %v7613_v44 = vpop.f32.mrb[92].mxu0  ;;  %v7689_v58 = vpop.f32.mrb[92].mxu1 }
0x11ef   :  { %v8197_v11 = vmul.f32 -1.442695, %v7613_v44  ;;  %v8200_v7 = vmul.f32 -1.442695, %v7689_v58  ;;  %v10288_v40 = vpop.f32.mrb[93].mxu0  ;;  %v10299_v6 = vpop.f32.mrb[93].mxu1 }
0x11f1   :  { %11507 = vpow2.f32 %v8197_v11 }
0x11f2   :  { %11509 = vpow2.f32 %v8200_v7 }
0x11f6   :  { %v7765_v33 = vpop.f32.mrb[94].mxu0  ;;  %v7836_v35 = vpop.f32.mrb[94].mxu1 }
0x11f7   :  { %v10310_v5 = vpop.f32.mrb[95].mxu0  ;;  %v10321_v9 = vpop.f32.mrb[95].mxu1  ;;  %v8205_v37 = vmul.f32 -1.442695, %v7836_v35 }
0x11f9   :  { %11511 = vpow2.f32 %v8205_v37 }
0x11fa   :  { %11513 = vtanh.f32 %v7765_v33 }
0x11fb   :  { %v11508_v47 = vpop.eup %11507 }
0x11fc   :  { %v11510_v10 = vpop.eup %11509  ;;  %v7620_v12 = vadd.f32 1.0, %v11508_v47 }
0x11fd   :  { %v7696_v15 = vadd.f32 1.0, %v11510_v10 }
0x11fe   :  { %11515 = vrcp.f32 %v7620_v12 }
0x11ff   :  { %11517 = vrcp.f32 %v7696_v15 }
0x1203   :  { %v11512_v28 = vpop.eup %11511 }
0x1204   :  { %v11514_v19 = vpop.eup %11513  ;;  %v7843_v56 = vadd.f32 1.0, %v11512_v28 }
0x1206   :  { %11519 = vrcp.f32 %v7843_v56 }
0x1208   :  { %v11516_v31 = vpop.eup %11515 }
0x1209   :  { %v11518_v48 = vpop.eup %11517  ;;  %v7847_v50 = vmul.f32 %v11516_v31, %v11514_v19 }
0x120a   :  { %v7846_v57 = vmul.f32 %v11518_v48, %v13159_v27 }
0x120c   :  { %v7848_v62 = vadd.f32 %v7847_v50, %v7846_v57 }
0x120e   :  { %11521 = vtanh.f32 %v7848_v62 }
0x1210   :  { %v11520_v63 = vpop.eup %11519 }
0x1218   :  { %v11522_v8 = vpop.eup %11521 }
0x1219   :  { %v7850_v14 = vmul.f32 %v11522_v8, %v11520_v63 }
0x121b   :  { %10325 = vmatmul.mubr.msk.f32.vlgmr.msra.gmra.mrb[96].mxu0 %vm7859_vm0, %v7850_v14 }
0x12ee   :  { %v7929_v46 = vpop.f32.mrb[96].mxu0 }
0x12ef   :  { %v7930_v41 = vadd.f32 %v8206_v34, %v7929_v46  ;;  %v10326_v4 = vpop.f32.mrb[97].mxu0 }
0x12f1   :  { %7934 = vst.msk [vmem:[%s13248_s6] sm:$0xff] %vm7933_vm1, %v7930_v41 }
0x12f2   :  { %7939 = vsyncpa [#allocation3], 1 }
0x12f3   :  { %7940 = vsyncpa [#allocation5], 1 }
0x12f4   :  { %7941 = vsyncpa [#allocation8], 1 }

</bundles_post_ra>
